<compile_context>
chip_gen: v5e
topology: v5e:2x2
jax: 0.10.0
libtpu: 0.0.40
codegen_flags: <defaults>
</compile_context>

<pallas_src>
import functools

import jax
import jax.numpy as jnp
from jax.experimental import pallas as pl
from jax.experimental.pallas import tpu as pltpu


def _round_up(x, m):
    return (x + m - 1) // m * m


# ----------------------- Pallas matmul + bias (+ReLU) -----------------------
def _matmul_bias_kernel(a_ref, b_ref, bias_ref, o_ref, acc_ref, *, apply_relu):
    @pl.when(pl.program_id(2) == 0)
    def _():
        acc_ref[...] = jnp.zeros_like(acc_ref)

    acc_ref[...] += jnp.dot(a_ref[...], b_ref[...],
                            preferred_element_type=jnp.float32)

    @pl.when(pl.program_id(2) == pl.num_programs(2) - 1)
    def _():
        r = acc_ref[...] + bias_ref[...]
        if apply_relu:
            r = jnp.maximum(r, 0.0)
        o_ref[...] = r.astype(o_ref.dtype)


def matmul_bias(a, b, bias, *, relu=False, tm=128, use_bf16=True):
    """relu?(a @ b + bias).  a:(M,K) b:(K,N) bias:(N,).  bf16 MXU operands, f32 accumulate."""
    M, K = a.shape
    K2, N = b.shape
    assert K == K2
    tm = min(tm, _round_up(M, 8))
    tn = 128
    tk = min(_round_up(K, 128), 1024)          # match K; avoid gratuitous zero K-padding
    Mp, Kp, Np = _round_up(M, tm), _round_up(K, tk), _round_up(N, tn)
    op_dtype = jnp.bfloat16 if use_bf16 else jnp.float32
    a_p = jnp.pad(a.astype(op_dtype), ((0, Mp - M), (0, Kp - K)))
    b_p = jnp.pad(b.astype(op_dtype), ((0, Kp - K), (0, Np - N)))
    bias_p = jnp.pad(bias.astype(jnp.float32), ((0, Np - N),)).reshape(1, Np)

    grid = (Mp // tm, Np // tn, Kp // tk)
    out = pl.pallas_call(
        functools.partial(_matmul_bias_kernel, apply_relu=relu),
        out_shape=jax.ShapeDtypeStruct((Mp, Np), jnp.float32),
        grid_spec=pltpu.PrefetchScalarGridSpec(
            num_scalar_prefetch=0,
            grid=grid,
            in_specs=[
                pl.BlockSpec((tm, tk), lambda i, j, k: (i, k)),
                pl.BlockSpec((tk, tn), lambda i, j, k: (k, j)),
                pl.BlockSpec((1, tn), lambda i, j, k: (0, j)),
            ],
            out_specs=pl.BlockSpec((tm, tn), lambda i, j, k: (i, j)),
            scratch_shapes=[pltpu.VMEM((tm, tn), jnp.float32)],
        ),
        compiler_params=pltpu.CompilerParams(
            dimension_semantics=("parallel", "parallel", "arbitrary")),
    )(a_p, b_p, bias_p)
    return out[:M, :N]


# --------------------------------- Conv2d ----------------------------------
def conv2d(x, w_mat, bias, *, kh, kw, stride, pad, relu, tm=128):
    """x: (N,C,H,W).  w_mat: (C*kh*kw, O), pre-reshaped from PyTorch (O,C,kh,kw).  bias: (O,)."""
    N, C, H, W = x.shape
    O = w_mat.shape[1]
    xp = jnp.pad(x, ((0, 0), (0, 0), (pad, pad), (pad, pad)))
    Ho = (H + 2 * pad - kh) // stride + 1
    Wo = (W + 2 * pad - kw) // stride + 1
    cols = []
    for di in range(kh):
        for dj in range(kw):
            cols.append(jax.lax.slice(
                xp, (0, 0, di, dj),
                (N, C, di + stride * (Ho - 1) + 1, dj + stride * (Wo - 1) + 1),
                (1, 1, stride, stride)))
    pat = jnp.stack(cols, axis=-1)                 # (N, C, Ho, Wo, kh*kw)
    pat = jnp.transpose(pat, (0, 2, 3, 1, 4))      # (N, Ho, Wo, C, kh*kw)
    a = pat.reshape(N * Ho * Wo, C * kh * kw)      # feature order (c, di, dj) == weight order
    y = matmul_bias(a, w_mat, bias, relu=relu, tm=tm)
    y = y.reshape(N, Ho, Wo, O)
    return jnp.transpose(y, (0, 3, 1, 2))          # back to NCHW


# ------------------------------- MaxPool2d ---------------------------------
def _maxpool_kernel(x_ref, o_ref, *, apply_relu):
    m = jnp.max(x_ref[...], axis=1, keepdims=True)     # reduce over the k*k taps
    if apply_relu:
        m = jnp.maximum(m, 0.0)
    o_ref[...] = m


def maxpool2d(x, *, k, stride, pad, relu, lane_tile=2048):
    """nn.MaxPool2d(k, stride, pad) (+ fused ReLU) on NCHW input."""
    N, C, H, W = x.shape
    Ho = (H + 2 * pad - k) // stride + 1
    Wo = (W + 2 * pad - k) // stride + 1
    neg = -3.0e38                                   # maxpool padding value (acts like -inf)
    xp = jnp.pad(x, ((0, 0), (0, 0), (pad, pad), (pad, pad)), constant_values=neg)
    taps = []
    for di in range(k):
        for dj in range(k):
            taps.append(jax.lax.slice(
                xp, (0, 0, di, dj),
                (N, C, di + stride * (Ho - 1) + 1, dj + stride * (Wo - 1) + 1),
                (1, 1, stride, stride)))
    T = k * k
    L = C * Ho * Wo
    stacked = jnp.stack(taps, axis=1).reshape(N, T, L)   # lane-dense: C*Ho*Wo on lanes
    TL = min(lane_tile, _round_up(L, 128))
    Lp = _round_up(L, TL)
    stacked = jnp.pad(stacked, ((0, 0), (0, 0), (0, Lp - L)), constant_values=neg)
    out = pl.pallas_call(
        functools.partial(_maxpool_kernel, apply_relu=relu),
        out_shape=jax.ShapeDtypeStruct((N, 1, Lp), jnp.float32),
        grid=(N, Lp // TL),
        in_specs=[pl.BlockSpec((1, T, TL), lambda n, l: (n, 0, l))],
        out_specs=pl.BlockSpec((1, 1, TL), lambda n, l: (n, 0, l)),
        compiler_params=pltpu.CompilerParams(
            dimension_semantics=("parallel", "parallel")),
    )(stacked)
    return out[:, 0, :L].reshape(N, C, Ho, Wo)


# ------------------------------ CBAM kernels --------------------------------
def _sigmoid(z):
    return 1.0 / (1.0 + jnp.exp(-z))


def _cam_kernel(x_ref, w1_ref, b1_ref, w2_ref, b2_ref, xc_ref, sam_ref):
    """Fused CBAM channel attention + spatial-attention input maps.

    x: (B, C, HW)   w1,w2: (1, C, Cr)   b1: (1, 1, Cr)   b2: (1, C, 1)
    xc_out  (B, C, HW) = x * sigmoid(mlp(avgpool) + mlp(maxpool))
    sam_out (B, 2, HW) = [mean_c(xc), max_c(xc)]
    """
    x = x_ref[...]
    w1 = w1_ref[...]
    b1 = b1_ref[...]
    w2 = w2_ref[...]
    b2 = b2_ref[...]

    def mlp(s):                                              # s: (B, C, 1)
        h = jnp.sum(s * w1, axis=1, keepdims=True) + b1      # (B, 1, Cr)
        h = jnp.maximum(h, 0.0)
        return jnp.sum(h * w2, axis=-1, keepdims=True) + b2  # (B, C, 1)

    s_avg = jnp.mean(x, axis=-1, keepdims=True)              # AdaptiveAvgPool2d(1)
    s_max = jnp.max(x, axis=-1, keepdims=True)               # AdaptiveMaxPool2d(1)
    gate = _sigmoid(mlp(s_avg) + mlp(s_max))                 # (B, C, 1)
    xc = x * gate
    xc_ref[...] = xc
    sam_ref[:, 0:1, :] = jnp.mean(xc, axis=1, keepdims=True)
    sam_ref[:, 1:2, :] = jnp.max(xc, axis=1, keepdims=True)


def _sam_gate_kernel(y1_ref, xc_ref, logit_ref, o_ref):
    """out = relu(y1 + xc * sigmoid(spatial_logits))   (SAM gate + residual + ReLU)."""
    g = _sigmoid(logit_ref[...])                             # (B, 1, HW), broadcast over C
    o_ref[...] = jnp.maximum(y1_ref[...] + xc_ref[...] * g, 0.0)


# ------------------------------ CBAM_CNN model -------------------------------
def init_params(key, num_classes=9):
    ks = jax.random.split(key, 16)
    r = lambda k, shp, s: s * jax.random.normal(k, shp, jnp.float32)
    # PyTorch-shaped tensors
    c1w = r(ks[0], (8, 3, 4, 4), 0.1);     c1b = r(ks[1], (8,), 0.1)
    c2w = r(ks[2], (16, 8, 4, 4), 0.1);    c2b = r(ks[3], (16,), 0.1)
    w1 = r(ks[4], (4, 16), 0.3);           b1 = r(ks[5], (4,), 0.3)    # CAM Linear(16,4)
    w2 = r(ks[6], (16, 4), 0.3);           b2 = r(ks[7], (16,), 0.3)   # CAM Linear(4,16)
    samw = r(ks[8], (1, 2, 3, 3), 0.3)                                  # SAM Conv2d(2,1,3,p=1)
    f1w = r(ks[9], (128, 16 * 196), 0.02); f1b = r(ks[10], (128,), 0.02)
    f2w = r(ks[11], (num_classes, 128), 0.05); f2b = r(ks[12], (num_classes,), 0.05)
    # Pre-reshape / pre-transpose ONCE into kernel-ready layouts (no per-call .T under jit).
    return {
        "c1w": c1w.reshape(8, -1).T,            # (48, 8)
        "c1b": c1b,
        "c2w": c2w.reshape(16, -1).T,           # (128, 16)
        "c2b": c2b,
        "caw1": jnp.transpose(w1)[None],        # (1, 16, 4)
        "cab1": b1.reshape(1, 1, 4),
        "caw2": w2[None],                       # (1, 16, 4)
        "cab2": b2.reshape(1, 16, 1),
        "samw": samw.reshape(1, -1).T,          # (18, 1)
        "fc1w": jnp.transpose(f1w),             # (3136, 128)
        "fc1b": f1b,
        "fc2w": jnp.transpose(f2w),             # (128, num_classes)
        "fc2b": f2b,
    }


def cbam_cnn_forward(x, p):
    """CBAM_CNN forward on NCHW float32 input (N, 3, 224, 224) -> (N, num_classes)."""
    # conv1 Sequential: Conv(3->8,4,2,1)+ReLU, MaxPool(4,2,1)+ReLU, Conv(8->16,4,2)+ReLU, MaxPool(5,2,2)+ReLU
    y = conv2d(x, p["c1w"], p["c1b"], kh=4, kw=4, stride=2, pad=1, relu=True, tm=256)
    y = maxpool2d(y, k=4, stride=2, pad=1, relu=True)
    y = conv2d(y, p["c2w"], p["c2b"], kh=4, kw=4, stride=2, pad=0, relu=True, tm=256)
    y1 = maxpool2d(y, k=5, stride=2, pad=2, relu=True)            # (N, 16, 14, 14)

    N, C, H, W = y1.shape
    HW = H * W
    y1f = y1.reshape(N, C, HW)

    # CBAM channel attention (fused Pallas kernel): gated features + [mean_c, max_c] maps.
    xc, sam_maps = pl.pallas_call(
        _cam_kernel,
        out_shape=(jax.ShapeDtypeStruct((N, C, HW), jnp.float32),
                   jax.ShapeDtypeStruct((N, 2, HW), jnp.float32)),
    )(y1f, p["caw1"], p["cab1"], p["caw2"], p["cab2"])

    # CBAM spatial attention: 3x3 conv (pad=1, no bias) over the 2 pooled maps.
    logits = conv2d(sam_maps.reshape(N, 2, H, W), p["samw"],
                    jnp.zeros((1,), jnp.float32),
                    kh=3, kw=3, stride=1, pad=1, relu=False, tm=128)   # (N, 1, H, W)

    # y2 = cbam(y1); out = relu(y1 + y2)  (fused gate + residual + ReLU kernel)
    yg = pl.pallas_call(
        _sam_gate_kernel,
        out_shape=jax.ShapeDtypeStruct((N, C, HW), jnp.float32),
    )(y1f, xc, logits.reshape(N, 1, HW))

    # classifier: reshape(-1, 16*196) in PyTorch NCHW order, then Linear -> Linear (no act.)
    flat = yg.reshape(N, C * HW)
    h = matmul_bias(flat, p["fc1w"], p["fc1b"], relu=False, tm=8)
    out = matmul_bias(h, p["fc2w"], p["fc2b"], relu=False, tm=8)
    return out


if __name__ == "__main__":
    key = jax.random.PRNGKey(0)
    kx, kp = jax.random.split(key)
    # The module's hard-coded 16*196 flatten implies a 224x224 input
    # (conv/pool chain: 224 -> 112 -> 56 -> 27 -> 14); batch kept small (2).
    x = jax.random.normal(kx, (2, 3, 224, 224), jnp.float32)
    params = init_params(kp, num_classes=9)

    fwd = jax.jit(cbam_cnn_forward)
    out = jax.block_until_ready(fwd(x, params))
    assert out.shape == (2, 9), out.shape
    assert bool(jnp.all(jnp.isfinite(out)))
    print("KERNEL_OK")
</pallas_src>

<mosaic_0001>
module attributes {stable_mosaic.version = 11 : i64} {
  func.func @_matmul_bias_kernel(%arg0: i32, %arg1: i32, %arg2: i32, %arg3: memref<256x128xbf16, #tpu.memory_space<vmem>>, %arg4: memref<128x128xbf16, #tpu.memory_space<vmem>>, %arg5: memref<1x128xf32, #tpu.memory_space<vmem>>, %arg6: memref<256x128xf32, #tpu.memory_space<vmem>>, %arg7: memref<256x128xf32, #tpu.memory_space<vmem>>) attributes {dimension_semantics = [#tpu.dimension_semantics<parallel>, #tpu.dimension_semantics<parallel>, #tpu.dimension_semantics<arbitrary>], iteration_bounds = array<i64: 98, 1, 1>, scalar_prefetch = 0 : i64, scratch_operands = 1 : i64, tpu.core_type = #tpu.core_type<tc>, window_params = [{transform_indices = @transform_0, window_bounds = array<i64: 256, 128>}, {transform_indices = @transform_1, window_bounds = array<i64: 128, 128>}, {transform_indices = @transform_2, window_bounds = array<i64: 1, 128>}, {transform_indices = @transform_3, window_bounds = array<i64: 256, 128>}]} {
    %c0_i32 = arith.constant 0 : i32
    %0 = arith.cmpi eq, %arg2, %c0_i32 : i32
    %1 = arith.extui %0 : i1 to i32
    %c0_i32_0 = arith.constant 0 : i32
    %2 = arith.cmpi ne, %1, %c0_i32_0 : i32
    scf.if %2 {
      %cst_10 = arith.constant 0.000000e+00 : f32
      %12 = vector.broadcast %cst_10 : f32 to vector<256x128xf32>
      %c0_11 = arith.constant 0 : index
      %c0_12 = arith.constant 0 : index
      %13 = vector.load %arg7[%c0_11, %c0_12] : memref<256x128xf32, #tpu.memory_space<vmem>>, vector<256x128xf32>
      tpu.vector_store %arg7[%c0_11, %c0_12], %12 {strides = array<i32>} : memref<256x128xf32, #tpu.memory_space<vmem>>, vector<256x128xf32>,
    } else {
    }
    %c0 = arith.constant 0 : index
    %c0_1 = arith.constant 0 : index
    %3 = vector.load %arg7[%c0, %c0_1] : memref<256x128xf32, #tpu.memory_space<vmem>>, vector<256x128xf32>
    %c0_2 = arith.constant 0 : index
    %c0_3 = arith.constant 0 : index
    %4 = vector.load %arg3[%c0_2, %c0_3] : memref<256x128xbf16, #tpu.memory_space<vmem>>, vector<256x128xbf16>
    %c0_4 = arith.constant 0 : index
    %c0_5 = arith.constant 0 : index
    %5 = vector.load %arg4[%c0_4, %c0_5] : memref<128x128xbf16, #tpu.memory_space<vmem>>, vector<128x128xbf16>
    %cst = arith.constant dense<0.000000e+00> : vector<256x128xf32>
    %6 = tpu.matmul %4, %5, %cst {dimension_numbers = #tpu.dot_dimension_numbers<[1], [0], [0], [1], [0, 0, 1, 1], [], []>} : vector<256x128xbf16>, vector<128x128xbf16>, vector<256x128xf32> -> vector<256x128xf32>
    %7 = arith.addf %3, %6 : vector<256x128xf32>
    %c0_6 = arith.constant 0 : index
    %c0_7 = arith.constant 0 : index
    %8 = vector.load %arg7[%c0_6, %c0_7] : memref<256x128xf32, #tpu.memory_space<vmem>>, vector<256x128xf32>
    tpu.vector_store %arg7[%c0_6, %c0_7], %7 {strides = array<i32>} : memref<256x128xf32, #tpu.memory_space<vmem>>, vector<256x128xf32>,
    %c0_i32_8 = arith.constant 0 : i32
    %9 = arith.cmpi eq, %arg2, %c0_i32_8 : i32
    %10 = arith.extui %9 : i1 to i32
    %c0_i32_9 = arith.constant 0 : i32
    %11 = arith.cmpi ne, %10, %c0_i32_9 : i32
    scf.if %11 {
      %c0_10 = arith.constant 0 : index
      %c0_11 = arith.constant 0 : index
      %12 = vector.load %arg7[%c0_10, %c0_11] : memref<256x128xf32, #tpu.memory_space<vmem>>, vector<256x128xf32>
      %c0_12 = arith.constant 0 : index
      %c0_13 = arith.constant 0 : index
      %13 = vector.load %arg5[%c0_12, %c0_13] : memref<1x128xf32, #tpu.memory_space<vmem>>, vector<1x128xf32>
      %14 = vector.broadcast %13 : vector<1x128xf32> to vector<256x128xf32>
      %15 = arith.addf %12, %14 : vector<256x128xf32>
      %cst_14 = arith.constant 0.000000e+00 : f32
      %16 = vector.broadcast %cst_14 : f32 to vector<256x128xf32>
      %17 = arith.maximumf %15, %16 : vector<256x128xf32>
      %c0_15 = arith.constant 0 : index
      %c0_16 = arith.constant 0 : index
      %18 = vector.load %arg6[%c0_15, %c0_16] : memref<256x128xf32, #tpu.memory_space<vmem>>, vector<256x128xf32>
      tpu.vector_store %arg6[%c0_15, %c0_16], %17 {strides = array<i32>} : memref<256x128xf32, #tpu.memory_space<vmem>>, vector<256x128xf32>,
    } else {
    }
    return
  }
  func.func @transform_0(%arg0: i32, %arg1: i32, %arg2: i32) -> (i32, i32) {
    %c0_i32 = arith.constant 0 : i32
    return %arg0, %arg2 : i32, i32
  }
  func.func @transform_1(%arg0: i32, %arg1: i32, %arg2: i32) -> (i32, i32) {
    %c0_i32 = arith.constant 0 : i32
    return %arg2, %arg1 : i32, i32
  }
  func.func @transform_2(%arg0: i32, %arg1: i32, %arg2: i32) -> (i32, i32) {
    %c0_i32 = arith.constant 0 : i32
    %c0_i32_0 = arith.constant 0 : i32
    return %c0_i32, %arg1 : i32, i32
  }
  func.func @transform_3(%arg0: i32, %arg1: i32, %arg2: i32) -> (i32, i32) {
    %c0_i32 = arith.constant 0 : i32
    return %arg0, %arg1 : i32, i32
  }
}

module attributes {stable_mosaic.version = 11 : i64} {
  func.func @_maxpool_kernel(%arg0: i32, %arg1: i32, %arg2: memref<1x16x2048xf32, #tpu.memory_space<vmem>>, %arg3: memref<1x1x2048xf32, #tpu.memory_space<vmem>>) attributes {dimension_semantics = [#tpu.dimension_semantics<parallel>, #tpu.dimension_semantics<parallel>], iteration_bounds = array<i64: 2, 13>, scalar_prefetch = 0 : i64, scratch_operands = 0 : i64, tpu.core_type = #tpu.core_type<tc>, window_params = [{transform_indices = @transform_0, window_bounds = array<i64: 1, 16, 2048>}, {transform_indices = @transform_1, window_bounds = array<i64: 1, 1, 2048>}]} {
    %c0 = arith.constant 0 : index
    %c0_0 = arith.constant 0 : index
    %c0_1 = arith.constant 0 : index
    %0 = vector.load %arg2[%c0, %c0_0, %c0_1] : memref<1x16x2048xf32, #tpu.memory_space<vmem>>, vector<1x16x2048xf32>
    %cst = arith.constant dense<0xFF800000> : vector<1x2048xf32>
    %1 = vector.multi_reduction <maximumf>, %0, %cst [1] : vector<1x16x2048xf32> to vector<1x2048xf32>
    %2 = vector.shape_cast %1 : vector<1x2048xf32> to vector<1x1x2048xf32>
    %cst_2 = arith.constant 0.000000e+00 : f32
    %3 = vector.broadcast %cst_2 : f32 to vector<1x1x2048xf32>
    %4 = arith.maximumf %2, %3 : vector<1x1x2048xf32>
    %c0_3 = arith.constant 0 : index
    %c0_4 = arith.constant 0 : index
    %c0_5 = arith.constant 0 : index
    %5 = vector.load %arg3[%c0_3, %c0_4, %c0_5] : memref<1x1x2048xf32, #tpu.memory_space<vmem>>, vector<1x1x2048xf32>
    tpu.vector_store %arg3[%c0_3, %c0_4, %c0_5], %4 {strides = array<i32>} : memref<1x1x2048xf32, #tpu.memory_space<vmem>>, vector<1x1x2048xf32>,
    return
  }
  func.func @transform_0(%arg0: i32, %arg1: i32) -> (i32, i32, i32) {
    %c0_i32 = arith.constant 0 : i32
    %c0_i32_0 = arith.constant 0 : i32
    return %arg0, %c0_i32, %arg1 : i32, i32, i32
  }
  func.func @transform_1(%arg0: i32, %arg1: i32) -> (i32, i32, i32) {
    %c0_i32 = arith.constant 0 : i32
    %c0_i32_0 = arith.constant 0 : i32
    return %arg0, %c0_i32, %arg1 : i32, i32, i32
  }
}

module attributes {stable_mosaic.version = 11 : i64} {
  func.func @_matmul_bias_kernel(%arg0: i32, %arg1: i32, %arg2: i32, %arg3: memref<256x128xbf16, #tpu.memory_space<vmem>>, %arg4: memref<128x128xbf16, #tpu.memory_space<vmem>>, %arg5: memref<1x128xf32, #tpu.memory_space<vmem>>, %arg6: memref<256x128xf32, #tpu.memory_space<vmem>>, %arg7: memref<256x128xf32, #tpu.memory_space<vmem>>) attributes {dimension_semantics = [#tpu.dimension_semantics<parallel>, #tpu.dimension_semantics<parallel>, #tpu.dimension_semantics<arbitrary>], iteration_bounds = array<i64: 6, 1, 1>, scalar_prefetch = 0 : i64, scratch_operands = 1 : i64, tpu.core_type = #tpu.core_type<tc>, window_params = [{transform_indices = @transform_0, window_bounds = array<i64: 256, 128>}, {transform_indices = @transform_1, window_bounds = array<i64: 128, 128>}, {transform_indices = @transform_2, window_bounds = array<i64: 1, 128>}, {transform_indices = @transform_3, window_bounds = array<i64: 256, 128>}]} {
    %c0_i32 = arith.constant 0 : i32
    %0 = arith.cmpi eq, %arg2, %c0_i32 : i32
    %1 = arith.extui %0 : i1 to i32
    %c0_i32_0 = arith.constant 0 : i32
    %2 = arith.cmpi ne, %1, %c0_i32_0 : i32
    scf.if %2 {
      %cst_10 = arith.constant 0.000000e+00 : f32
      %12 = vector.broadcast %cst_10 : f32 to vector<256x128xf32>
      %c0_11 = arith.constant 0 : index
      %c0_12 = arith.constant 0 : index
      %13 = vector.load %arg7[%c0_11, %c0_12] : memref<256x128xf32, #tpu.memory_space<vmem>>, vector<256x128xf32>
      tpu.vector_store %arg7[%c0_11, %c0_12], %12 {strides = array<i32>} : memref<256x128xf32, #tpu.memory_space<vmem>>, vector<256x128xf32>,
    } else {
    }
    %c0 = arith.constant 0 : index
    %c0_1 = arith.constant 0 : index
    %3 = vector.load %arg7[%c0, %c0_1] : memref<256x128xf32, #tpu.memory_space<vmem>>, vector<256x128xf32>
    %c0_2 = arith.constant 0 : index
    %c0_3 = arith.constant 0 : index
    %4 = vector.load %arg3[%c0_2, %c0_3] : memref<256x128xbf16, #tpu.memory_space<vmem>>, vector<256x128xbf16>
    %c0_4 = arith.constant 0 : index
    %c0_5 = arith.constant 0 : index
    %5 = vector.load %arg4[%c0_4, %c0_5] : memref<128x128xbf16, #tpu.memory_space<vmem>>, vector<128x128xbf16>
    %cst = arith.constant dense<0.000000e+00> : vector<256x128xf32>
    %6 = tpu.matmul %4, %5, %cst {dimension_numbers = #tpu.dot_dimension_numbers<[1], [0], [0], [1], [0, 0, 1, 1], [], []>} : vector<256x128xbf16>, vector<128x128xbf16>, vector<256x128xf32> -> vector<256x128xf32>
    %7 = arith.addf %3, %6 : vector<256x128xf32>
    %c0_6 = arith.constant 0 : index
    %c0_7 = arith.constant 0 : index
    %8 = vector.load %arg7[%c0_6, %c0_7] : memref<256x128xf32, #tpu.memory_space<vmem>>, vector<256x128xf32>
    tpu.vector_store %arg7[%c0_6, %c0_7], %7 {strides = array<i32>} : memref<256x128xf32, #tpu.memory_space<vmem>>, vector<256x128xf32>,
    %c0_i32_8 = arith.constant 0 : i32
    %9 = arith.cmpi eq, %arg2, %c0_i32_8 : i32
    %10 = arith.extui %9 : i1 to i32
    %c0_i32_9 = arith.constant 0 : i32
    %11 = arith.cmpi ne, %10, %c0_i32_9 : i32
    scf.if %11 {
      %c0_10 = arith.constant 0 : index
      %c0_11 = arith.constant 0 : index
      %12 = vector.load %arg7[%c0_10, %c0_11] : memref<256x128xf32, #tpu.memory_space<vmem>>, vector<256x128xf32>
      %c0_12 = arith.constant 0 : index
      %c0_13 = arith.constant 0 : index
      %13 = vector.load %arg5[%c0_12, %c0_13] : memref<1x128xf32, #tpu.memory_space<vmem>>, vector<1x128xf32>
      %14 = vector.broadcast %13 : vector<1x128xf32> to vector<256x128xf32>
      %15 = arith.addf %12, %14 : vector<256x128xf32>
      %cst_14 = arith.constant 0.000000e+00 : f32
      %16 = vector.broadcast %cst_14 : f32 to vector<256x128xf32>
      %17 = arith.maximumf %15, %16 : vector<256x128xf32>
      %c0_15 = arith.constant 0 : index
      %c0_16 = arith.constant 0 : index
      %18 = vector.load %arg6[%c0_15, %c0_16] : memref<256x128xf32, #tpu.memory_space<vmem>>, vector<256x128xf32>
      tpu.vector_store %arg6[%c0_15, %c0_16], %17 {strides = array<i32>} : memref<256x128xf32, #tpu.memory_space<vmem>>, vector<256x128xf32>,
    } else {
    }
    return
  }
  func.func @transform_0(%arg0: i32, %arg1: i32, %arg2: i32) -> (i32, i32) {
    %c0_i32 = arith.constant 0 : i32
    return %arg0, %arg2 : i32, i32
  }
  func.func @transform_1(%arg0: i32, %arg1: i32, %arg2: i32) -> (i32, i32) {
    %c0_i32 = arith.constant 0 : i32
    return %arg2, %arg1 : i32, i32
  }
  func.func @transform_2(%arg0: i32, %arg1: i32, %arg2: i32) -> (i32, i32) {
    %c0_i32 = arith.constant 0 : i32
    %c0_i32_0 = arith.constant 0 : i32
    return %c0_i32, %arg1 : i32, i32
  }
  func.func @transform_3(%arg0: i32, %arg1: i32, %arg2: i32) -> (i32, i32) {
    %c0_i32 = arith.constant 0 : i32
    return %arg0, %arg1 : i32, i32
  }
}

module attributes {stable_mosaic.version = 11 : i64} {
  func.func @_maxpool_kernel(%arg0: i32, %arg1: i32, %arg2: memref<1x25x2048xf32, #tpu.memory_space<vmem>>, %arg3: memref<1x1x2048xf32, #tpu.memory_space<vmem>>) attributes {dimension_semantics = [#tpu.dimension_semantics<parallel>, #tpu.dimension_semantics<parallel>], iteration_bounds = array<i64: 2, 2>, scalar_prefetch = 0 : i64, scratch_operands = 0 : i64, tpu.core_type = #tpu.core_type<tc>, window_params = [{transform_indices = @transform_0, window_bounds = array<i64: 1, 25, 2048>}, {transform_indices = @transform_1, window_bounds = array<i64: 1, 1, 2048>}]} {
    %c0 = arith.constant 0 : index
    %c0_0 = arith.constant 0 : index
    %c0_1 = arith.constant 0 : index
    %0 = vector.load %arg2[%c0, %c0_0, %c0_1] : memref<1x25x2048xf32, #tpu.memory_space<vmem>>, vector<1x25x2048xf32>
    %cst = arith.constant dense<0xFF800000> : vector<1x2048xf32>
    %1 = vector.multi_reduction <maximumf>, %0, %cst [1] : vector<1x25x2048xf32> to vector<1x2048xf32>
    %2 = vector.shape_cast %1 : vector<1x2048xf32> to vector<1x1x2048xf32>
    %cst_2 = arith.constant 0.000000e+00 : f32
    %3 = vector.broadcast %cst_2 : f32 to vector<1x1x2048xf32>
    %4 = arith.maximumf %2, %3 : vector<1x1x2048xf32>
    %c0_3 = arith.constant 0 : index
    %c0_4 = arith.constant 0 : index
    %c0_5 = arith.constant 0 : index
    %5 = vector.load %arg3[%c0_3, %c0_4, %c0_5] : memref<1x1x2048xf32, #tpu.memory_space<vmem>>, vector<1x1x2048xf32>
    tpu.vector_store %arg3[%c0_3, %c0_4, %c0_5], %4 {strides = array<i32>} : memref<1x1x2048xf32, #tpu.memory_space<vmem>>, vector<1x1x2048xf32>,
    return
  }
  func.func @transform_0(%arg0: i32, %arg1: i32) -> (i32, i32, i32) {
    %c0_i32 = arith.constant 0 : i32
    %c0_i32_0 = arith.constant 0 : i32
    return %arg0, %c0_i32, %arg1 : i32, i32, i32
  }
  func.func @transform_1(%arg0: i32, %arg1: i32) -> (i32, i32, i32) {
    %c0_i32 = arith.constant 0 : i32
    %c0_i32_0 = arith.constant 0 : i32
    return %arg0, %c0_i32, %arg1 : i32, i32, i32
  }
}

module attributes {stable_mosaic.version = 11 : i64} {
  func.func @_cam_kernel(%arg0: memref<2x16x196xf32, #tpu.memory_space<vmem>>, %arg1: memref<1x16x4xf32, #tpu.memory_space<vmem>>, %arg2: memref<1x1x4xf32, #tpu.memory_space<vmem>>, %arg3: memref<1x16x4xf32, #tpu.memory_space<vmem>>, %arg4: memref<1x16x1xf32, #tpu.memory_space<vmem>>, %arg5: memref<2x16x196xf32, #tpu.memory_space<vmem>>, %arg6: memref<2x2x196xf32, #tpu.memory_space<vmem>>) attributes {dimension_semantics = [], scalar_prefetch = 0 : i64, scratch_operands = 0 : i64, tpu.core_type = #tpu.core_type<tc>} {
    %c0 = arith.constant 0 : index
    %c0_0 = arith.constant 0 : index
    %c0_1 = arith.constant 0 : index
    %0 = vector.load %arg0[%c0, %c0_0, %c0_1] : memref<2x16x196xf32, #tpu.memory_space<vmem>>, vector<2x16x196xf32>
    %c0_2 = arith.constant 0 : index
    %c0_3 = arith.constant 0 : index
    %c0_4 = arith.constant 0 : index
    %1 = vector.load %arg1[%c0_2, %c0_3, %c0_4] : memref<1x16x4xf32, #tpu.memory_space<vmem>>, vector<1x16x4xf32>
    %c0_5 = arith.constant 0 : index
    %c0_6 = arith.constant 0 : index
    %c0_7 = arith.constant 0 : index
    %2 = vector.load %arg2[%c0_5, %c0_6, %c0_7] : memref<1x1x4xf32, #tpu.memory_space<vmem>>, vector<1x1x4xf32>
    %c0_8 = arith.constant 0 : index
    %c0_9 = arith.constant 0 : index
    %c0_10 = arith.constant 0 : index
    %3 = vector.load %arg3[%c0_8, %c0_9, %c0_10] : memref<1x16x4xf32, #tpu.memory_space<vmem>>, vector<1x16x4xf32>
    %c0_11 = arith.constant 0 : index
    %c0_12 = arith.constant 0 : index
    %c0_13 = arith.constant 0 : index
    %4 = vector.load %arg4[%c0_11, %c0_12, %c0_13] : memref<1x16x1xf32, #tpu.memory_space<vmem>>, vector<1x16x1xf32>
    %cst = arith.constant dense<0.000000e+00> : vector<2x16xf32>
    %5 = vector.multi_reduction <add>, %0, %cst [2] : vector<2x16x196xf32> to vector<2x16xf32>
    %6 = vector.shape_cast %5 : vector<2x16xf32> to vector<2x16x1xf32>
    %cst_14 = arith.constant 1.960000e+02 : f32
    %7 = vector.broadcast %cst_14 : f32 to vector<2x16x1xf32>
    %8 = arith.divf %6, %7 : vector<2x16x1xf32>
    %cst_15 = arith.constant dense<0xFF800000> : vector<2x16xf32>
    %9 = vector.multi_reduction <maximumf>, %0, %cst_15 [2] : vector<2x16x196xf32> to vector<2x16xf32>
    %10 = vector.shape_cast %9 : vector<2x16xf32> to vector<2x16x1xf32>
    %11 = vector.broadcast %8 : vector<2x16x1xf32> to vector<2x16x4xf32>
    %12 = vector.broadcast %1 : vector<1x16x4xf32> to vector<2x16x4xf32>
    %13 = arith.mulf %11, %12 : vector<2x16x4xf32>
    %cst_16 = arith.constant dense<0.000000e+00> : vector<2x4xf32>
    %14 = vector.multi_reduction <add>, %13, %cst_16 [1] : vector<2x16x4xf32> to vector<2x4xf32>
    %15 = vector.shape_cast %14 : vector<2x4xf32> to vector<2x1x4xf32>
    %16 = vector.broadcast %2 : vector<1x1x4xf32> to vector<2x1x4xf32>
    %17 = arith.addf %15, %16 : vector<2x1x4xf32>
    %cst_17 = arith.constant 0.000000e+00 : f32
    %18 = vector.broadcast %cst_17 : f32 to vector<2x1x4xf32>
    %19 = arith.maximumf %17, %18 : vector<2x1x4xf32>
    %20 = vector.broadcast %19 : vector<2x1x4xf32> to vector<2x16x4xf32>
    %21 = vector.broadcast %3 : vector<1x16x4xf32> to vector<2x16x4xf32>
    %22 = arith.mulf %20, %21 : vector<2x16x4xf32>
    %cst_18 = arith.constant dense<0.000000e+00> : vector<2x16xf32>
    %23 = vector.multi_reduction <add>, %22, %cst_18 [2] : vector<2x16x4xf32> to vector<2x16xf32>
    %24 = vector.shape_cast %23 : vector<2x16xf32> to vector<2x16x1xf32>
    %25 = vector.broadcast %4 : vector<1x16x1xf32> to vector<2x16x1xf32>
    %26 = arith.addf %24, %25 : vector<2x16x1xf32>
    %27 = vector.broadcast %10 : vector<2x16x1xf32> to vector<2x16x4xf32>
    %28 = vector.broadcast %1 : vector<1x16x4xf32> to vector<2x16x4xf32>
    %29 = arith.mulf %27, %28 : vector<2x16x4xf32>
    %cst_19 = arith.constant dense<0.000000e+00> : vector<2x4xf32>
    %30 = vector.multi_reduction <add>, %29, %cst_19 [1] : vector<2x16x4xf32> to vector<2x4xf32>
    %31 = vector.shape_cast %30 : vector<2x4xf32> to vector<2x1x4xf32>
    %32 = vector.broadcast %2 : vector<1x1x4xf32> to vector<2x1x4xf32>
    %33 = arith.addf %31, %32 : vector<2x1x4xf32>
    %cst_20 = arith.constant 0.000000e+00 : f32
    %34 = vector.broadcast %cst_20 : f32 to vector<2x1x4xf32>
    %35 = arith.maximumf %33, %34 : vector<2x1x4xf32>
    %36 = vector.broadcast %35 : vector<2x1x4xf32> to vector<2x16x4xf32>
    %37 = vector.broadcast %3 : vector<1x16x4xf32> to vector<2x16x4xf32>
    %38 = arith.mulf %36, %37 : vector<2x16x4xf32>
    %cst_21 = arith.constant dense<0.000000e+00> : vector<2x16xf32>
    %39 = vector.multi_reduction <add>, %38, %cst_21 [2] : vector<2x16x4xf32> to vector<2x16xf32>
    %40 = vector.shape_cast %39 : vector<2x16xf32> to vector<2x16x1xf32>
    %41 = vector.broadcast %4 : vector<1x16x1xf32> to vector<2x16x1xf32>
    %42 = arith.addf %40, %41 : vector<2x16x1xf32>
    %43 = arith.addf %26, %42 : vector<2x16x1xf32>
    %cst_22 = arith.constant 0.000000e+00 : f32
    %44 = vector.broadcast %cst_22 : f32 to vector<2x16x1xf32>
    %45 = arith.subf %44, %43 : vector<2x16x1xf32>
    %46 = math.exp %45 : vector<2x16x1xf32>
    %cst_23 = arith.constant 1.000000e+00 : f32
    %47 = vector.broadcast %cst_23 : f32 to vector<2x16x1xf32>
    %48 = arith.addf %47, %46 : vector<2x16x1xf32>
    %cst_24 = arith.constant 1.000000e+00 : f32
    %49 = vector.broadcast %cst_24 : f32 to vector<2x16x1xf32>
    %50 = arith.divf %49, %48 : vector<2x16x1xf32>
    %51 = vector.broadcast %50 : vector<2x16x1xf32> to vector<2x16x196xf32>
    %52 = arith.mulf %0, %51 : vector<2x16x196xf32>
    %c0_25 = arith.constant 0 : index
    %c0_26 = arith.constant 0 : index
    %c0_27 = arith.constant 0 : index
    %53 = vector.load %arg5[%c0_25, %c0_26, %c0_27] : memref<2x16x196xf32, #tpu.memory_space<vmem>>, vector<2x16x196xf32>
    tpu.vector_store %arg5[%c0_25, %c0_26, %c0_27], %52 {strides = array<i32>} : memref<2x16x196xf32, #tpu.memory_space<vmem>>, vector<2x16x196xf32>,
    %cst_28 = arith.constant dense<0.000000e+00> : vector<2x196xf32>
    %54 = vector.multi_reduction <add>, %52, %cst_28 [1] : vector<2x16x196xf32> to vector<2x196xf32>
    %55 = vector.shape_cast %54 : vector<2x196xf32> to vector<2x1x196xf32>
    %cst_29 = arith.constant 1.600000e+01 : f32
    %56 = vector.broadcast %cst_29 : f32 to vector<2x1x196xf32>
    %57 = arith.divf %55, %56 : vector<2x1x196xf32>
    %c0_30 = arith.constant 0 : index
    %c0_31 = arith.constant 0 : index
    %c0_32 = arith.constant 0 : index
    %58 = vector.load %arg6[%c0_30, %c0_31, %c0_32] : memref<2x2x196xf32, #tpu.memory_space<vmem>>, vector<2x1x196xf32>
    tpu.vector_store %arg6[%c0_30, %c0_31, %c0_32], %57 {strides = array<i32>} : memref<2x2x196xf32, #tpu.memory_space<vmem>>, vector<2x1x196xf32>,
    %cst_33 = arith.constant dense<0xFF800000> : vector<2x196xf32>
    %59 = vector.multi_reduction <maximumf>, %52, %cst_33 [1] : vector<2x16x196xf32> to vector<2x196xf32>
    %60 = vector.shape_cast %59 : vector<2x196xf32> to vector<2x1x196xf32>
    %c0_34 = arith.constant 0 : index
    %c1 = arith.constant 1 : index
    %c0_35 = arith.constant 0 : index
    %61 = vector.load %arg6[%c0_34, %c1, %c0_35] : memref<2x2x196xf32, #tpu.memory_space<vmem>>, vector<2x1x196xf32>
    tpu.vector_store %arg6[%c0_34, %c1, %c0_35], %60 {strides = array<i32>} : memref<2x2x196xf32, #tpu.memory_space<vmem>>, vector<2x1x196xf32>,
    return
  }
}

module attributes {stable_mosaic.version = 11 : i64} {
  func.func @_matmul_bias_kernel(%arg0: i32, %arg1: i32, %arg2: i32, %arg3: memref<128x128xbf16, #tpu.memory_space<vmem>>, %arg4: memref<128x128xbf16, #tpu.memory_space<vmem>>, %arg5: memref<1x128xf32, #tpu.memory_space<vmem>>, %arg6: memref<128x128xf32, #tpu.memory_space<vmem>>, %arg7: memref<128x128xf32, #tpu.memory_space<vmem>>) attributes {dimension_semantics = [#tpu.dimension_semantics<parallel>, #tpu.dimension_semantics<parallel>, #tpu.dimension_semantics<arbitrary>], iteration_bounds = array<i64: 4, 1, 1>, scalar_prefetch = 0 : i64, scratch_operands = 1 : i64, tpu.core_type = #tpu.core_type<tc>, window_params = [{transform_indices = @transform_0, window_bounds = array<i64: 128, 128>}, {transform_indices = @transform_1, window_bounds = array<i64: 128, 128>}, {transform_indices = @transform_2, window_bounds = array<i64: 1, 128>}, {transform_indices = @transform_3, window_bounds = array<i64: 128, 128>}]} {
    %c0_i32 = arith.constant 0 : i32
    %0 = arith.cmpi eq, %arg2, %c0_i32 : i32
    %1 = arith.extui %0 : i1 to i32
    %c0_i32_0 = arith.constant 0 : i32
    %2 = arith.cmpi ne, %1, %c0_i32_0 : i32
    scf.if %2 {
      %cst_10 = arith.constant 0.000000e+00 : f32
      %12 = vector.broadcast %cst_10 : f32 to vector<128x128xf32>
      %c0_11 = arith.constant 0 : index
      %c0_12 = arith.constant 0 : index
      %13 = vector.load %arg7[%c0_11, %c0_12] : memref<128x128xf32, #tpu.memory_space<vmem>>, vector<128x128xf32>
      tpu.vector_store %arg7[%c0_11, %c0_12], %12 {strides = array<i32>} : memref<128x128xf32, #tpu.memory_space<vmem>>, vector<128x128xf32>,
    } else {
    }
    %c0 = arith.constant 0 : index
    %c0_1 = arith.constant 0 : index
    %3 = vector.load %arg7[%c0, %c0_1] : memref<128x128xf32, #tpu.memory_space<vmem>>, vector<128x128xf32>
    %c0_2 = arith.constant 0 : index
    %c0_3 = arith.constant 0 : index
    %4 = vector.load %arg3[%c0_2, %c0_3] : memref<128x128xbf16, #tpu.memory_space<vmem>>, vector<128x128xbf16>
    %c0_4 = arith.constant 0 : index
    %c0_5 = arith.constant 0 : index
    %5 = vector.load %arg4[%c0_4, %c0_5] : memref<128x128xbf16, #tpu.memory_space<vmem>>, vector<128x128xbf16>
    %cst = arith.constant dense<0.000000e+00> : vector<128x128xf32>
    %6 = tpu.matmul %4, %5, %cst {dimension_numbers = #tpu.dot_dimension_numbers<[1], [0], [0], [1], [0, 0, 1, 1], [], []>} : vector<128x128xbf16>, vector<128x128xbf16>, vector<128x128xf32> -> vector<128x128xf32>
    %7 = arith.addf %3, %6 : vector<128x128xf32>
    %c0_6 = arith.constant 0 : index
    %c0_7 = arith.constant 0 : index
    %8 = vector.load %arg7[%c0_6, %c0_7] : memref<128x128xf32, #tpu.memory_space<vmem>>, vector<128x128xf32>
    tpu.vector_store %arg7[%c0_6, %c0_7], %7 {strides = array<i32>} : memref<128x128xf32, #tpu.memory_space<vmem>>, vector<128x128xf32>,
    %c0_i32_8 = arith.constant 0 : i32
    %9 = arith.cmpi eq, %arg2, %c0_i32_8 : i32
    %10 = arith.extui %9 : i1 to i32
    %c0_i32_9 = arith.constant 0 : i32
    %11 = arith.cmpi ne, %10, %c0_i32_9 : i32
    scf.if %11 {
      %c0_10 = arith.constant 0 : index
      %c0_11 = arith.constant 0 : index
      %12 = vector.load %arg7[%c0_10, %c0_11] : memref<128x128xf32, #tpu.memory_space<vmem>>, vector<128x128xf32>
      %c0_12 = arith.constant 0 : index
      %c0_13 = arith.constant 0 : index
      %13 = vector.load %arg5[%c0_12, %c0_13] : memref<1x128xf32, #tpu.memory_space<vmem>>, vector<1x128xf32>
      %14 = vector.broadcast %13 : vector<1x128xf32> to vector<128x128xf32>
      %15 = arith.addf %12, %14 : vector<128x128xf32>
      %c0_14 = arith.constant 0 : index
      %c0_15 = arith.constant 0 : index
      %16 = vector.load %arg6[%c0_14, %c0_15] : memref<128x128xf32, #tpu.memory_space<vmem>>, vector<128x128xf32>
      tpu.vector_store %arg6[%c0_14, %c0_15], %15 {strides = array<i32>} : memref<128x128xf32, #tpu.memory_space<vmem>>, vector<128x128xf32>,
    } else {
    }
    return
  }
  func.func @transform_0(%arg0: i32, %arg1: i32, %arg2: i32) -> (i32, i32) {
    %c0_i32 = arith.constant 0 : i32
    return %arg0, %arg2 : i32, i32
  }
  func.func @transform_1(%arg0: i32, %arg1: i32, %arg2: i32) -> (i32, i32) {
    %c0_i32 = arith.constant 0 : i32
    return %arg2, %arg1 : i32, i32
  }
  func.func @transform_2(%arg0: i32, %arg1: i32, %arg2: i32) -> (i32, i32) {
    %c0_i32 = arith.constant 0 : i32
    %c0_i32_0 = arith.constant 0 : i32
    return %c0_i32, %arg1 : i32, i32
  }
  func.func @transform_3(%arg0: i32, %arg1: i32, %arg2: i32) -> (i32, i32) {
    %c0_i32 = arith.constant 0 : i32
    return %arg0, %arg1 : i32, i32
  }
}

module attributes {stable_mosaic.version = 11 : i64} {
  func.func @_sam_gate_kernel(%arg0: memref<2x16x196xf32, #tpu.memory_space<vmem>>, %arg1: memref<2x16x196xf32, #tpu.memory_space<vmem>>, %arg2: memref<2x1x196xf32, #tpu.memory_space<vmem>>, %arg3: memref<2x16x196xf32, #tpu.memory_space<vmem>>) attributes {dimension_semantics = [], scalar_prefetch = 0 : i64, scratch_operands = 0 : i64, tpu.core_type = #tpu.core_type<tc>} {
    %c0 = arith.constant 0 : index
    %c0_0 = arith.constant 0 : index
    %c0_1 = arith.constant 0 : index
    %0 = vector.load %arg2[%c0, %c0_0, %c0_1] : memref<2x1x196xf32, #tpu.memory_space<vmem>>, vector<2x1x196xf32>
    %cst = arith.constant 0.000000e+00 : f32
    %1 = vector.broadcast %cst : f32 to vector<2x1x196xf32>
    %2 = arith.subf %1, %0 : vector<2x1x196xf32>
    %3 = math.exp %2 : vector<2x1x196xf32>
    %cst_2 = arith.constant 1.000000e+00 : f32
    %4 = vector.broadcast %cst_2 : f32 to vector<2x1x196xf32>
    %5 = arith.addf %4, %3 : vector<2x1x196xf32>
    %cst_3 = arith.constant 1.000000e+00 : f32
    %6 = vector.broadcast %cst_3 : f32 to vector<2x1x196xf32>
    %7 = arith.divf %6, %5 : vector<2x1x196xf32>
    %c0_4 = arith.constant 0 : index
    %c0_5 = arith.constant 0 : index
    %c0_6 = arith.constant 0 : index
    %8 = vector.load %arg0[%c0_4, %c0_5, %c0_6] : memref<2x16x196xf32, #tpu.memory_space<vmem>>, vector<2x16x196xf32>
    %c0_7 = arith.constant 0 : index
    %c0_8 = arith.constant 0 : index
    %c0_9 = arith.constant 0 : index
    %9 = vector.load %arg1[%c0_7, %c0_8, %c0_9] : memref<2x16x196xf32, #tpu.memory_space<vmem>>, vector<2x16x196xf32>
    %10 = vector.broadcast %7 : vector<2x1x196xf32> to vector<2x16x196xf32>
    %11 = arith.mulf %9, %10 : vector<2x16x196xf32>
    %12 = arith.addf %8, %11 : vector<2x16x196xf32>
    %cst_10 = arith.constant 0.000000e+00 : f32
    %13 = vector.broadcast %cst_10 : f32 to vector<2x16x196xf32>
    %14 = arith.maximumf %12, %13 : vector<2x16x196xf32>
    %c0_11 = arith.constant 0 : index
    %c0_12 = arith.constant 0 : index
    %c0_13 = arith.constant 0 : index
    %15 = vector.load %arg3[%c0_11, %c0_12, %c0_13] : memref<2x16x196xf32, #tpu.memory_space<vmem>>, vector<2x16x196xf32>
    tpu.vector_store %arg3[%c0_11, %c0_12, %c0_13], %14 {strides = array<i32>} : memref<2x16x196xf32, #tpu.memory_space<vmem>>, vector<2x16x196xf32>,
    return
  }
}

module attributes {stable_mosaic.version = 11 : i64} {
  func.func @_matmul_bias_kernel(%arg0: i32, %arg1: i32, %arg2: i32, %arg3: memref<8x1024xbf16, #tpu.memory_space<vmem>>, %arg4: memref<1024x128xbf16, #tpu.memory_space<vmem>>, %arg5: memref<1x128xf32, #tpu.memory_space<vmem>>, %arg6: memref<8x128xf32, #tpu.memory_space<vmem>>, %arg7: memref<8x128xf32, #tpu.memory_space<vmem>>) attributes {dimension_semantics = [#tpu.dimension_semantics<parallel>, #tpu.dimension_semantics<parallel>, #tpu.dimension_semantics<arbitrary>], iteration_bounds = array<i64: 1, 1, 4>, scalar_prefetch = 0 : i64, scratch_operands = 1 : i64, tpu.core_type = #tpu.core_type<tc>, window_params = [{transform_indices = @transform_0, window_bounds = array<i64: 8, 1024>}, {transform_indices = @transform_1, window_bounds = array<i64: 1024, 128>}, {transform_indices = @transform_2, window_bounds = array<i64: 1, 128>}, {transform_indices = @transform_3, window_bounds = array<i64: 8, 128>}]} {
    %c0_i32 = arith.constant 0 : i32
    %0 = arith.cmpi eq, %arg2, %c0_i32 : i32
    %1 = arith.extui %0 : i1 to i32
    %c0_i32_0 = arith.constant 0 : i32
    %2 = arith.cmpi ne, %1, %c0_i32_0 : i32
    scf.if %2 {
      %cst_9 = arith.constant 0.000000e+00 : f32
      %12 = vector.broadcast %cst_9 : f32 to vector<8x128xf32>
      %c0_10 = arith.constant 0 : index
      %c0_11 = arith.constant 0 : index
      %13 = vector.load %arg7[%c0_10, %c0_11] : memref<8x128xf32, #tpu.memory_space<vmem>>, vector<8x128xf32>
      tpu.vector_store %arg7[%c0_10, %c0_11], %12 {strides = array<i32>} : memref<8x128xf32, #tpu.memory_space<vmem>>, vector<8x128xf32>,
    } else {
    }
    %c0 = arith.constant 0 : index
    %c0_1 = arith.constant 0 : index
    %3 = vector.load %arg7[%c0, %c0_1] : memref<8x128xf32, #tpu.memory_space<vmem>>, vector<8x128xf32>
    %c0_2 = arith.constant 0 : index
    %c0_3 = arith.constant 0 : index
    %4 = vector.load %arg3[%c0_2, %c0_3] : memref<8x1024xbf16, #tpu.memory_space<vmem>>, vector<8x1024xbf16>
    %c0_4 = arith.constant 0 : index
    %c0_5 = arith.constant 0 : index
    %5 = vector.load %arg4[%c0_4, %c0_5] : memref<1024x128xbf16, #tpu.memory_space<vmem>>, vector<1024x128xbf16>
    %cst = arith.constant dense<0.000000e+00> : vector<8x128xf32>
    %6 = tpu.matmul %4, %5, %cst {dimension_numbers = #tpu.dot_dimension_numbers<[1], [0], [0], [1], [0, 0, 1, 1], [], []>} : vector<8x1024xbf16>, vector<1024x128xbf16>, vector<8x128xf32> -> vector<8x128xf32>
    %7 = arith.addf %3, %6 : vector<8x128xf32>
    %c0_6 = arith.constant 0 : index
    %c0_7 = arith.constant 0 : index
    %8 = vector.load %arg7[%c0_6, %c0_7] : memref<8x128xf32, #tpu.memory_space<vmem>>, vector<8x128xf32>
    tpu.vector_store %arg7[%c0_6, %c0_7], %7 {strides = array<i32>} : memref<8x128xf32, #tpu.memory_space<vmem>>, vector<8x128xf32>,
    %c3_i32 = arith.constant 3 : i32
    %9 = arith.cmpi eq, %arg2, %c3_i32 : i32
    %10 = arith.extui %9 : i1 to i32
    %c0_i32_8 = arith.constant 0 : i32
    %11 = arith.cmpi ne, %10, %c0_i32_8 : i32
    scf.if %11 {
      %c0_9 = arith.constant 0 : index
      %c0_10 = arith.constant 0 : index
      %12 = vector.load %arg7[%c0_9, %c0_10] : memref<8x128xf32, #tpu.memory_space<vmem>>, vector<8x128xf32>
      %c0_11 = arith.constant 0 : index
      %c0_12 = arith.constant 0 : index
      %13 = vector.load %arg5[%c0_11, %c0_12] : memref<1x128xf32, #tpu.memory_space<vmem>>, vector<1x128xf32>
      %14 = vector.broadcast %13 : vector<1x128xf32> to vector<8x128xf32>
      %15 = arith.addf %12, %14 : vector<8x128xf32>
      %c0_13 = arith.constant 0 : index
      %c0_14 = arith.constant 0 : index
      %16 = vector.load %arg6[%c0_13, %c0_14] : memref<8x128xf32, #tpu.memory_space<vmem>>, vector<8x128xf32>
      tpu.vector_store %arg6[%c0_13, %c0_14], %15 {strides = array<i32>} : memref<8x128xf32, #tpu.memory_space<vmem>>, vector<8x128xf32>,
    } else {
    }
    return
  }
  func.func @transform_0(%arg0: i32, %arg1: i32, %arg2: i32) -> (i32, i32) {
    %c0_i32 = arith.constant 0 : i32
    return %arg0, %arg2 : i32, i32
  }
  func.func @transform_1(%arg0: i32, %arg1: i32, %arg2: i32) -> (i32, i32) {
    %c0_i32 = arith.constant 0 : i32
    return %arg2, %arg1 : i32, i32
  }
  func.func @transform_2(%arg0: i32, %arg1: i32, %arg2: i32) -> (i32, i32) {
    %c0_i32 = arith.constant 0 : i32
    %c0_i32_0 = arith.constant 0 : i32
    return %c0_i32, %arg1 : i32, i32
  }
  func.func @transform_3(%arg0: i32, %arg1: i32, %arg2: i32) -> (i32, i32) {
    %c0_i32 = arith.constant 0 : i32
    return %arg0, %arg1 : i32, i32
  }
}

module attributes {stable_mosaic.version = 11 : i64} {
  func.func @_matmul_bias_kernel(%arg0: i32, %arg1: i32, %arg2: i32, %arg3: memref<8x128xbf16, #tpu.memory_space<vmem>>, %arg4: memref<128x128xbf16, #tpu.memory_space<vmem>>, %arg5: memref<1x128xf32, #tpu.memory_space<vmem>>, %arg6: memref<8x128xf32, #tpu.memory_space<vmem>>, %arg7: memref<8x128xf32, #tpu.memory_space<vmem>>) attributes {dimension_semantics = [#tpu.dimension_semantics<parallel>, #tpu.dimension_semantics<parallel>, #tpu.dimension_semantics<arbitrary>], iteration_bounds = array<i64: 1, 1, 1>, scalar_prefetch = 0 : i64, scratch_operands = 1 : i64, tpu.core_type = #tpu.core_type<tc>, window_params = [{transform_indices = @transform_0, window_bounds = array<i64: 8, 128>}, {transform_indices = @transform_1, window_bounds = array<i64: 128, 128>}, {transform_indices = @transform_2, window_bounds = array<i64: 1, 128>}, {transform_indices = @transform_3, window_bounds = array<i64: 8, 128>}]} {
    %c0_i32 = arith.constant 0 : i32
    %0 = arith.cmpi eq, %arg2, %c0_i32 : i32
    %1 = arith.extui %0 : i1 to i32
    %c0_i32_0 = arith.constant 0 : i32
    %2 = arith.cmpi ne, %1, %c0_i32_0 : i32
    scf.if %2 {
      %cst_10 = arith.constant 0.000000e+00 : f32
      %12 = vector.broadcast %cst_10 : f32 to vector<8x128xf32>
      %c0_11 = arith.constant 0 : index
      %c0_12 = arith.constant 0 : index
      %13 = vector.load %arg7[%c0_11, %c0_12] : memref<8x128xf32, #tpu.memory_space<vmem>>, vector<8x128xf32>
      tpu.vector_store %arg7[%c0_11, %c0_12], %12 {strides = array<i32>} : memref<8x128xf32, #tpu.memory_space<vmem>>, vector<8x128xf32>,
    } else {
    }
    %c0 = arith.constant 0 : index
    %c0_1 = arith.constant 0 : index
    %3 = vector.load %arg7[%c0, %c0_1] : memref<8x128xf32, #tpu.memory_space<vmem>>, vector<8x128xf32>
    %c0_2 = arith.constant 0 : index
    %c0_3 = arith.constant 0 : index
    %4 = vector.load %arg3[%c0_2, %c0_3] : memref<8x128xbf16, #tpu.memory_space<vmem>>, vector<8x128xbf16>
    %c0_4 = arith.constant 0 : index
    %c0_5 = arith.constant 0 : index
    %5 = vector.load %arg4[%c0_4, %c0_5] : memref<128x128xbf16, #tpu.memory_space<vmem>>, vector<128x128xbf16>
    %cst = arith.constant dense<0.000000e+00> : vector<8x128xf32>
    %6 = tpu.matmul %4, %5, %cst {dimension_numbers = #tpu.dot_dimension_numbers<[1], [0], [0], [1], [0, 0, 1, 1], [], []>} : vector<8x128xbf16>, vector<128x128xbf16>, vector<8x128xf32> -> vector<8x128xf32>
    %7 = arith.addf %3, %6 : vector<8x128xf32>
    %c0_6 = arith.constant 0 : index
    %c0_7 = arith.constant 0 : index
    %8 = vector.load %arg7[%c0_6, %c0_7] : memref<8x128xf32, #tpu.memory_space<vmem>>, vector<8x128xf32>
    tpu.vector_store %arg7[%c0_6, %c0_7], %7 {strides = array<i32>} : memref<8x128xf32, #tpu.memory_space<vmem>>, vector<8x128xf32>,
    %c0_i32_8 = arith.constant 0 : i32
    %9 = arith.cmpi eq, %arg2, %c0_i32_8 : i32
    %10 = arith.extui %9 : i1 to i32
    %c0_i32_9 = arith.constant 0 : i32
    %11 = arith.cmpi ne, %10, %c0_i32_9 : i32
    scf.if %11 {
      %c0_10 = arith.constant 0 : index
      %c0_11 = arith.constant 0 : index
      %12 = vector.load %arg7[%c0_10, %c0_11] : memref<8x128xf32, #tpu.memory_space<vmem>>, vector<8x128xf32>
      %c0_12 = arith.constant 0 : index
      %c0_13 = arith.constant 0 : index
      %13 = vector.load %arg5[%c0_12, %c0_13] : memref<1x128xf32, #tpu.memory_space<vmem>>, vector<1x128xf32>
      %14 = vector.broadcast %13 : vector<1x128xf32> to vector<8x128xf32>
      %15 = arith.addf %12, %14 : vector<8x128xf32>
      %c0_14 = arith.constant 0 : index
      %c0_15 = arith.constant 0 : index
      %16 = vector.load %arg6[%c0_14, %c0_15] : memref<8x128xf32, #tpu.memory_space<vmem>>, vector<8x128xf32>
      tpu.vector_store %arg6[%c0_14, %c0_15], %15 {strides = array<i32>} : memref<8x128xf32, #tpu.memory_space<vmem>>, vector<8x128xf32>,
    } else {
    }
    return
  }
  func.func @transform_0(%arg0: i32, %arg1: i32, %arg2: i32) -> (i32, i32) {
    %c0_i32 = arith.constant 0 : i32
    return %arg0, %arg2 : i32, i32
  }
  func.func @transform_1(%arg0: i32, %arg1: i32, %arg2: i32) -> (i32, i32) {
    %c0_i32 = arith.constant 0 : i32
    return %arg2, %arg1 : i32, i32
  }
  func.func @transform_2(%arg0: i32, %arg1: i32, %arg2: i32) -> (i32, i32) {
    %c0_i32 = arith.constant 0 : i32
    %c0_i32_0 = arith.constant 0 : i32
    return %c0_i32, %arg1 : i32, i32
  }
  func.func @transform_3(%arg0: i32, %arg1: i32, %arg2: i32) -> (i32, i32) {
    %c0_i32 = arith.constant 0 : i32
    return %arg0, %arg1 : i32, i32
  }
}

</mosaic_0001>

<bundles_post_ra>
// kernel: cbam_cnn_forward.9
= control target key start
LH: loop header
LB: loop body
LE: loop exit
PB: predicated region body
PF: predicated region fallthrough
CT: control target
= control target key end

     0   :  { %s1144_s12 = smov 0   ;;  %s1146_s13 = smov 0   ;;  %s1297_s0 = inlined_call_operand.vmem [shape: bf16[25088,128], index: 0, kind: input, shape index: {}]   ;;  %s1298_s1 = inlined_call_operand.vmem [shape: bf16[128,128], index: 1, kind: input, shape index: {}]   ;;  %s1299_s2 = inlined_call_operand.vmem [shape: f32[1,128], index: 2, kind: input, shape index: {}]   ;;  %s1300_s3 = inlined_call_operand.vmem [shape: f32[25088,128], index: 3, kind: output, shape index: {}]  }
   0x1   :  { %s1148_s14 = smov 0  }
   0x2 LB: > { %s32_s15 = sadd.s32 1, %s1118_s13  ;;  %p924_p0 = scmp.ge.s32.totalorder %s1122_s14, 1  ;;  %s1122_s14 = sphi %s1148_s14, %s13_s14   ;;  %s1118_s13 = sphi %s1146_s13, %s1302_s13   ;;  %s1114_s12 = sphi %s1144_s12, %s1301_s12  }
   0x3   : > { %p34_p1 = scmp.ge.s32.totalorder %s32_s15, 98  ;;  %p188_p2 = scmp.lt.s32.totalorder %s1122_s14, 99 }
   0x5   : > { %s1304_s15 = smov (%p34_p1, %s32_s15), 0  ;;  %p189_p3 = pnand %p924_p0, %p188_p2 }
   0x6   : > { %s925_s24 = sshll.u32 (!%p189_p3), %s1114_s12, 5 }
   0x7   : > { %192 = sbr.rel (%p189_p3) target bundleno = 239 (0xef), region = 32  ;;  %p230_p4 = scmp.lt.s32.totalorder (!%p189_p3), %s925_s24, 3135 }
   0xc   : > { %v1050_v0 = vld [vmem:[%s1298_s1 + $0x38] sm:$0xff]  ;;  %v1049_v1 = vld [vmem:[%s1298_s1 + $0x30] sm:$0xff]  ;;  %v1048_v2 = vld [vmem:[%s1298_s1 + $0x28] sm:$0xff]  ;;  %s1306_s24 = smov (!%p230_p4, %s925_s24), 3135 }
   0xd   : > { %519 = vmatpush.bf16.msra.mxu0 %v1050_v0  ;;  %1051 = vmatpush.bf16.msra.mxu1 %v1050_v0  ;;  %v1047_v3 = vld [vmem:[%s1298_s1 + $0x20] sm:$0xff]  ;;  %v1046_v4 = vld [vmem:[%s1298_s1 + $0x18] sm:$0xff]  ;;  %v1045_v5 = vld [vmem:[%s1298_s1 + $0x10] sm:$0xff]  ;;  %s926_s4 = sshll.u32 %s1306_s24, 2  ;;  %s928_s12 = sshll.u32 %s1306_s24, 3 }
   0xe   : > { %1052 = vmatpush.bf16.msra.mxu2 %v1050_v0  ;;  %1053 = vmatpush.bf16.msra.mxu3 %v1050_v0  ;;  %v1044_v6 = vld [vmem:[%s1298_s1 + $0x8] sm:$0xff]  ;;  %v1043_v7 = vld [vmem:[%s1298_s1] sm:$0xff]  ;;  %s1195_s9 = scalar_lea.vmem %s1297_s0, %s926_s4  ;;  %s1224_s18 = scalar_lea.vmem %s1300_s3, %s928_s12 }
   0xf   : > { %v1027_v8 = vld [vmem:[%s1195_s9] sm:$0xff]  ;;  %v1028_v12 = vld [vmem:[%s1195_s9 + $0x8] sm:$0xff]  ;;  %v1029_v16 = vld [vmem:[%s1195_s9 + $0x10] sm:$0xff] }
  0x10   : > { %v1031_v9 = vld [vmem:[%s1195_s9 + $0x20] sm:$0xff]  ;;  %v1032_v13 = vld [vmem:[%s1195_s9 + $0x28] sm:$0xff]  ;;  %v1033_v17 = vld [vmem:[%s1195_s9 + $0x30] sm:$0xff] }
  0x11   : > { %520 = vmatpush.bf16.msra.mxu0 %v1049_v1  ;;  %1054 = vmatpush.bf16.msra.mxu1 %v1049_v1  ;;  %v1035_v10 = vld [vmem:[%s1195_s9 + $0x40] sm:$0xff]  ;;  %v1036_v14 = vld [vmem:[%s1195_s9 + $0x48] sm:$0xff]  ;;  %v1037_v18 = vld [vmem:[%s1195_s9 + $0x50] sm:$0xff] }
  0x12   : > { %1055 = vmatpush.bf16.msra.mxu2 %v1049_v1  ;;  %1056 = vmatpush.bf16.msra.mxu3 %v1049_v1  ;;  %v1039_v11 = vld [vmem:[%s1195_s9 + $0x60] sm:$0xff]  ;;  %v1040_v15 = vld [vmem:[%s1195_s9 + $0x68] sm:$0xff]  ;;  %v1041_v19 = vld [vmem:[%s1195_s9 + $0x70] sm:$0xff] }
  0x13   : > { %v1030_v20 = vld [vmem:[%s1195_s9 + $0x18] sm:$0xff]  ;;  %v1216_v24 = vld [vmem:[%s1299_s2] ss:$0 sm:$0xff] }
  0x14   : > { %v1034_v21 = vld [vmem:[%s1195_s9 + $0x38] sm:$0xff] }
  0x15   : > { %521 = vmatpush.bf16.msra.mxu0 %v1048_v2  ;;  %1057 = vmatpush.bf16.msra.mxu1 %v1048_v2  ;;  %v1038_v22 = vld [vmem:[%s1195_s9 + $0x58] sm:$0xff] }
  0x16   : > { %1058 = vmatpush.bf16.msra.mxu2 %v1048_v2  ;;  %1059 = vmatpush.bf16.msra.mxu3 %v1048_v2  ;;  %v1042_v23 = vld [vmem:[%s1195_s9 + $0x78] sm:$0xff] }
  0x19   : > { %522 = vmatpush.bf16.msra.mxu0 %v1047_v3  ;;  %1060 = vmatpush.bf16.msra.mxu1 %v1047_v3 }
  0x1a   : > { %1061 = vmatpush.bf16.msra.mxu2 %v1047_v3  ;;  %1062 = vmatpush.bf16.msra.mxu3 %v1047_v3 }
  0x1d   : > { %523 = vmatpush.bf16.msra.mxu0 %v1046_v4  ;;  %1063 = vmatpush.bf16.msra.mxu1 %v1046_v4 }
  0x1e   : > { %1064 = vmatpush.bf16.msra.mxu2 %v1046_v4  ;;  %1065 = vmatpush.bf16.msra.mxu3 %v1046_v4 }
  0x21   : > { %524 = vmatpush.bf16.msra.mxu0 %v1045_v5  ;;  %1066 = vmatpush.bf16.msra.mxu1 %v1045_v5 }
  0x22   : > { %1067 = vmatpush.bf16.msra.mxu2 %v1045_v5  ;;  %1068 = vmatpush.bf16.msra.mxu3 %v1045_v5 }
  0x25   : > { %525 = vmatpush.bf16.msra.mxu0 %v1044_v6  ;;  %1069 = vmatpush.bf16.msra.mxu1 %v1044_v6 }
  0x26   : > { %1070 = vmatpush.bf16.msra.mxu2 %v1044_v6  ;;  %1071 = vmatpush.bf16.msra.mxu3 %v1044_v6 }
  0x29   : > { %526 = vmatpush.bf16.msra.mxu0 %v1043_v7  ;;  %1072 = vmatpush.bf16.msra.mxu1 %v1043_v7 }
  0x2a   : > { %1073 = vmatpush.bf16.msra.mxu2 %v1043_v7  ;;  %1074 = vmatpush.bf16.msra.mxu3 %v1043_v7 }
  0x2c   : > { %527 = vmatmul.bf16.vlgmr.msra.gmra.mxu0 %v1027_v8  ;;  %547 = vmatmul.bf16.vlgmr.msra.gmra.mxu1 %v1031_v9 }
  0x2d   : > { %567 = vmatmul.bf16.vlgmr.msra.gmra.mxu2 %v1035_v10  ;;  %587 = vmatmul.bf16.vlgmr.msra.gmra.mxu3 %v1039_v11 }
  0x3c   : > { %532 = vmatmul.bf16.gmra.mxu0 %v1028_v12  ;;  %552 = vmatmul.bf16.gmra.mxu1 %v1032_v13 }
  0x3d   : > { %572 = vmatmul.bf16.gmra.mxu2 %v1036_v14  ;;  %592 = vmatmul.bf16.gmra.mxu3 %v1040_v15 }
  0x4c   : > { %537 = vmatmul.bf16.gmra.mxu0 %v1029_v16  ;;  %557 = vmatmul.bf16.gmra.mxu1 %v1033_v17 }
  0x4d   : > { %577 = vmatmul.bf16.gmra.mxu2 %v1037_v18  ;;  %597 = vmatmul.bf16.gmra.mxu3 %v1041_v19 }
  0x5c   : > { %542 = vmatmul.bf16.gmra.mxu0 %v1030_v20  ;;  %562 = vmatmul.bf16.gmra.mxu1 %v1034_v21 }
  0x5d   : > { %582 = vmatmul.bf16.gmra.mxu2 %v1038_v22  ;;  %602 = vmatmul.bf16.gmra.mxu3 %v1042_v23 }
  0xa9   : > { %v528_v25 = vpop.f32.mrf.mxu0  ;;  %v548_v26 = vpop.f32.mrf.mxu1 }
  0xaa   : > { %v711_v27 = vadd.f32 %v1216_v24, %v528_v25  ;;  %v719_v28 = vadd.f32 %v1216_v24, %v548_v26 }
  0xac   : > { %v743_v29 = vmax.f32 %v711_v27, 0.0  ;;  %v751_v30 = vmax.f32 %v719_v28, 0.0 }
  0xae   : > { %775 = vst [vmem:[%s1224_s18] sm:$0xff] %v743_v29 }
  0xaf   : > { %783 = vst [vmem:[%s1224_s18 + $0x40] sm:$0xff] %v751_v30 }
  0xb0   : > { %v568_v31 = vpop.f32.mrf.mxu2  ;;  %v588_v32 = vpop.f32.mrf.mxu3 }
  0xb1   : > { %v727_v33 = vadd.f32 %v1216_v24, %v568_v31  ;;  %v735_v34 = vadd.f32 %v1216_v24, %v588_v32  ;;  %v530_v35 = vpop.f32.mrf.mxu0  ;;  %v550_v36 = vpop.f32.mrf.mxu1 }
  0xb2   : > { %v712_v37 = vadd.f32 %v1216_v24, %v530_v35  ;;  %v720_v38 = vadd.f32 %v1216_v24, %v550_v36 }
  0xb3   : > { %v759_v39 = vmax.f32 %v727_v33, 0.0  ;;  %v767_v40 = vmax.f32 %v735_v34, 0.0 }
  0xb4   : > { %v744_v41 = vmax.f32 %v712_v37, 0.0  ;;  %v752_v42 = vmax.f32 %v720_v38, 0.0 }
  0xb5   : > { %791 = vst [vmem:[%s1224_s18 + $0x80] sm:$0xff] %v759_v39 }
  0xb6   : > { %799 = vst [vmem:[%s1224_s18 + $0xc0] sm:$0xff] %v767_v40 }
  0xb7   : > { %776 = vst [vmem:[%s1224_s18 + $0x8] sm:$0xff] %v744_v41 }
  0xb8   : > { %784 = vst [vmem:[%s1224_s18 + $0x48] sm:$0xff] %v752_v42  ;;  %v570_v43 = vpop.f32.mrf.mxu2  ;;  %v590_v44 = vpop.f32.mrf.mxu3 }
  0xb9   : > { %v728_v45 = vadd.f32 %v1216_v24, %v570_v43  ;;  %v736_v46 = vadd.f32 %v1216_v24, %v590_v44  ;;  %v533_v47 = vpop.f32.mrf.mxu0  ;;  %v553_v48 = vpop.f32.mrf.mxu1 }
  0xba   : > { %v713_v49 = vadd.f32 %v1216_v24, %v533_v47  ;;  %v721_v50 = vadd.f32 %v1216_v24, %v553_v48 }
  0xbb   : > { %v760_v51 = vmax.f32 %v728_v45, 0.0  ;;  %v768_v52 = vmax.f32 %v736_v46, 0.0 }
  0xbc   : > { %v745_v53 = vmax.f32 %v713_v49, 0.0  ;;  %v753_v54 = vmax.f32 %v721_v50, 0.0 }
  0xbd   : > { %792 = vst [vmem:[%s1224_s18 + $0x88] sm:$0xff] %v760_v51 }
  0xbe   : > { %800 = vst [vmem:[%s1224_s18 + $0xc8] sm:$0xff] %v768_v52 }
  0xbf   : > { %777 = vst [vmem:[%s1224_s18 + $0x10] sm:$0xff] %v745_v53 }
  0xc0   : > { %785 = vst [vmem:[%s1224_s18 + $0x50] sm:$0xff] %v753_v54  ;;  %v573_v55 = vpop.f32.mrf.mxu2  ;;  %v593_v56 = vpop.f32.mrf.mxu3 }
  0xc1   : > { %v729_v57 = vadd.f32 %v1216_v24, %v573_v55  ;;  %v737_v58 = vadd.f32 %v1216_v24, %v593_v56  ;;  %v535_v59 = vpop.f32.mrf.mxu0  ;;  %v555_v60 = vpop.f32.mrf.mxu1 }
  0xc2   : > { %v714_v61 = vadd.f32 %v1216_v24, %v535_v59  ;;  %v722_v62 = vadd.f32 %v1216_v24, %v555_v60 }
  0xc3   : > { %v761_v63 = vmax.f32 %v729_v57, 0.0  ;;  %v769_v0 = vmax.f32 %v737_v58, 0.0 }
  0xc4   : > { %v746_v1 = vmax.f32 %v714_v61, 0.0  ;;  %v754_v2 = vmax.f32 %v722_v62, 0.0 }
  0xc5   : > { %793 = vst [vmem:[%s1224_s18 + $0x90] sm:$0xff] %v761_v63 }
  0xc6   : > { %801 = vst [vmem:[%s1224_s18 + $0xd0] sm:$0xff] %v769_v0 }
  0xc7   : > { %778 = vst [vmem:[%s1224_s18 + $0x18] sm:$0xff] %v746_v1 }
  0xc8   : > { %786 = vst [vmem:[%s1224_s18 + $0x58] sm:$0xff] %v754_v2  ;;  %v575_v3 = vpop.f32.mrf.mxu2  ;;  %v595_v4 = vpop.f32.mrf.mxu3 }
  0xc9   : > { %v730_v5 = vadd.f32 %v1216_v24, %v575_v3  ;;  %v738_v6 = vadd.f32 %v1216_v24, %v595_v4  ;;  %v538_v7 = vpop.f32.mrf.mxu0  ;;  %v558_v8 = vpop.f32.mrf.mxu1 }
  0xca   : > { %v715_v9 = vadd.f32 %v1216_v24, %v538_v7  ;;  %v723_v10 = vadd.f32 %v1216_v24, %v558_v8 }
  0xcb   : > { %v762_v11 = vmax.f32 %v730_v5, 0.0  ;;  %v770_v12 = vmax.f32 %v738_v6, 0.0 }
  0xcc   : > { %v747_v13 = vmax.f32 %v715_v9, 0.0  ;;  %v755_v14 = vmax.f32 %v723_v10, 0.0 }
  0xcd   : > { %794 = vst [vmem:[%s1224_s18 + $0x98] sm:$0xff] %v762_v11 }
  0xce   : > { %802 = vst [vmem:[%s1224_s18 + $0xd8] sm:$0xff] %v770_v12 }
  0xcf   : > { %779 = vst [vmem:[%s1224_s18 + $0x20] sm:$0xff] %v747_v13 }
  0xd0   : > { %787 = vst [vmem:[%s1224_s18 + $0x60] sm:$0xff] %v755_v14  ;;  %v578_v15 = vpop.f32.mrf.mxu2  ;;  %v598_v16 = vpop.f32.mrf.mxu3 }
  0xd1   : > { %v731_v17 = vadd.f32 %v1216_v24, %v578_v15  ;;  %v739_v18 = vadd.f32 %v1216_v24, %v598_v16  ;;  %v540_v19 = vpop.f32.mrf.mxu0  ;;  %v560_v20 = vpop.f32.mrf.mxu1 }
  0xd2   : > { %v716_v21 = vadd.f32 %v1216_v24, %v540_v19  ;;  %v724_v22 = vadd.f32 %v1216_v24, %v560_v20 }
  0xd3   : > { %v763_v23 = vmax.f32 %v731_v17, 0.0  ;;  %v771_v25 = vmax.f32 %v739_v18, 0.0 }
  0xd4   : > { %v748_v26 = vmax.f32 %v716_v21, 0.0  ;;  %v756_v27 = vmax.f32 %v724_v22, 0.0 }
  0xd5   : > { %795 = vst [vmem:[%s1224_s18 + $0xa0] sm:$0xff] %v763_v23 }
  0xd6   : > { %803 = vst [vmem:[%s1224_s18 + $0xe0] sm:$0xff] %v771_v25 }
  0xd7   : > { %780 = vst [vmem:[%s1224_s18 + $0x28] sm:$0xff] %v748_v26 }
  0xd8   : > { %788 = vst [vmem:[%s1224_s18 + $0x68] sm:$0xff] %v756_v27  ;;  %v580_v28 = vpop.f32.mrf.mxu2  ;;  %v600_v29 = vpop.f32.mrf.mxu3 }
  0xd9   : > { %v732_v30 = vadd.f32 %v1216_v24, %v580_v28  ;;  %v740_v31 = vadd.f32 %v1216_v24, %v600_v29  ;;  %v543_v32 = vpop.f32.mrf.mxu0  ;;  %v563_v33 = vpop.f32.mrf.mxu1 }
  0xda   : > { %v717_v34 = vadd.f32 %v1216_v24, %v543_v32  ;;  %v725_v35 = vadd.f32 %v1216_v24, %v563_v33 }
  0xdb   : > { %v764_v36 = vmax.f32 %v732_v30, 0.0  ;;  %v772_v37 = vmax.f32 %v740_v31, 0.0 }
  0xdc   : > { %v749_v38 = vmax.f32 %v717_v34, 0.0  ;;  %v757_v39 = vmax.f32 %v725_v35, 0.0 }
  0xdd   : > { %796 = vst [vmem:[%s1224_s18 + $0xa8] sm:$0xff] %v764_v36 }
  0xde   : > { %804 = vst [vmem:[%s1224_s18 + $0xe8] sm:$0xff] %v772_v37 }
  0xdf   : > { %781 = vst [vmem:[%s1224_s18 + $0x30] sm:$0xff] %v749_v38 }
  0xe0   : > { %789 = vst [vmem:[%s1224_s18 + $0x70] sm:$0xff] %v757_v39  ;;  %v583_v40 = vpop.f32.mrf.mxu2  ;;  %v603_v41 = vpop.f32.mrf.mxu3 }
  0xe1   : > { %v733_v42 = vadd.f32 %v1216_v24, %v583_v40  ;;  %v741_v43 = vadd.f32 %v1216_v24, %v603_v41  ;;  %v545_v44 = vpop.f32.mrf.mxu0  ;;  %v565_v45 = vpop.f32.mrf.mxu1 }
  0xe2   : > { %v718_v46 = vadd.f32 %v1216_v24, %v545_v44  ;;  %v726_v47 = vadd.f32 %v1216_v24, %v565_v45 }
  0xe3   : > { %v765_v48 = vmax.f32 %v733_v42, 0.0  ;;  %v773_v49 = vmax.f32 %v741_v43, 0.0 }
  0xe4   : > { %v750_v50 = vmax.f32 %v718_v46, 0.0  ;;  %v758_v51 = vmax.f32 %v726_v47, 0.0 }
  0xe5   : > { %797 = vst [vmem:[%s1224_s18 + $0xb0] sm:$0xff] %v765_v48 }
  0xe6   : > { %805 = vst [vmem:[%s1224_s18 + $0xf0] sm:$0xff] %v773_v49 }
  0xe7   : > { %782 = vst [vmem:[%s1224_s18 + $0x38] sm:$0xff] %v750_v50 }
  0xe8   : > { %790 = vst [vmem:[%s1224_s18 + $0x78] sm:$0xff] %v758_v51  ;;  %v585_v52 = vpop.f32.mrf.mxu2  ;;  %v605_v53 = vpop.f32.mrf.mxu3 }
  0xe9   : > { %v734_v54 = vadd.f32 %v1216_v24, %v585_v52  ;;  %v742_v55 = vadd.f32 %v1216_v24, %v605_v53 }
  0xeb   : > { %v766_v56 = vmax.f32 %v734_v54, 0.0  ;;  %v774_v57 = vmax.f32 %v742_v55, 0.0 }
  0xed   : > { %798 = vst [vmem:[%s1224_s18 + $0xb8] sm:$0xff] %v766_v56 }
  0xee   : > { %806 = vst [vmem:[%s1224_s18 + $0xf8] sm:$0xff] %v774_v57 }
  0xef PF: > { %s13_s14 = sadd.s32 1, %s1122_s14   ;;  %s1301_s12 = smov %s1118_s13 }
  0xf0   : > { %p10_p5 = scmp.ge.s32.totalorder %s13_s14, 100   ;;  %s1302_s13 = smov %s1304_s15 }
  0xf2   :  { %12 = sbr.rel (!%p10_p5) target bundleno = 2 (0x2), region = 76 }

// kernel: cbam_cnn_forward.10
= control target key start
LH: loop header
LB: loop body
LE: loop exit
PB: predicated region body
PF: predicated region fallthrough
CT: control target
= control target key end

     0   :  { %s663_s6 = smov 0   ;;  %s665_s7 = smov 0   ;;  %s894_s0 = inlined_call_operand.vmem [shape: f32[2,16,26624], index: 0, kind: input, shape index: {}]   ;;  %s895_s1 = inlined_call_operand.vmem [shape: f32[2,1,26624], index: 1, kind: output, shape index: {}]  }
   0x1   :  { %s667_s8 = smov 0   ;;  %s669_s9 = smov 0  }
   0x2   :  { %s671_s10 = smov 0   ;;  %s673_s11 = smov 0  }
   0x3   :  { %s675_s12 = smov 0  }
   0x4 LB: > { %s20_s13 = sadd.s32 1, %s643_s10  ;;  %s23_s14 = sadd.s32 1, %s647_s11  ;;  %s651_s12 = sphi %s675_s12, %s11_s12   ;;  %s647_s11 = sphi %s673_s11, %s902_s11   ;;  %s643_s10 = sphi %s671_s10, %s901_s10   ;;  %s639_s9 = sphi %s669_s9, %s900_s9   ;;  %s635_s8 = sphi %s667_s8, %s899_s8   ;;  %s631_s7 = sphi %s665_s7, %s898_s7   ;;  %s627_s6 = sphi %s663_s6, %s897_s6  }
   0x5   : > { %p21_p0 = scmp.ge.s32.totalorder %s20_s13, 13  ;;  %p39_p1 = scmp.ne.s32.totalorder %s631_s7, %s627_s6 }
   0x6   : > { %p40_p2 = scmp.eq.s32.totalorder %s651_s12, 0  ;;  %s32_s18 = sadd.s32 1, %s631_s7 }
   0x7   : > { %s904_s13 = smov (%p21_p0, %s20_s13), 0  ;;  %s906_s14 = smov (!%p21_p0, %s23_s14), %s647_s11 }
   0x8   : > { %p41_p3 = por %p40_p2, %p39_p1  ;;  %p25_p4 = scmp.ge.s32.totalorder %s906_s14, 2 }
   0x9   : > { %s28_s15 = ssub.s32 %s643_s10, %s904_s13  ;;  %p530_p6 = scmp.ge.s32.totalorder %s651_s12, 26 }
   0xa   : > { %s908_s14 = smov (%p25_p4, %s906_s14), 0 }
   0xb   : > { %s27_s16 = ssub.s32 %s647_s11, %s908_s14  ;;  %93 = sbr.rel (%p530_p6) target bundleno = 56 (0x38), region = 16 }
   0xc   : > { %s29_s17 = sor.u32 %s28_s15, %s27_s16 }
   0xd   : > { %p30_p5 = scmp.eq.s32.totalorder %s29_s17, 0 }
   0xf   : > { %s714_s19 = scalar_select %p30_p5, %s631_s7, %s32_s18  }
  0x10   : > { %96 = sbr.rel (!%p41_p3) target bundleno = 56 (0x38), region = 20  ;;  %s98_s20 = sand.u32 (%p41_p3), 1, %s631_s7  }
  0x11   : > { %s532_s21 = sshll.u32 (%p41_p3), %s643_s10, 4  ;;  %s531_s22 = sshll.u32 (%p41_p3), %s98_s20, 8 }
  0x12   : > { %s539_s23 = smul.u32 (%p41_p3), 416, %s647_s11  ;;  %s728_s29 = scalar_lea.vmem (%p41_p3), [#allocation2], %s531_s22 }
  0x14   : > { %s103_s24 = sadd.s32 (%p41_p3), %s539_s23, %s532_s21 }
  0x15   : > { %s533_s25 = sshll.u32 %s103_s24, 3 }
  0x16   : > { %s723_s28 = scalar_lea.vmem %s894_s0, %s533_s25 }
  0x17   : > { %v118_v0 = vld [vmem:[%s723_s28] sm:$0xff]  ;;  %v120_v1 = vld [vmem:[%s723_s28 + $0x8] sm:$0xff]  ;;  %v122_v2 = vld [vmem:[%s723_s28 + $0x10] sm:$0xff] }
  0x18   : > { %119 = vst [vmem:[%s728_s29] sm:$0xff] %v118_v0  ;;  %v124_v3 = vld [vmem:[%s723_s28 + $0x18] sm:$0xff]  ;;  %v126_v4 = vld [vmem:[%s723_s28 + $0x20] sm:$0xff]  ;;  %v128_v5 = vld [vmem:[%s723_s28 + $0x28] sm:$0xff] }
  0x19   : > { %121 = vst [vmem:[%s728_s29 + $0x8] sm:$0xff] %v120_v1  ;;  %v130_v6 = vld [vmem:[%s723_s28 + $0x30] sm:$0xff]  ;;  %v132_v7 = vld [vmem:[%s723_s28 + $0x38] sm:$0xff]  ;;  %v134_v8 = vld [vmem:[%s723_s28 + $0x40] sm:$0xff] }
  0x1a   : > { %123 = vst [vmem:[%s728_s29 + $0x10] sm:$0xff] %v122_v2  ;;  %v136_v9 = vld [vmem:[%s723_s28 + $0x48] sm:$0xff]  ;;  %v138_v10 = vld [vmem:[%s723_s28 + $0x50] sm:$0xff]  ;;  %v140_v11 = vld [vmem:[%s723_s28 + $0x58] sm:$0xff] }
  0x1b   : > { %125 = vst [vmem:[%s728_s29 + $0x18] sm:$0xff] %v124_v3  ;;  %v142_v12 = vld [vmem:[%s723_s28 + $0x60] sm:$0xff]  ;;  %v144_v13 = vld [vmem:[%s723_s28 + $0x68] sm:$0xff]  ;;  %v146_v14 = vld [vmem:[%s723_s28 + $0x70] sm:$0xff] }
  0x1c   : > { %127 = vst [vmem:[%s728_s29 + $0x20] sm:$0xff] %v126_v4  ;;  %v148_v15 = vld [vmem:[%s723_s28 + $0x78] sm:$0xff]  ;;  %v150_v16 = vld [vmem:[%s723_s28 + $0x680] sm:$0xff]  ;;  %v152_v17 = vld [vmem:[%s723_s28 + $0x688] sm:$0xff] }
  0x1d   : > { %129 = vst [vmem:[%s728_s29 + $0x28] sm:$0xff] %v128_v5  ;;  %v154_v18 = vld [vmem:[%s723_s28 + $0x690] sm:$0xff]  ;;  %v156_v19 = vld [vmem:[%s723_s28 + $0x698] sm:$0xff]  ;;  %v158_v20 = vld [vmem:[%s723_s28 + $0x6a0] sm:$0xff] }
  0x1e   : > { %131 = vst [vmem:[%s728_s29 + $0x30] sm:$0xff] %v130_v6  ;;  %v160_v21 = vld [vmem:[%s723_s28 + $0x6a8] sm:$0xff]  ;;  %v162_v22 = vld [vmem:[%s723_s28 + $0x6b0] sm:$0xff]  ;;  %v164_v23 = vld [vmem:[%s723_s28 + $0x6b8] sm:$0xff] }
  0x1f   : > { %133 = vst [vmem:[%s728_s29 + $0x38] sm:$0xff] %v132_v7  ;;  %v166_v24 = vld [vmem:[%s723_s28 + $0x6c0] sm:$0xff]  ;;  %v168_v25 = vld [vmem:[%s723_s28 + $0x6c8] sm:$0xff]  ;;  %v170_v26 = vld [vmem:[%s723_s28 + $0x6d0] sm:$0xff] }
  0x20   : > { %135 = vst [vmem:[%s728_s29 + $0x40] sm:$0xff] %v134_v8  ;;  %v172_v27 = vld [vmem:[%s723_s28 + $0x6d8] sm:$0xff]  ;;  %v174_v28 = vld [vmem:[%s723_s28 + $0x6e0] sm:$0xff]  ;;  %v176_v29 = vld [vmem:[%s723_s28 + $0x6e8] sm:$0xff] }
  0x21   : > { %137 = vst [vmem:[%s728_s29 + $0x48] sm:$0xff] %v136_v9  ;;  %v178_v30 = vld [vmem:[%s723_s28 + $0x6f0] sm:$0xff]  ;;  %v180_v31 = vld [vmem:[%s723_s28 + $0x6f8] sm:$0xff] }
  0x22   : > { %139 = vst [vmem:[%s728_s29 + $0x50] sm:$0xff] %v138_v10 }
  0x23   : > { %141 = vst [vmem:[%s728_s29 + $0x58] sm:$0xff] %v140_v11 }
  0x24   : > { %143 = vst [vmem:[%s728_s29 + $0x60] sm:$0xff] %v142_v12 }
  0x25   : > { %145 = vst [vmem:[%s728_s29 + $0x68] sm:$0xff] %v144_v13 }
  0x26   : > { %147 = vst [vmem:[%s728_s29 + $0x70] sm:$0xff] %v146_v14 }
  0x27   : > { %149 = vst [vmem:[%s728_s29 + $0x78] sm:$0xff] %v148_v15 }
  0x28   : > { %151 = vst [vmem:[%s728_s29 + $0x80] sm:$0xff] %v150_v16 }
  0x29   : > { %153 = vst [vmem:[%s728_s29 + $0x88] sm:$0xff] %v152_v17 }
  0x2a   : > { %155 = vst [vmem:[%s728_s29 + $0x90] sm:$0xff] %v154_v18 }
  0x2b   : > { %157 = vst [vmem:[%s728_s29 + $0x98] sm:$0xff] %v156_v19 }
  0x2c   : > { %159 = vst [vmem:[%s728_s29 + $0xa0] sm:$0xff] %v158_v20 }
  0x2d   : > { %161 = vst [vmem:[%s728_s29 + $0xa8] sm:$0xff] %v160_v21 }
  0x2e   : > { %163 = vst [vmem:[%s728_s29 + $0xb0] sm:$0xff] %v162_v22 }
  0x2f   : > { %165 = vst [vmem:[%s728_s29 + $0xb8] sm:$0xff] %v164_v23 }
  0x30   : > { %167 = vst [vmem:[%s728_s29 + $0xc0] sm:$0xff] %v166_v24 }
  0x31   : > { %169 = vst [vmem:[%s728_s29 + $0xc8] sm:$0xff] %v168_v25 }
  0x32   : > { %171 = vst [vmem:[%s728_s29 + $0xd0] sm:$0xff] %v170_v26 }
  0x33   : > { %173 = vst [vmem:[%s728_s29 + $0xd8] sm:$0xff] %v172_v27 }
  0x34   : > { %175 = vst [vmem:[%s728_s29 + $0xe0] sm:$0xff] %v174_v28 }
  0x35   : > { %177 = vst [vmem:[%s728_s29 + $0xe8] sm:$0xff] %v176_v29 }
  0x36   : > { %179 = vst [vmem:[%s728_s29 + $0xf0] sm:$0xff] %v178_v30 }
  0x37   : > { %181 = vst [vmem:[%s728_s29 + $0xf8] sm:$0xff] %v180_v31 }
  0x38 PF: > { %p534_p7 = scmp.ge.s32.totalorder %s651_s12, 1  ;;  %p186_p8 = scmp.lt.s32.totalorder %s651_s12, 27 }
  0x3a   : > { %p187_p9 = pnand %p534_p7, %p186_p8 }
  0x3b   : > { %s193_s30 = sand.u32 (!%p187_p9), 1, %s627_s6   ;;  %s536_s4 = sshll.u32 (!%p187_p9), %s635_s8, 4 }
  0x3c   : > { %190 = sbr.rel (%p187_p9) target bundleno = 110 (0x6e), region = 43  ;;  %s535_s2 = sshll.u32 (!%p187_p9), %s193_s30, 8 }
  0x3d   : > { %s794_s3 = scalar_lea.vmem (!%p187_p9), [#allocation2], %s535_s2  ;;  %p217_p10 = scmp.lt.s32.totalorder (!%p187_p9), %s639_s9, 1 }
  0x3e   : > { %p848_p11 = scmp.lt.s32.totalorder (!%p187_p9), %s536_s4, 207 }
  0x41   : > { %v225_v32 = vld [vmem:[%s794_s3] sm:$0xff]  ;;  %v226_v33 = vld [vmem:[%s794_s3 + $0x8] sm:$0xff]  ;;  %v227_v34 = vld [vmem:[%s794_s3 + $0x10] sm:$0xff]  ;;  %s910_s9 = smov (!%p217_p10, %s639_s9), 1  ;;  %s912_s4 = smov (!%p848_p11, %s536_s4), 207  ;;  %vm415_vm0 = vcmask 1040384  }
  0x42   : > { %v228_v35 = vld [vmem:[%s794_s3 + $0x18] sm:$0xff]  ;;  %v229_v36 = vld [vmem:[%s794_s3 + $0x20] sm:$0xff]  ;;  %v230_v37 = vld [vmem:[%s794_s3 + $0x28] sm:$0xff]  ;;  %s540_s6 = smul.u32 208, %s910_s9  ;;  %vm417_vm1 = vcmask 1042434   ;;  %vm419_vm2 = vcmask 1041408  }
  0x43   : > { %v231_v38 = vld [vmem:[%s794_s3 + $0x30] sm:$0xff]  ;;  %v232_v39 = vld [vmem:[%s794_s3 + $0x38] sm:$0xff]  ;;  %v241_v40 = vld [vmem:[%s794_s3 + $0x80] sm:$0xff]  ;;  %vm421_vm3 = vcmask 1044484   ;;  %vm423_vm4 = vcmask 1046534   ;;  %vm425_vm5 = vcmask 1045508  }
  0x44   : > { %v242_v41 = vld [vmem:[%s794_s3 + $0x88] sm:$0xff]  ;;  %v243_v42 = vld [vmem:[%s794_s3 + $0x90] sm:$0xff]  ;;  %v244_v43 = vld [vmem:[%s794_s3 + $0x98] sm:$0xff]  ;;  %v257_v45 = vmax.f32 %v225_v32, %v241_v40  ;;  %s222_s8 = sadd.s32 %s540_s6, %s912_s4  ;;  %vm427_vm6 = vcmask 1043456  }
  0x45   : > { %v245_v44 = vld [vmem:[%s794_s3 + $0xa0] sm:$0xff]  ;;  %v264_v46 = vmax.f32 %v226_v33, %v242_v41  ;;  %v246_v47 = vld [vmem:[%s794_s3 + $0xa8] sm:$0xff]  ;;  %v247_v48 = vld [vmem:[%s794_s3 + $0xb0] sm:$0xff]  ;;  %v271_v50 = vmax.f32 %v227_v34, %v243_v42  ;;  %v278_v51 = vmax.f32 %v228_v35, %v244_v43  ;;  %s223_s16 = scalar_lea.vmem %s895_s1, %s222_s8 }
  0x46   : > { %v248_v49 = vld [vmem:[%s794_s3 + $0xb8] sm:$0xff]  ;;  %v285_v52 = vmax.f32 %v229_v36, %v245_v44  ;;  %v258_v53 = vrot.slane %v257_v45, 4  ;;  %v292_v55 = vmax.f32 %v230_v37, %v246_v47  ;;  %v299_v56 = vmax.f32 %v231_v38, %v247_v48  ;;  %v233_v17 = vld [vmem:[%s794_s3 + $0x40] sm:$0xff]  ;;  %v234_v18 = vld [vmem:[%s794_s3 + $0x48] sm:$0xff] }
  0x47   : > { %v265_v54 = vrot.slane %v264_v46, 4  ;;  %v272_v57 = vrot.slane %v271_v50, 4  ;;  %v279_v58 = vrot.slane %v278_v51, 4  ;;  %v306_v60 = vmax.f32 %v232_v39, %v248_v49  ;;  %v235_v23 = vld [vmem:[%s794_s3 + $0x50] sm:$0xff]  ;;  %v236_v24 = vld [vmem:[%s794_s3 + $0x58] sm:$0xff]  ;;  %v237_v25 = vld [vmem:[%s794_s3 + $0x60] sm:$0xff] }
  0x48   : > { %v286_v59 = vrot.slane %v285_v52, 4  ;;  %v259_v61 = vmax.f32 %v257_v45, %v258_v53  ;;  %v293_v63 = vrot.slane %v292_v55, 4  ;;  %v300_v0 = vrot.slane %v299_v56, 4  ;;  %v238_v30 = vld [vmem:[%s794_s3 + $0x68] sm:$0xff]  ;;  %v249_v31 = vld [vmem:[%s794_s3 + $0xc0] sm:$0xff]  ;;  %v251_v37 = vld [vmem:[%s794_s3 + $0xd0] sm:$0xff] }
  0x49   : > { %v266_v62 = vmax.f32 %v264_v46, %v265_v54  ;;  %v273_v1 = vmax.f32 %v271_v50, %v272_v57  ;;  %v280_v2 = vmax.f32 %v278_v51, %v279_v58  ;;  %v307_v4 = vrot.slane %v306_v60, 4  ;;  %v250_v32 = vld [vmem:[%s794_s3 + $0xc8] sm:$0xff]  ;;  %v252_v38 = vld [vmem:[%s794_s3 + $0xd8] sm:$0xff]  ;;  %v253_v39 = vld [vmem:[%s794_s3 + $0xe0] sm:$0xff] }
  0x4a   : > { %v287_v3 = vmax.f32 %v285_v52, %v286_v59  ;;  %v260_v5 = vrot.slane %v259_v61, 2  ;;  %v294_v7 = vmax.f32 %v292_v55, %v293_v63  ;;  %v301_v8 = vmax.f32 %v299_v56, %v300_v0  ;;  %v239_v44 = vld [vmem:[%s794_s3 + $0x70] sm:$0xff]  ;;  %v254_v45 = vld [vmem:[%s794_s3 + $0xe8] sm:$0xff]  ;;  %v240_v51 = vld [vmem:[%s794_s3 + $0x78] sm:$0xff] }
  0x4b   : > { %v267_v6 = vrot.slane %v266_v62, 2  ;;  %v274_v9 = vrot.slane %v273_v1, 2  ;;  %v281_v10 = vrot.slane %v280_v2, 2  ;;  %v308_v12 = vmax.f32 %v306_v60, %v307_v4  ;;  %v255_v46 = vld [vmem:[%s794_s3 + $0xf0] sm:$0xff]  ;;  %v256_v52 = vld [vmem:[%s794_s3 + $0xf8] sm:$0xff] }
  0x4c   : > { %v288_v11 = vrot.slane %v287_v3, 2  ;;  %v261_v13 = vmax.f32 %v259_v61, %v260_v5  ;;  %v295_v15 = vrot.slane %v294_v7, 2  ;;  %v302_v16 = vrot.slane %v301_v8, 2 }
  0x4d   : > { %v268_v14 = vmax.f32 %v266_v62, %v267_v6  ;;  %v275_v19 = vmax.f32 %v273_v1, %v274_v9  ;;  %v282_v20 = vmax.f32 %v280_v2, %v281_v10  ;;  %v309_v22 = vrot.slane %v308_v12, 2 }
  0x4e   : > { %v289_v21 = vmax.f32 %v287_v3, %v288_v11  ;;  %v262_v26 = vrot.slane %v261_v13, 1  ;;  %v296_v28 = vmax.f32 %v294_v7, %v295_v15  ;;  %v303_v29 = vmax.f32 %v301_v8, %v302_v16 }
  0x4f   : > { %v269_v27 = vrot.slane %v268_v14, 1  ;;  %v276_v33 = vrot.slane %v275_v19, 1  ;;  %v283_v34 = vrot.slane %v282_v20, 1  ;;  %v310_v36 = vmax.f32 %v308_v12, %v309_v22 }
  0x50   : > { %v290_v35 = vrot.slane %v289_v21, 1  ;;  %v823_v40 = vmax.f32 %v261_v13, %v262_v26  ;;  %v297_v42 = vrot.slane %v296_v28, 1  ;;  %v304_v43 = vrot.slane %v303_v29, 1 }
  0x51   : > { %v825_v41 = vmax.f32 %v268_v14, %v269_v27  ;;  %v830_v47 = vmax.f32 %v275_v19, %v276_v33  ;;  %v832_v48 = vmax.f32 %v282_v20, %v283_v34  ;;  %v311_v50 = vrot.slane %v310_v36, 1 }
  0x52   : > { %v834_v49 = vmax.f32 %v289_v21, %v290_v35  ;;  %v838_v53 = vmax.f32 %v296_v28, %v297_v42  ;;  %v840_v54 = vmax.f32 %v303_v29, %v304_v43  ;;  %v313_v55 = vmax.f32 %v233_v17, %v249_v31 }
  0x53   : > { %v320_v56 = vmax.f32 %v234_v18, %v250_v32  ;;  %v842_v57 = vmax.f32 %v310_v36, %v311_v50  ;;  %v327_v58 = vmax.f32 %v235_v23, %v251_v37  ;;  %v334_v59 = vmax.f32 %v236_v24, %v252_v38 }
  0x54   : > { %v341_v60 = vmax.f32 %v237_v25, %v253_v39  ;;  %v314_v61 = vrot.slane %v313_v55, 4  ;;  %v348_v63 = vmax.f32 %v238_v30, %v254_v45  ;;  %v355_v0 = vmax.f32 %v239_v44, %v255_v46 }
  0x55   : > { %v321_v62 = vrot.slane %v320_v56, 4  ;;  %v328_v1 = vrot.slane %v327_v58, 4  ;;  %v335_v2 = vrot.slane %v334_v59, 4  ;;  %v362_v4 = vmax.f32 %v240_v51, %v256_v52 }
  0x56   : > { %v342_v3 = vrot.slane %v341_v60, 4  ;;  %v315_v5 = vmax.f32 %v313_v55, %v314_v61  ;;  %v349_v7 = vrot.slane %v348_v63, 4  ;;  %v356_v8 = vrot.slane %v355_v0, 4 }
  0x57   : > { %v322_v6 = vmax.f32 %v320_v56, %v321_v62  ;;  %v329_v9 = vmax.f32 %v327_v58, %v328_v1  ;;  %v336_v10 = vmax.f32 %v334_v59, %v335_v2  ;;  %v363_v12 = vrot.slane %v362_v4, 4 }
  0x58   : > { %v343_v11 = vmax.f32 %v341_v60, %v342_v3  ;;  %v316_v13 = vrot.slane %v315_v5, 2  ;;  %v350_v15 = vmax.f32 %v348_v63, %v349_v7  ;;  %v357_v16 = vmax.f32 %v355_v0, %v356_v8 }
  0x59   : > { %v323_v14 = vrot.slane %v322_v6, 2  ;;  %v330_v17 = vrot.slane %v329_v9, 2  ;;  %v337_v18 = vrot.slane %v336_v10, 2  ;;  %v364_v20 = vmax.f32 %v362_v4, %v363_v12 }
  0x5a   : > { %v344_v19 = vrot.slane %v343_v11, 2  ;;  %v317_v21 = vmax.f32 %v315_v5, %v316_v13  ;;  %v351_v23 = vrot.slane %v350_v15, 2  ;;  %v358_v24 = vrot.slane %v357_v16, 2 }
  0x5b   : > { %v324_v22 = vmax.f32 %v322_v6, %v323_v14  ;;  %v331_v25 = vmax.f32 %v329_v9, %v330_v17  ;;  %v338_v26 = vmax.f32 %v336_v10, %v337_v18  ;;  %v365_v28 = vrot.slane %v364_v20, 2 }
  0x5c   : > { %v345_v27 = vmax.f32 %v343_v11, %v344_v19  ;;  %v318_v29 = vrot.slane %v317_v21, 1  ;;  %v352_v31 = vmax.f32 %v350_v15, %v351_v23  ;;  %v359_v32 = vmax.f32 %v357_v16, %v358_v24 }
  0x5d   : > { %v325_v30 = vrot.slane %v324_v22, 1  ;;  %v332_v33 = vrot.slane %v331_v25, 1  ;;  %v339_v34 = vrot.slane %v338_v26, 1  ;;  %v366_v36 = vmax.f32 %v364_v20, %v365_v28 }
  0x5e   : > { %v346_v35 = vrot.slane %v345_v27, 1  ;;  %v319_v37 = vmax.f32 %v317_v21, %v318_v29  ;;  %v353_v39 = vrot.slane %v352_v31, 1  ;;  %v360_v42 = vrot.slane %v359_v32, 1 }
  0x5f   : > { %v326_v38 = vmax.f32 %v324_v22, %v325_v30  ;;  %v333_v43 = vmax.f32 %v331_v25, %v332_v33  ;;  %v340_v44 = vmax.f32 %v338_v26, %v339_v34  ;;  %v367_v46 = vrot.slane %v366_v36, 1 }
  0x60   : > { %v347_v45 = vmax.f32 %v345_v27, %v346_v35  ;;  %v354_v50 = vmax.f32 %v352_v31, %v353_v39  ;;  %v361_v51 = vmax.f32 %v359_v32, %v360_v42  ;;  %v369_v52 = vmax.f32 %v823_v40, 0.0 }
  0x61   : > { %v370_v55 = vmax.f32 %v825_v41, 0.0  ;;  %v368_v56 = vmax.f32 %v366_v36, %v367_v46  ;;  %v371_v58 = vmax.f32 %v830_v47, 0.0  ;;  %v372_v59 = vmax.f32 %v832_v48, 0.0 }
  0x62   : > { %v373_v60 = vmax.f32 %v834_v49, 0.0  ;;  %v374_v61 = vmax.f32 %v838_v53, 0.0  ;;  %v375_v62 = vmax.f32 %v840_v54, 0.0  ;;  %v376_v63 = vmax.f32 %v842_v57, 0.0 }
  0x63   : > { %v377_v0 = vmax.f32 %v319_v37, 0.0  ;;  %v378_v40 = vmax.f32 %v326_v38, 0.0  ;;  %v379_v41 = vmax.f32 %v333_v43, 0.0  ;;  %v380_v1 = vmax.f32 %v340_v44, 0.0 }
  0x64   : > { %v381_v2 = vmax.f32 %v347_v45, 0.0  ;;  %v382_v47 = vmax.f32 %v354_v50, 0.0  ;;  %v383_v3 = vmax.f32 %v361_v51, 0.0  ;;  %v384_v48 = vmax.f32 %v368_v56, 0.0 }
  0x65   : > { %v401_v4 = vrot.slane %v370_v55, 7  ;;  %v402_v49 = vrot.slane %v371_v58, 6  ;;  %v403_v5 = vrot.slane %v372_v59, 5  ;;  %v404_v6 = vrot.slane %v373_v60, 4 }
  0x66   : > { %v405_v7 = vrot.slane %v374_v61, 3  ;;  %v406_v8 = vrot.slane %v375_v62, 2  ;;  %v407_v53 = vrot.slane %v376_v63, 1  ;;  %v408_v9 = vrot.slane %v378_v40, 7 }
  0x67   : > { %v409_v54 = vrot.slane %v379_v41, 6  ;;  %v410_v57 = vrot.slane %v380_v1, 5  ;;  %v411_v10 = vrot.slane %v381_v2, 4  ;;  %v412_v11 = vrot.slane %v382_v47, 3 }
  0x68   : > { %v413_v12 = vrot.slane %v383_v3, 2  ;;  %v414_v13 = vrot.slane %v384_v48, 1  ;;  %v416_v14 = vsel %vm415_vm0, %v369_v52, %v401_v4  ;;  %v418_v15 = vsel %vm417_vm1, %v402_v49, %v403_v5 }
  0x69   : > { %v420_v16 = vsel %vm419_vm2, %v416_v14, %v418_v15  ;;  %v422_v17 = vsel %vm421_vm3, %v404_v6, %v405_v7  ;;  %v424_v18 = vsel %vm423_vm4, %v406_v8, %v407_v53  ;;  %v429_v20 = vsel %vm415_vm0, %v377_v0, %v408_v9 }
  0x6a   : > { %v426_v19 = vsel %vm425_vm5, %v422_v17, %v424_v18  ;;  %v430_v21 = vsel %vm417_vm1, %v409_v54, %v410_v57  ;;  %v432_v24 = vsel %vm421_vm3, %v411_v10, %v412_v11  ;;  %v433_v25 = vsel %vm423_vm4, %v413_v12, %v414_v13 }
  0x6b   : > { %v428_v22 = vsel %vm427_vm6, %v420_v16, %v426_v19  ;;  %v431_v23 = vsel %vm419_vm2, %v429_v20, %v430_v21  ;;  %v434_v26 = vsel %vm425_vm5, %v432_v24, %v433_v25 }
  0x6c   : > { %438 = vst [vmem:[%s223_s16] sm:$0xff] %v428_v22  ;;  %v435_v27 = vsel %vm427_vm6, %v431_v23, %v434_v26 }
  0x6d   : > { %439 = vst [vmem:[%s223_s16 + $0x8] sm:$0xff] %v435_v27 }
  0x6e PF: > { %s11_s12 = sadd.s32 1, %s651_s12   ;;  %s897_s6 = smov %s631_s7 }
  0x6f   : > { %p8_p12 = scmp.ge.s32.totalorder %s11_s12, 28   ;;  %s898_s7 = smov %s714_s19 }
  0x70   : > { %s899_s8 = smov %s643_s10  ;;  %s900_s9 = smov %s647_s11 }
  0x71   : > { %s901_s10 = smov %s904_s13  ;;  %s902_s11 = smov %s908_s14 }
  0x72   :  { %10 = sbr.rel (!%p8_p12) target bundleno = 4 (0x4), region = 82 }

// kernel: cbam_cnn_forward.11
= control target key start
LH: loop header
LB: loop body
LE: loop exit
PB: predicated region body
PF: predicated region fallthrough
CT: control target
= control target key end

     0   :  { %s1144_s12 = smov 0   ;;  %s1146_s13 = smov 0   ;;  %s1297_s0 = inlined_call_operand.vmem [shape: bf16[1536,128], index: 0, kind: input, shape index: {}]   ;;  %s1298_s1 = inlined_call_operand.vmem [shape: bf16[128,128], index: 1, kind: input, shape index: {}]   ;;  %s1299_s2 = inlined_call_operand.vmem [shape: f32[1,128], index: 2, kind: input, shape index: {}]   ;;  %s1300_s3 = inlined_call_operand.vmem [shape: f32[1536,128], index: 3, kind: output, shape index: {}]  }
   0x1   :  { %s1148_s14 = smov 0  }
   0x2 LB: > { %s32_s15 = sadd.s32 1, %s1118_s13  ;;  %p924_p0 = scmp.ge.s32.totalorder %s1122_s14, 1  ;;  %s1122_s14 = sphi %s1148_s14, %s13_s14   ;;  %s1118_s13 = sphi %s1146_s13, %s1302_s13   ;;  %s1114_s12 = sphi %s1144_s12, %s1301_s12  }
   0x3   : > { %p34_p1 = scmp.ge.s32.totalorder %s32_s15, 6  ;;  %p188_p2 = scmp.lt.s32.totalorder %s1122_s14, 7 }
   0x5   : > { %s1304_s15 = smov (%p34_p1, %s32_s15), 0  ;;  %p189_p3 = pnand %p924_p0, %p188_p2 }
   0x6   : > { %s925_s24 = sshll.u32 (!%p189_p3), %s1114_s12, 5 }
   0x7   : > { %192 = sbr.rel (%p189_p3) target bundleno = 239 (0xef), region = 32  ;;  %p230_p4 = scmp.lt.s32.totalorder (!%p189_p3), %s925_s24, 191 }
   0xc   : > { %v1050_v0 = vld [vmem:[%s1298_s1 + $0x38] sm:$0xff]  ;;  %v1049_v1 = vld [vmem:[%s1298_s1 + $0x30] sm:$0xff]  ;;  %v1048_v2 = vld [vmem:[%s1298_s1 + $0x28] sm:$0xff]  ;;  %s1306_s24 = smov (!%p230_p4, %s925_s24), 191 }
   0xd   : > { %519 = vmatpush.bf16.msra.mxu0 %v1050_v0  ;;  %1051 = vmatpush.bf16.msra.mxu1 %v1050_v0  ;;  %v1047_v3 = vld [vmem:[%s1298_s1 + $0x20] sm:$0xff]  ;;  %v1046_v4 = vld [vmem:[%s1298_s1 + $0x18] sm:$0xff]  ;;  %v1045_v5 = vld [vmem:[%s1298_s1 + $0x10] sm:$0xff]  ;;  %s926_s4 = sshll.u32 %s1306_s24, 2  ;;  %s928_s12 = sshll.u32 %s1306_s24, 3 }
   0xe   : > { %1052 = vmatpush.bf16.msra.mxu2 %v1050_v0  ;;  %1053 = vmatpush.bf16.msra.mxu3 %v1050_v0  ;;  %v1044_v6 = vld [vmem:[%s1298_s1 + $0x8] sm:$0xff]  ;;  %v1043_v7 = vld [vmem:[%s1298_s1] sm:$0xff]  ;;  %s1195_s9 = scalar_lea.vmem %s1297_s0, %s926_s4  ;;  %s1224_s18 = scalar_lea.vmem %s1300_s3, %s928_s12 }
   0xf   : > { %v1027_v8 = vld [vmem:[%s1195_s9] sm:$0xff]  ;;  %v1028_v12 = vld [vmem:[%s1195_s9 + $0x8] sm:$0xff]  ;;  %v1029_v16 = vld [vmem:[%s1195_s9 + $0x10] sm:$0xff] }
  0x10   : > { %v1031_v9 = vld [vmem:[%s1195_s9 + $0x20] sm:$0xff]  ;;  %v1032_v13 = vld [vmem:[%s1195_s9 + $0x28] sm:$0xff]  ;;  %v1033_v17 = vld [vmem:[%s1195_s9 + $0x30] sm:$0xff] }
  0x11   : > { %520 = vmatpush.bf16.msra.mxu0 %v1049_v1  ;;  %1054 = vmatpush.bf16.msra.mxu1 %v1049_v1  ;;  %v1035_v10 = vld [vmem:[%s1195_s9 + $0x40] sm:$0xff]  ;;  %v1036_v14 = vld [vmem:[%s1195_s9 + $0x48] sm:$0xff]  ;;  %v1037_v18 = vld [vmem:[%s1195_s9 + $0x50] sm:$0xff] }
  0x12   : > { %1055 = vmatpush.bf16.msra.mxu2 %v1049_v1  ;;  %1056 = vmatpush.bf16.msra.mxu3 %v1049_v1  ;;  %v1039_v11 = vld [vmem:[%s1195_s9 + $0x60] sm:$0xff]  ;;  %v1040_v15 = vld [vmem:[%s1195_s9 + $0x68] sm:$0xff]  ;;  %v1041_v19 = vld [vmem:[%s1195_s9 + $0x70] sm:$0xff] }
  0x13   : > { %v1030_v20 = vld [vmem:[%s1195_s9 + $0x18] sm:$0xff]  ;;  %v1216_v24 = vld [vmem:[%s1299_s2] ss:$0 sm:$0xff] }
  0x14   : > { %v1034_v21 = vld [vmem:[%s1195_s9 + $0x38] sm:$0xff] }
  0x15   : > { %521 = vmatpush.bf16.msra.mxu0 %v1048_v2  ;;  %1057 = vmatpush.bf16.msra.mxu1 %v1048_v2  ;;  %v1038_v22 = vld [vmem:[%s1195_s9 + $0x58] sm:$0xff] }
  0x16   : > { %1058 = vmatpush.bf16.msra.mxu2 %v1048_v2  ;;  %1059 = vmatpush.bf16.msra.mxu3 %v1048_v2  ;;  %v1042_v23 = vld [vmem:[%s1195_s9 + $0x78] sm:$0xff] }
  0x19   : > { %522 = vmatpush.bf16.msra.mxu0 %v1047_v3  ;;  %1060 = vmatpush.bf16.msra.mxu1 %v1047_v3 }
  0x1a   : > { %1061 = vmatpush.bf16.msra.mxu2 %v1047_v3  ;;  %1062 = vmatpush.bf16.msra.mxu3 %v1047_v3 }
  0x1d   : > { %523 = vmatpush.bf16.msra.mxu0 %v1046_v4  ;;  %1063 = vmatpush.bf16.msra.mxu1 %v1046_v4 }
  0x1e   : > { %1064 = vmatpush.bf16.msra.mxu2 %v1046_v4  ;;  %1065 = vmatpush.bf16.msra.mxu3 %v1046_v4 }
  0x21   : > { %524 = vmatpush.bf16.msra.mxu0 %v1045_v5  ;;  %1066 = vmatpush.bf16.msra.mxu1 %v1045_v5 }
  0x22   : > { %1067 = vmatpush.bf16.msra.mxu2 %v1045_v5  ;;  %1068 = vmatpush.bf16.msra.mxu3 %v1045_v5 }
  0x25   : > { %525 = vmatpush.bf16.msra.mxu0 %v1044_v6  ;;  %1069 = vmatpush.bf16.msra.mxu1 %v1044_v6 }
  0x26   : > { %1070 = vmatpush.bf16.msra.mxu2 %v1044_v6  ;;  %1071 = vmatpush.bf16.msra.mxu3 %v1044_v6 }
  0x29   : > { %526 = vmatpush.bf16.msra.mxu0 %v1043_v7  ;;  %1072 = vmatpush.bf16.msra.mxu1 %v1043_v7 }
  0x2a   : > { %1073 = vmatpush.bf16.msra.mxu2 %v1043_v7  ;;  %1074 = vmatpush.bf16.msra.mxu3 %v1043_v7 }
  0x2c   : > { %527 = vmatmul.bf16.vlgmr.msra.gmra.mxu0 %v1027_v8  ;;  %547 = vmatmul.bf16.vlgmr.msra.gmra.mxu1 %v1031_v9 }
  0x2d   : > { %567 = vmatmul.bf16.vlgmr.msra.gmra.mxu2 %v1035_v10  ;;  %587 = vmatmul.bf16.vlgmr.msra.gmra.mxu3 %v1039_v11 }
  0x3c   : > { %532 = vmatmul.bf16.gmra.mxu0 %v1028_v12  ;;  %552 = vmatmul.bf16.gmra.mxu1 %v1032_v13 }
  0x3d   : > { %572 = vmatmul.bf16.gmra.mxu2 %v1036_v14  ;;  %592 = vmatmul.bf16.gmra.mxu3 %v1040_v15 }
  0x4c   : > { %537 = vmatmul.bf16.gmra.mxu0 %v1029_v16  ;;  %557 = vmatmul.bf16.gmra.mxu1 %v1033_v17 }
  0x4d   : > { %577 = vmatmul.bf16.gmra.mxu2 %v1037_v18  ;;  %597 = vmatmul.bf16.gmra.mxu3 %v1041_v19 }
  0x5c   : > { %542 = vmatmul.bf16.gmra.mxu0 %v1030_v20  ;;  %562 = vmatmul.bf16.gmra.mxu1 %v1034_v21 }
  0x5d   : > { %582 = vmatmul.bf16.gmra.mxu2 %v1038_v22  ;;  %602 = vmatmul.bf16.gmra.mxu3 %v1042_v23 }
  0xa9   : > { %v528_v25 = vpop.f32.mrf.mxu0  ;;  %v548_v26 = vpop.f32.mrf.mxu1 }
  0xaa   : > { %v711_v27 = vadd.f32 %v1216_v24, %v528_v25  ;;  %v719_v28 = vadd.f32 %v1216_v24, %v548_v26 }
  0xac   : > { %v743_v29 = vmax.f32 %v711_v27, 0.0  ;;  %v751_v30 = vmax.f32 %v719_v28, 0.0 }
  0xae   : > { %775 = vst [vmem:[%s1224_s18] sm:$0xff] %v743_v29 }
  0xaf   : > { %783 = vst [vmem:[%s1224_s18 + $0x40] sm:$0xff] %v751_v30 }
  0xb0   : > { %v568_v31 = vpop.f32.mrf.mxu2  ;;  %v588_v32 = vpop.f32.mrf.mxu3 }
  0xb1   : > { %v727_v33 = vadd.f32 %v1216_v24, %v568_v31  ;;  %v735_v34 = vadd.f32 %v1216_v24, %v588_v32  ;;  %v530_v35 = vpop.f32.mrf.mxu0  ;;  %v550_v36 = vpop.f32.mrf.mxu1 }
  0xb2   : > { %v712_v37 = vadd.f32 %v1216_v24, %v530_v35  ;;  %v720_v38 = vadd.f32 %v1216_v24, %v550_v36 }
  0xb3   : > { %v759_v39 = vmax.f32 %v727_v33, 0.0  ;;  %v767_v40 = vmax.f32 %v735_v34, 0.0 }
  0xb4   : > { %v744_v41 = vmax.f32 %v712_v37, 0.0  ;;  %v752_v42 = vmax.f32 %v720_v38, 0.0 }
  0xb5   : > { %791 = vst [vmem:[%s1224_s18 + $0x80] sm:$0xff] %v759_v39 }
  0xb6   : > { %799 = vst [vmem:[%s1224_s18 + $0xc0] sm:$0xff] %v767_v40 }
  0xb7   : > { %776 = vst [vmem:[%s1224_s18 + $0x8] sm:$0xff] %v744_v41 }
  0xb8   : > { %784 = vst [vmem:[%s1224_s18 + $0x48] sm:$0xff] %v752_v42  ;;  %v570_v43 = vpop.f32.mrf.mxu2  ;;  %v590_v44 = vpop.f32.mrf.mxu3 }
  0xb9   : > { %v728_v45 = vadd.f32 %v1216_v24, %v570_v43  ;;  %v736_v46 = vadd.f32 %v1216_v24, %v590_v44  ;;  %v533_v47 = vpop.f32.mrf.mxu0  ;;  %v553_v48 = vpop.f32.mrf.mxu1 }
  0xba   : > { %v713_v49 = vadd.f32 %v1216_v24, %v533_v47  ;;  %v721_v50 = vadd.f32 %v1216_v24, %v553_v48 }
  0xbb   : > { %v760_v51 = vmax.f32 %v728_v45, 0.0  ;;  %v768_v52 = vmax.f32 %v736_v46, 0.0 }
  0xbc   : > { %v745_v53 = vmax.f32 %v713_v49, 0.0  ;;  %v753_v54 = vmax.f32 %v721_v50, 0.0 }
  0xbd   : > { %792 = vst [vmem:[%s1224_s18 + $0x88] sm:$0xff] %v760_v51 }
  0xbe   : > { %800 = vst [vmem:[%s1224_s18 + $0xc8] sm:$0xff] %v768_v52 }
  0xbf   : > { %777 = vst [vmem:[%s1224_s18 + $0x10] sm:$0xff] %v745_v53 }
  0xc0   : > { %785 = vst [vmem:[%s1224_s18 + $0x50] sm:$0xff] %v753_v54  ;;  %v573_v55 = vpop.f32.mrf.mxu2  ;;  %v593_v56 = vpop.f32.mrf.mxu3 }
  0xc1   : > { %v729_v57 = vadd.f32 %v1216_v24, %v573_v55  ;;  %v737_v58 = vadd.f32 %v1216_v24, %v593_v56  ;;  %v535_v59 = vpop.f32.mrf.mxu0  ;;  %v555_v60 = vpop.f32.mrf.mxu1 }
  0xc2   : > { %v714_v61 = vadd.f32 %v1216_v24, %v535_v59  ;;  %v722_v62 = vadd.f32 %v1216_v24, %v555_v60 }
  0xc3   : > { %v761_v63 = vmax.f32 %v729_v57, 0.0  ;;  %v769_v0 = vmax.f32 %v737_v58, 0.0 }
  0xc4   : > { %v746_v1 = vmax.f32 %v714_v61, 0.0  ;;  %v754_v2 = vmax.f32 %v722_v62, 0.0 }
  0xc5   : > { %793 = vst [vmem:[%s1224_s18 + $0x90] sm:$0xff] %v761_v63 }
  0xc6   : > { %801 = vst [vmem:[%s1224_s18 + $0xd0] sm:$0xff] %v769_v0 }
  0xc7   : > { %778 = vst [vmem:[%s1224_s18 + $0x18] sm:$0xff] %v746_v1 }
  0xc8   : > { %786 = vst [vmem:[%s1224_s18 + $0x58] sm:$0xff] %v754_v2  ;;  %v575_v3 = vpop.f32.mrf.mxu2  ;;  %v595_v4 = vpop.f32.mrf.mxu3 }
  0xc9   : > { %v730_v5 = vadd.f32 %v1216_v24, %v575_v3  ;;  %v738_v6 = vadd.f32 %v1216_v24, %v595_v4  ;;  %v538_v7 = vpop.f32.mrf.mxu0  ;;  %v558_v8 = vpop.f32.mrf.mxu1 }
  0xca   : > { %v715_v9 = vadd.f32 %v1216_v24, %v538_v7  ;;  %v723_v10 = vadd.f32 %v1216_v24, %v558_v8 }
  0xcb   : > { %v762_v11 = vmax.f32 %v730_v5, 0.0  ;;  %v770_v12 = vmax.f32 %v738_v6, 0.0 }
  0xcc   : > { %v747_v13 = vmax.f32 %v715_v9, 0.0  ;;  %v755_v14 = vmax.f32 %v723_v10, 0.0 }
  0xcd   : > { %794 = vst [vmem:[%s1224_s18 + $0x98] sm:$0xff] %v762_v11 }
  0xce   : > { %802 = vst [vmem:[%s1224_s18 + $0xd8] sm:$0xff] %v770_v12 }
  0xcf   : > { %779 = vst [vmem:[%s1224_s18 + $0x20] sm:$0xff] %v747_v13 }
  0xd0   : > { %787 = vst [vmem:[%s1224_s18 + $0x60] sm:$0xff] %v755_v14  ;;  %v578_v15 = vpop.f32.mrf.mxu2  ;;  %v598_v16 = vpop.f32.mrf.mxu3 }
  0xd1   : > { %v731_v17 = vadd.f32 %v1216_v24, %v578_v15  ;;  %v739_v18 = vadd.f32 %v1216_v24, %v598_v16  ;;  %v540_v19 = vpop.f32.mrf.mxu0  ;;  %v560_v20 = vpop.f32.mrf.mxu1 }
  0xd2   : > { %v716_v21 = vadd.f32 %v1216_v24, %v540_v19  ;;  %v724_v22 = vadd.f32 %v1216_v24, %v560_v20 }
  0xd3   : > { %v763_v23 = vmax.f32 %v731_v17, 0.0  ;;  %v771_v25 = vmax.f32 %v739_v18, 0.0 }
  0xd4   : > { %v748_v26 = vmax.f32 %v716_v21, 0.0  ;;  %v756_v27 = vmax.f32 %v724_v22, 0.0 }
  0xd5   : > { %795 = vst [vmem:[%s1224_s18 + $0xa0] sm:$0xff] %v763_v23 }
  0xd6   : > { %803 = vst [vmem:[%s1224_s18 + $0xe0] sm:$0xff] %v771_v25 }
  0xd7   : > { %780 = vst [vmem:[%s1224_s18 + $0x28] sm:$0xff] %v748_v26 }
  0xd8   : > { %788 = vst [vmem:[%s1224_s18 + $0x68] sm:$0xff] %v756_v27  ;;  %v580_v28 = vpop.f32.mrf.mxu2  ;;  %v600_v29 = vpop.f32.mrf.mxu3 }
  0xd9   : > { %v732_v30 = vadd.f32 %v1216_v24, %v580_v28  ;;  %v740_v31 = vadd.f32 %v1216_v24, %v600_v29  ;;  %v543_v32 = vpop.f32.mrf.mxu0  ;;  %v563_v33 = vpop.f32.mrf.mxu1 }
  0xda   : > { %v717_v34 = vadd.f32 %v1216_v24, %v543_v32  ;;  %v725_v35 = vadd.f32 %v1216_v24, %v563_v33 }
  0xdb   : > { %v764_v36 = vmax.f32 %v732_v30, 0.0  ;;  %v772_v37 = vmax.f32 %v740_v31, 0.0 }
  0xdc   : > { %v749_v38 = vmax.f32 %v717_v34, 0.0  ;;  %v757_v39 = vmax.f32 %v725_v35, 0.0 }
  0xdd   : > { %796 = vst [vmem:[%s1224_s18 + $0xa8] sm:$0xff] %v764_v36 }
  0xde   : > { %804 = vst [vmem:[%s1224_s18 + $0xe8] sm:$0xff] %v772_v37 }
  0xdf   : > { %781 = vst [vmem:[%s1224_s18 + $0x30] sm:$0xff] %v749_v38 }
  0xe0   : > { %789 = vst [vmem:[%s1224_s18 + $0x70] sm:$0xff] %v757_v39  ;;  %v583_v40 = vpop.f32.mrf.mxu2  ;;  %v603_v41 = vpop.f32.mrf.mxu3 }
  0xe1   : > { %v733_v42 = vadd.f32 %v1216_v24, %v583_v40  ;;  %v741_v43 = vadd.f32 %v1216_v24, %v603_v41  ;;  %v545_v44 = vpop.f32.mrf.mxu0  ;;  %v565_v45 = vpop.f32.mrf.mxu1 }
  0xe2   : > { %v718_v46 = vadd.f32 %v1216_v24, %v545_v44  ;;  %v726_v47 = vadd.f32 %v1216_v24, %v565_v45 }
  0xe3   : > { %v765_v48 = vmax.f32 %v733_v42, 0.0  ;;  %v773_v49 = vmax.f32 %v741_v43, 0.0 }
  0xe4   : > { %v750_v50 = vmax.f32 %v718_v46, 0.0  ;;  %v758_v51 = vmax.f32 %v726_v47, 0.0 }
  0xe5   : > { %797 = vst [vmem:[%s1224_s18 + $0xb0] sm:$0xff] %v765_v48 }
  0xe6   : > { %805 = vst [vmem:[%s1224_s18 + $0xf0] sm:$0xff] %v773_v49 }
  0xe7   : > { %782 = vst [vmem:[%s1224_s18 + $0x38] sm:$0xff] %v750_v50 }
  0xe8   : > { %790 = vst [vmem:[%s1224_s18 + $0x78] sm:$0xff] %v758_v51  ;;  %v585_v52 = vpop.f32.mrf.mxu2  ;;  %v605_v53 = vpop.f32.mrf.mxu3 }
  0xe9   : > { %v734_v54 = vadd.f32 %v1216_v24, %v585_v52  ;;  %v742_v55 = vadd.f32 %v1216_v24, %v605_v53 }
  0xeb   : > { %v766_v56 = vmax.f32 %v734_v54, 0.0  ;;  %v774_v57 = vmax.f32 %v742_v55, 0.0 }
  0xed   : > { %798 = vst [vmem:[%s1224_s18 + $0xb8] sm:$0xff] %v766_v56 }
  0xee   : > { %806 = vst [vmem:[%s1224_s18 + $0xf8] sm:$0xff] %v774_v57 }
  0xef PF: > { %s13_s14 = sadd.s32 1, %s1122_s14   ;;  %s1301_s12 = smov %s1118_s13 }
  0xf0   : > { %p10_p5 = scmp.ge.s32.totalorder %s13_s14, 8   ;;  %s1302_s13 = smov %s1304_s15 }
  0xf2   :  { %12 = sbr.rel (!%p10_p5) target bundleno = 2 (0x2), region = 76 }

// kernel: cbam_cnn_forward.12
= control target key start
LH: loop header
LB: loop body
LE: loop exit
PB: predicated region body
PF: predicated region fallthrough
CT: control target
= control target key end

     0   :  { %s807_s6 = smov 0   ;;  %s809_s7 = smov 0   ;;  %s1224_s0 = inlined_call_operand.vmem [shape: f32[2,25,4096], index: 0, kind: input, shape index: {}]   ;;  %s1225_s1 = inlined_call_operand.vmem [shape: f32[2,1,4096], index: 1, kind: output, shape index: {}]  }
   0x1   :  { %s811_s8 = smov 0   ;;  %s813_s9 = smov 0  }
   0x2   :  { %s815_s10 = smov 0   ;;  %s817_s11 = smov 0  }
   0x3   :  { %s819_s12 = smov 0  }
   0x4 LB: > { %s20_s13 = sadd.s32 1, %s787_s10  ;;  %s23_s14 = sadd.s32 1, %s791_s11  ;;  %s795_s12 = sphi %s819_s12, %s11_s12   ;;  %s791_s11 = sphi %s817_s11, %s1232_s11   ;;  %s787_s10 = sphi %s815_s10, %s1231_s10   ;;  %s783_s9 = sphi %s813_s9, %s1230_s9   ;;  %s779_s8 = sphi %s811_s8, %s1229_s8   ;;  %s775_s7 = sphi %s809_s7, %s1228_s7   ;;  %s771_s6 = sphi %s807_s6, %s1227_s6  }
   0x5   : > { %p21_p0 = scmp.ge.s32.totalorder %s20_s13, 2  ;;  %p39_p1 = scmp.ne.s32.totalorder %s775_s7, %s771_s6 }
   0x6   : > { %p40_p2 = scmp.eq.s32.totalorder %s795_s12, 0  ;;  %s32_s18 = sadd.s32 1, %s775_s7 }
   0x7   : > { %s1234_s13 = smov (%p21_p0, %s20_s13), 0  ;;  %s1236_s14 = smov (!%p21_p0, %s23_s14), %s791_s11 }
   0x8   : > { %p41_p3 = por %p40_p2, %p39_p1  ;;  %p25_p4 = scmp.ge.s32.totalorder %s1236_s14, 2 }
   0x9   : > { %s28_s15 = ssub.s32 %s787_s10, %s1234_s13  ;;  %p674_p6 = scmp.ge.s32.totalorder %s795_s12, 4 }
   0xa   : > { %s1238_s14 = smov (%p25_p4, %s1236_s14), 0 }
   0xb   : > { %s27_s16 = ssub.s32 %s791_s11, %s1238_s14  ;;  %93 = sbr.rel (%p674_p6) target bundleno = 87 (0x57), region = 16 }
   0xc   : > { %s29_s17 = sor.u32 %s28_s15, %s27_s16 }
   0xd   : > { %p30_p5 = scmp.eq.s32.totalorder %s29_s17, 0 }
   0xf   : > { %s858_s19 = scalar_select %p30_p5, %s775_s7, %s32_s18  }
  0x10   : > { %96 = sbr.rel (!%p41_p3) target bundleno = 87 (0x57), region = 20  ;;  %s98_s20 = sand.u32 (%p41_p3), 1, %s775_s7  }
  0x11   : > { %s676_s21 = sshll.u32 (%p41_p3), %s787_s10, 4  ;;  %s675_s22 = sshll.u32 (%p41_p3), %s98_s20, 9 }
  0x12   : > { %s677_s23 = sshll.u32 (%p41_p3), %s791_s11, 7  ;;  %s872_s29 = scalar_lea.vmem (%p41_p3), [#allocation2], %s675_s22 }
  0x13   : > { %s103_s24 = sadd.s32 (%p41_p3), %s677_s23, %s676_s21 }
  0x14   : > { %s678_s25 = sshll.u32 (%p41_p3), %s103_s24, 3 }
  0x15   : > { %s867_s28 = scalar_lea.vmem %s1224_s0, %s678_s25 }
  0x16   : > { %v118_v0 = vld [vmem:[%s867_s28] sm:$0xff]  ;;  %v120_v1 = vld [vmem:[%s867_s28 + $0x8] sm:$0xff]  ;;  %v122_v2 = vld [vmem:[%s867_s28 + $0x10] sm:$0xff] }
  0x17   : > { %119 = vst [vmem:[%s872_s29] sm:$0xff] %v118_v0  ;;  %v124_v3 = vld [vmem:[%s867_s28 + $0x18] sm:$0xff]  ;;  %v126_v4 = vld [vmem:[%s867_s28 + $0x20] sm:$0xff]  ;;  %v128_v5 = vld [vmem:[%s867_s28 + $0x28] sm:$0xff] }
  0x18   : > { %121 = vst [vmem:[%s872_s29 + $0x8] sm:$0xff] %v120_v1  ;;  %v130_v6 = vld [vmem:[%s867_s28 + $0x30] sm:$0xff]  ;;  %v132_v7 = vld [vmem:[%s867_s28 + $0x38] sm:$0xff]  ;;  %v134_v8 = vld [vmem:[%s867_s28 + $0x40] sm:$0xff] }
  0x19   : > { %123 = vst [vmem:[%s872_s29 + $0x10] sm:$0xff] %v122_v2  ;;  %v136_v9 = vld [vmem:[%s867_s28 + $0x48] sm:$0xff]  ;;  %v138_v10 = vld [vmem:[%s867_s28 + $0x50] sm:$0xff]  ;;  %v140_v11 = vld [vmem:[%s867_s28 + $0x58] sm:$0xff] }
  0x1a   : > { %125 = vst [vmem:[%s872_s29 + $0x18] sm:$0xff] %v124_v3  ;;  %v142_v12 = vld [vmem:[%s867_s28 + $0x60] sm:$0xff]  ;;  %v144_v13 = vld [vmem:[%s867_s28 + $0x68] sm:$0xff]  ;;  %v146_v14 = vld [vmem:[%s867_s28 + $0x70] sm:$0xff] }
  0x1b   : > { %127 = vst [vmem:[%s872_s29 + $0x20] sm:$0xff] %v126_v4  ;;  %v148_v15 = vld [vmem:[%s867_s28 + $0x78] sm:$0xff]  ;;  %v150_v16 = vld [vmem:[%s867_s28 + $0x100] sm:$0xff]  ;;  %v152_v17 = vld [vmem:[%s867_s28 + $0x108] sm:$0xff] }
  0x1c   : > { %129 = vst [vmem:[%s872_s29 + $0x28] sm:$0xff] %v128_v5  ;;  %v154_v18 = vld [vmem:[%s867_s28 + $0x110] sm:$0xff]  ;;  %v156_v19 = vld [vmem:[%s867_s28 + $0x118] sm:$0xff]  ;;  %v158_v20 = vld [vmem:[%s867_s28 + $0x120] sm:$0xff] }
  0x1d   : > { %131 = vst [vmem:[%s872_s29 + $0x30] sm:$0xff] %v130_v6  ;;  %v160_v21 = vld [vmem:[%s867_s28 + $0x128] sm:$0xff]  ;;  %v162_v22 = vld [vmem:[%s867_s28 + $0x130] sm:$0xff]  ;;  %v164_v23 = vld [vmem:[%s867_s28 + $0x138] sm:$0xff] }
  0x1e   : > { %133 = vst [vmem:[%s872_s29 + $0x38] sm:$0xff] %v132_v7  ;;  %v166_v24 = vld [vmem:[%s867_s28 + $0x140] sm:$0xff]  ;;  %v168_v25 = vld [vmem:[%s867_s28 + $0x148] sm:$0xff]  ;;  %v170_v26 = vld [vmem:[%s867_s28 + $0x150] sm:$0xff] }
  0x1f   : > { %135 = vst [vmem:[%s872_s29 + $0x40] sm:$0xff] %v134_v8  ;;  %v172_v27 = vld [vmem:[%s867_s28 + $0x158] sm:$0xff]  ;;  %v174_v28 = vld [vmem:[%s867_s28 + $0x160] sm:$0xff]  ;;  %v176_v29 = vld [vmem:[%s867_s28 + $0x168] sm:$0xff] }
  0x20   : > { %137 = vst [vmem:[%s872_s29 + $0x48] sm:$0xff] %v136_v9  ;;  %v178_v30 = vld [vmem:[%s867_s28 + $0x170] sm:$0xff]  ;;  %v180_v31 = vld [vmem:[%s867_s28 + $0x178] sm:$0xff]  ;;  %v182_v32 = vld [vmem:[%s867_s28 + $0x200] sm:$0xff] }
  0x21   : > { %139 = vst [vmem:[%s872_s29 + $0x50] sm:$0xff] %v138_v10  ;;  %v184_v33 = vld [vmem:[%s867_s28 + $0x208] sm:$0xff]  ;;  %v186_v34 = vld [vmem:[%s867_s28 + $0x210] sm:$0xff]  ;;  %v188_v35 = vld [vmem:[%s867_s28 + $0x218] sm:$0xff] }
  0x22   : > { %141 = vst [vmem:[%s872_s29 + $0x58] sm:$0xff] %v140_v11  ;;  %v190_v36 = vld [vmem:[%s867_s28 + $0x220] sm:$0xff]  ;;  %v192_v37 = vld [vmem:[%s867_s28 + $0x228] sm:$0xff]  ;;  %v194_v38 = vld [vmem:[%s867_s28 + $0x230] sm:$0xff] }
  0x23   : > { %143 = vst [vmem:[%s872_s29 + $0x60] sm:$0xff] %v142_v12  ;;  %v196_v39 = vld [vmem:[%s867_s28 + $0x238] sm:$0xff]  ;;  %v198_v40 = vld [vmem:[%s867_s28 + $0x240] sm:$0xff]  ;;  %v200_v41 = vld [vmem:[%s867_s28 + $0x248] sm:$0xff] }
  0x24   : > { %145 = vst [vmem:[%s872_s29 + $0x68] sm:$0xff] %v144_v13  ;;  %v202_v42 = vld [vmem:[%s867_s28 + $0x250] sm:$0xff]  ;;  %v204_v43 = vld [vmem:[%s867_s28 + $0x258] sm:$0xff]  ;;  %v206_v44 = vld [vmem:[%s867_s28 + $0x260] sm:$0xff] }
  0x25   : > { %147 = vst [vmem:[%s872_s29 + $0x70] sm:$0xff] %v146_v14  ;;  %v208_v45 = vld [vmem:[%s867_s28 + $0x268] sm:$0xff]  ;;  %v210_v46 = vld [vmem:[%s867_s28 + $0x270] sm:$0xff]  ;;  %v212_v47 = vld [vmem:[%s867_s28 + $0x278] sm:$0xff] }
  0x26   : > { %149 = vst [vmem:[%s872_s29 + $0x78] sm:$0xff] %v148_v15  ;;  %v214_v48 = vld [vmem:[%s867_s28 + $0x300] sm:$0xff]  ;;  %v216_v49 = vld [vmem:[%s867_s28 + $0x308] sm:$0xff]  ;;  %v218_v50 = vld [vmem:[%s867_s28 + $0x310] sm:$0xff] }
  0x27   : > { %151 = vst [vmem:[%s872_s29 + $0x80] sm:$0xff] %v150_v16  ;;  %v220_v51 = vld [vmem:[%s867_s28 + $0x318] sm:$0xff]  ;;  %v222_v52 = vld [vmem:[%s867_s28 + $0x320] sm:$0xff]  ;;  %v224_v53 = vld [vmem:[%s867_s28 + $0x328] sm:$0xff] }
  0x28   : > { %153 = vst [vmem:[%s872_s29 + $0x88] sm:$0xff] %v152_v17  ;;  %v226_v54 = vld [vmem:[%s867_s28 + $0x330] sm:$0xff]  ;;  %v228_v55 = vld [vmem:[%s867_s28 + $0x338] sm:$0xff]  ;;  %v230_v56 = vld [vmem:[%s867_s28 + $0x340] sm:$0xff] }
  0x29   : > { %155 = vst [vmem:[%s872_s29 + $0x90] sm:$0xff] %v154_v18  ;;  %v232_v57 = vld [vmem:[%s867_s28 + $0x348] sm:$0xff]  ;;  %v234_v58 = vld [vmem:[%s867_s28 + $0x350] sm:$0xff]  ;;  %v236_v59 = vld [vmem:[%s867_s28 + $0x358] sm:$0xff] }
  0x2a   : > { %157 = vst [vmem:[%s872_s29 + $0x98] sm:$0xff] %v156_v19  ;;  %v238_v60 = vld [vmem:[%s867_s28 + $0x360] sm:$0xff]  ;;  %v240_v61 = vld [vmem:[%s867_s28 + $0x368] sm:$0xff]  ;;  %v242_v62 = vld [vmem:[%s867_s28 + $0x370] sm:$0xff] }
  0x2b   : > { %159 = vst [vmem:[%s872_s29 + $0xa0] sm:$0xff] %v158_v20  ;;  %v244_v63 = vld [vmem:[%s867_s28 + $0x378] sm:$0xff] }
  0x2c   : > { %161 = vst [vmem:[%s872_s29 + $0xa8] sm:$0xff] %v160_v21 }
  0x2d   : > { %163 = vst [vmem:[%s872_s29 + $0xb0] sm:$0xff] %v162_v22 }
  0x2e   : > { %165 = vst [vmem:[%s872_s29 + $0xb8] sm:$0xff] %v164_v23 }
  0x2f   : > { %167 = vst [vmem:[%s872_s29 + $0xc0] sm:$0xff] %v166_v24 }
  0x30   : > { %169 = vst [vmem:[%s872_s29 + $0xc8] sm:$0xff] %v168_v25 }
  0x31   : > { %171 = vst [vmem:[%s872_s29 + $0xd0] sm:$0xff] %v170_v26 }
  0x32   : > { %173 = vst [vmem:[%s872_s29 + $0xd8] sm:$0xff] %v172_v27 }
  0x33   : > { %175 = vst [vmem:[%s872_s29 + $0xe0] sm:$0xff] %v174_v28 }
  0x34   : > { %177 = vst [vmem:[%s872_s29 + $0xe8] sm:$0xff] %v176_v29 }
  0x35   : > { %179 = vst [vmem:[%s872_s29 + $0xf0] sm:$0xff] %v178_v30 }
  0x36   : > { %181 = vst [vmem:[%s872_s29 + $0xf8] sm:$0xff] %v180_v31 }
  0x37   : > { %183 = vst [vmem:[%s872_s29 + $0x100] sm:$0xff] %v182_v32 }
  0x38   : > { %185 = vst [vmem:[%s872_s29 + $0x108] sm:$0xff] %v184_v33 }
  0x39   : > { %187 = vst [vmem:[%s872_s29 + $0x110] sm:$0xff] %v186_v34 }
  0x3a   : > { %189 = vst [vmem:[%s872_s29 + $0x118] sm:$0xff] %v188_v35 }
  0x3b   : > { %191 = vst [vmem:[%s872_s29 + $0x120] sm:$0xff] %v190_v36 }
  0x3c   : > { %193 = vst [vmem:[%s872_s29 + $0x128] sm:$0xff] %v192_v37 }
  0x3d   : > { %195 = vst [vmem:[%s872_s29 + $0x130] sm:$0xff] %v194_v38 }
  0x3e   : > { %197 = vst [vmem:[%s872_s29 + $0x138] sm:$0xff] %v196_v39 }
  0x3f   : > { %199 = vst [vmem:[%s872_s29 + $0x140] sm:$0xff] %v198_v40 }
  0x40   : > { %201 = vst [vmem:[%s872_s29 + $0x148] sm:$0xff] %v200_v41 }
  0x41   : > { %203 = vst [vmem:[%s872_s29 + $0x150] sm:$0xff] %v202_v42 }
  0x42   : > { %205 = vst [vmem:[%s872_s29 + $0x158] sm:$0xff] %v204_v43 }
  0x43   : > { %207 = vst [vmem:[%s872_s29 + $0x160] sm:$0xff] %v206_v44 }
  0x44   : > { %209 = vst [vmem:[%s872_s29 + $0x168] sm:$0xff] %v208_v45 }
  0x45   : > { %211 = vst [vmem:[%s872_s29 + $0x170] sm:$0xff] %v210_v46 }
  0x46   : > { %213 = vst [vmem:[%s872_s29 + $0x178] sm:$0xff] %v212_v47 }
  0x47   : > { %215 = vst [vmem:[%s872_s29 + $0x180] sm:$0xff] %v214_v48 }
  0x48   : > { %217 = vst [vmem:[%s872_s29 + $0x188] sm:$0xff] %v216_v49 }
  0x49   : > { %219 = vst [vmem:[%s872_s29 + $0x190] sm:$0xff] %v218_v50 }
  0x4a   : > { %221 = vst [vmem:[%s872_s29 + $0x198] sm:$0xff] %v220_v51 }
  0x4b   : > { %223 = vst [vmem:[%s872_s29 + $0x1a0] sm:$0xff] %v222_v52 }
  0x4c   : > { %225 = vst [vmem:[%s872_s29 + $0x1a8] sm:$0xff] %v224_v53 }
  0x4d   : > { %227 = vst [vmem:[%s872_s29 + $0x1b0] sm:$0xff] %v226_v54 }
  0x4e   : > { %229 = vst [vmem:[%s872_s29 + $0x1b8] sm:$0xff] %v228_v55 }
  0x4f   : > { %231 = vst [vmem:[%s872_s29 + $0x1c0] sm:$0xff] %v230_v56 }
  0x50   : > { %233 = vst [vmem:[%s872_s29 + $0x1c8] sm:$0xff] %v232_v57 }
  0x51   : > { %235 = vst [vmem:[%s872_s29 + $0x1d0] sm:$0xff] %v234_v58 }
  0x52   : > { %237 = vst [vmem:[%s872_s29 + $0x1d8] sm:$0xff] %v236_v59 }
  0x53   : > { %239 = vst [vmem:[%s872_s29 + $0x1e0] sm:$0xff] %v238_v60 }
  0x54   : > { %241 = vst [vmem:[%s872_s29 + $0x1e8] sm:$0xff] %v240_v61 }
  0x55   : > { %243 = vst [vmem:[%s872_s29 + $0x1f0] sm:$0xff] %v242_v62 }
  0x56   : > { %245 = vst [vmem:[%s872_s29 + $0x1f8] sm:$0xff] %v244_v63 }
  0x57 PF: > { %p679_p7 = scmp.ge.s32.totalorder %s795_s12, 1  ;;  %p250_p8 = scmp.lt.s32.totalorder %s795_s12, 5 }
  0x59   : > { %p251_p9 = pnand %p679_p7, %p250_p8 }
  0x5a   : > { %s257_s30 = sand.u32 (!%p251_p9), 1, %s771_s6   ;;  %s681_s4 = sshll.u32 (!%p251_p9), %s779_s8, 4 }
  0x5b   : > { %254 = sbr.rel (%p251_p9) target bundleno = 160 (0xa0), region = 43  ;;  %s680_s2 = sshll.u32 (!%p251_p9), %s257_s30, 9 }
  0x5c   : > { %s1002_s3 = scalar_lea.vmem (!%p251_p9), [#allocation2], %s680_s2  ;;  %p281_p10 = scmp.lt.s32.totalorder (!%p251_p9), %s783_s9, 1 }
  0x5d   : > { %p1176_p11 = scmp.lt.s32.totalorder (!%p251_p9), %s681_s4, 31 }
  0x60   : > { %v1005_v0 = vld [vmem:[%s1002_s3] sm:$0xff]  ;;  %v1008_v1 = vld [vmem:[%s1002_s3 + $0x8] sm:$0xff]  ;;  %v1011_v2 = vld [vmem:[%s1002_s3 + $0x10] sm:$0xff]  ;;  %vm355_vm0 = vcmask 1040384   ;;  %s1240_s9 = smov (!%p281_p10, %s783_s9), 1  ;;  %s1242_s4 = smov (!%p1176_p11, %s681_s4), 31 }
  0x61   : > { %v1014_v3 = vld [vmem:[%s1002_s3 + $0x18] sm:$0xff]  ;;  %v1017_v4 = vld [vmem:[%s1002_s3 + $0x80] sm:$0xff]  ;;  %v1020_v5 = vld [vmem:[%s1002_s3 + $0x88] sm:$0xff]  ;;  %s682_s6 = sshll.u32 %s1240_s9, 5  ;;  %vm561_vm1 = vcmask 1042434   ;;  %vm563_vm2 = vcmask 1041408  }
  0x62   : > { %v1023_v6 = vld [vmem:[%s1002_s3 + $0x90] sm:$0xff]  ;;  %v1026_v7 = vld [vmem:[%s1002_s3 + $0x98] sm:$0xff]  ;;  %v1029_v8 = vld [vmem:[%s1002_s3 + $0x20] sm:$0xff]  ;;  %v353_v37 = vmax.f32 %v1005_v0, %v1017_v4  ;;  %v364_v38 = vmax.f32 %v1008_v1, %v1020_v5  ;;  %s286_s8 = sadd.s32 %s682_s6, %s1242_s4  ;;  %vm565_vm3 = vcmask 1044484   ;;  %vm567_vm4 = vcmask 1046534  }
  0x63   : > { %v1032_v9 = vld [vmem:[%s1002_s3 + $0x28] sm:$0xff]  ;;  %v1035_v10 = vld [vmem:[%s1002_s3 + $0x30] sm:$0xff]  ;;  %v1038_v11 = vld [vmem:[%s1002_s3 + $0x38] sm:$0xff]  ;;  %v374_v39 = vmax.f32 %v1011_v2, %v1023_v6  ;;  %v384_v40 = vmax.f32 %v1014_v3, %v1026_v7  ;;  %s287_s16 = scalar_lea.vmem %s1225_s1, %s286_s8  ;;  %vm569_vm5 = vcmask 1045508   ;;  %vm571_vm6 = vcmask 1043456  }
  0x64   : > { %v309_v12 = vld [vmem:[%s1002_s3 + $0xa0] sm:$0xff]  ;;  %v310_v13 = vld [vmem:[%s1002_s3 + $0xa8] sm:$0xff]  ;;  %v311_v14 = vld [vmem:[%s1002_s3 + $0xb0] sm:$0xff] }
  0x65   : > { %v312_v15 = vld [vmem:[%s1002_s3 + $0xb8] sm:$0xff]  ;;  %v1045_v16 = vld [vmem:[%s1002_s3 + $0x40] sm:$0xff]  ;;  %v1048_v17 = vld [vmem:[%s1002_s3 + $0x48] sm:$0xff]  ;;  %v394_v44 = vmax.f32 %v1029_v8, %v309_v12  ;;  %v404_v45 = vmax.f32 %v1032_v9, %v310_v13  ;;  %v414_v46 = vmax.f32 %v1035_v10, %v311_v14 }
  0x66   : > { %v1051_v18 = vld [vmem:[%s1002_s3 + $0x50] sm:$0xff]  ;;  %v1054_v19 = vld [vmem:[%s1002_s3 + $0x58] sm:$0xff]  ;;  %v313_v20 = vld [vmem:[%s1002_s3 + $0xc0] sm:$0xff]  ;;  %v424_v47 = vmax.f32 %v1038_v11, %v312_v15 }
  0x67   : > { %v314_v21 = vld [vmem:[%s1002_s3 + $0xc8] sm:$0xff]  ;;  %v315_v22 = vld [vmem:[%s1002_s3 + $0xd0] sm:$0xff]  ;;  %v316_v23 = vld [vmem:[%s1002_s3 + $0xd8] sm:$0xff]  ;;  %v434_v51 = vmax.f32 %v1045_v16, %v313_v20 }
  0x68   : > { %v301_v24 = vld [vmem:[%s1002_s3 + $0x60] sm:$0xff]  ;;  %v302_v25 = vld [vmem:[%s1002_s3 + $0x68] sm:$0xff]  ;;  %v303_v26 = vld [vmem:[%s1002_s3 + $0x70] sm:$0xff]  ;;  %v444_v52 = vmax.f32 %v1048_v17, %v314_v21  ;;  %v454_v53 = vmax.f32 %v1051_v18, %v315_v22  ;;  %v464_v54 = vmax.f32 %v1054_v19, %v316_v23 }
  0x69   : > { %v304_v27 = vld [vmem:[%s1002_s3 + $0x78] sm:$0xff]  ;;  %v317_v28 = vld [vmem:[%s1002_s3 + $0xe0] sm:$0xff]  ;;  %v318_v29 = vld [vmem:[%s1002_s3 + $0xe8] sm:$0xff] }
  0x6a   : > { %v319_v30 = vld [vmem:[%s1002_s3 + $0xf0] sm:$0xff]  ;;  %v320_v31 = vld [vmem:[%s1002_s3 + $0xf8] sm:$0xff]  ;;  %v321_v32 = vld [vmem:[%s1002_s3 + $0x100] sm:$0xff]  ;;  %v474_v58 = vmax.f32 %v301_v24, %v317_v28  ;;  %v484_v59 = vmax.f32 %v302_v25, %v318_v29 }
  0x6b   : > { %v322_v33 = vld [vmem:[%s1002_s3 + $0x108] sm:$0xff]  ;;  %v323_v34 = vld [vmem:[%s1002_s3 + $0x110] sm:$0xff]  ;;  %v324_v35 = vld [vmem:[%s1002_s3 + $0x118] sm:$0xff]  ;;  %v494_v60 = vmax.f32 %v303_v26, %v319_v30  ;;  %v504_v61 = vmax.f32 %v304_v27, %v320_v31  ;;  %v354_v1 = vmax.f32 %v353_v37, %v321_v32 }
  0x6c   : > { %v325_v36 = vld [vmem:[%s1002_s3 + $0x120] sm:$0xff]  ;;  %v326_v41 = vld [vmem:[%s1002_s3 + $0x128] sm:$0xff]  ;;  %v327_v42 = vld [vmem:[%s1002_s3 + $0x130] sm:$0xff]  ;;  %v365_v2 = vmax.f32 %v364_v38, %v322_v33  ;;  %v375_v3 = vmax.f32 %v374_v39, %v323_v34  ;;  %v385_v4 = vmax.f32 %v384_v40, %v324_v35 }
  0x6d   : > { %v328_v43 = vld [vmem:[%s1002_s3 + $0x138] sm:$0xff]  ;;  %v329_v48 = vld [vmem:[%s1002_s3 + $0x140] sm:$0xff]  ;;  %v330_v49 = vld [vmem:[%s1002_s3 + $0x148] sm:$0xff]  ;;  %v395_v8 = vmax.f32 %v394_v44, %v325_v36  ;;  %v405_v9 = vmax.f32 %v404_v45, %v326_v41  ;;  %v415_v10 = vmax.f32 %v414_v46, %v327_v42 }
  0x6e   : > { %v331_v50 = vld [vmem:[%s1002_s3 + $0x150] sm:$0xff]  ;;  %v332_v55 = vld [vmem:[%s1002_s3 + $0x158] sm:$0xff]  ;;  %v333_v56 = vld [vmem:[%s1002_s3 + $0x160] sm:$0xff]  ;;  %v425_v11 = vmax.f32 %v424_v47, %v328_v43  ;;  %v1105_v13 = vmax.f32 %v434_v51, %v329_v48  ;;  %v1107_v14 = vmax.f32 %v444_v52, %v330_v49 }
  0x6f   : > { %v334_v57 = vld [vmem:[%s1002_s3 + $0x168] sm:$0xff]  ;;  %v335_v62 = vld [vmem:[%s1002_s3 + $0x170] sm:$0xff]  ;;  %v336_v63 = vld [vmem:[%s1002_s3 + $0x178] sm:$0xff]  ;;  %v1109_v15 = vmax.f32 %v454_v53, %v331_v50  ;;  %v1111_v16 = vmax.f32 %v464_v54, %v332_v55  ;;  %v1116_v20 = vmax.f32 %v474_v58, %v333_v56 }
  0x70   : > { %v337_v0 = vld [vmem:[%s1002_s3 + $0x180] sm:$0x1]  ;;  %v338_v5 = vld [vmem:[%s1002_s3 + $0x188] sm:$0x1]  ;;  %v339_v6 = vld [vmem:[%s1002_s3 + $0x190] sm:$0x1]  ;;  %v1118_v21 = vmax.f32 %v484_v59, %v334_v57  ;;  %v1120_v22 = vmax.f32 %v494_v60, %v335_v62  ;;  %v1122_v23 = vmax.f32 %v504_v61, %v336_v63 }
  0x71   : > { %v340_v7 = vld [vmem:[%s1002_s3 + $0x198] sm:$0x1]  ;;  %v341_v12 = vld [vmem:[%s1002_s3 + $0x1a0] sm:$0x1]  ;;  %v342_v17 = vld [vmem:[%s1002_s3 + $0x1a8] sm:$0x1] }
  0x72   : > { %v343_v18 = vld [vmem:[%s1002_s3 + $0x1b0] sm:$0x1]  ;;  %v344_v19 = vld [vmem:[%s1002_s3 + $0x1b8] sm:$0x1]  ;;  %v356_v24 = vsel %vm355_vm0, %v337_v0, -inf  ;;  %v366_v25 = vsel %vm355_vm0, %v338_v5, -inf }
  0x73   : > { %v376_v26 = vsel %vm355_vm0, %v339_v6, -inf  ;;  %v386_v27 = vsel %vm355_vm0, %v340_v7, -inf  ;;  %v357_v28 = vmax.f32 %v354_v1, %v356_v24  ;;  %v367_v29 = vmax.f32 %v365_v2, %v366_v25  ;;  %v349_v24 = vld [vmem:[%s1002_s3 + $0x1e0] sm:$0x1]  ;;  %v350_v25 = vld [vmem:[%s1002_s3 + $0x1e8] sm:$0x1] }
  0x74   : > { %v377_v30 = vmax.f32 %v375_v3, %v376_v26  ;;  %v387_v31 = vmax.f32 %v385_v4, %v386_v27  ;;  %v396_v32 = vsel %vm355_vm0, %v341_v12, -inf  ;;  %v406_v33 = vsel %vm355_vm0, %v342_v17, -inf  ;;  %v345_v4 = vld [vmem:[%s1002_s3 + $0x1c0] sm:$0x1] }
  0x75   : > { %v416_v34 = vsel %vm355_vm0, %v343_v18, -inf  ;;  %v426_v35 = vsel %vm355_vm0, %v344_v19, -inf  ;;  %v358_v36 = vrot.slane %v357_v28, 4  ;;  %v368_v37 = vrot.slane %v367_v29, 4 }
  0x76   : > { %v378_v38 = vrot.slane %v377_v30, 4  ;;  %v388_v39 = vrot.slane %v387_v31, 4  ;;  %v397_v40 = vmax.f32 %v395_v8, %v396_v32  ;;  %v407_v41 = vmax.f32 %v405_v9, %v406_v33  ;;  %v346_v9 = vld [vmem:[%s1002_s3 + $0x1c8] sm:$0x1] }
  0x77   : > { %v417_v42 = vmax.f32 %v415_v10, %v416_v34  ;;  %v427_v43 = vmax.f32 %v425_v11, %v426_v35  ;;  %v359_v44 = vmax.f32 %v357_v28, %v358_v36  ;;  %v369_v45 = vmax.f32 %v367_v29, %v368_v37  ;;  %v347_v10 = vld [vmem:[%s1002_s3 + $0x1d0] sm:$0x1]  ;;  %v348_v11 = vld [vmem:[%s1002_s3 + $0x1d8] sm:$0x1] }
  0x78   : > { %v379_v46 = vmax.f32 %v377_v30, %v378_v38  ;;  %v389_v47 = vmax.f32 %v387_v31, %v388_v39  ;;  %v398_v48 = vrot.slane %v397_v40, 4  ;;  %v408_v49 = vrot.slane %v407_v41, 4  ;;  %v351_v30 = vld [vmem:[%s1002_s3 + $0x1f0] sm:$0x1]  ;;  %v352_v35 = vld [vmem:[%s1002_s3 + $0x1f8] sm:$0x1] }
  0x79   : > { %v418_v50 = vrot.slane %v417_v42, 4  ;;  %v428_v51 = vrot.slane %v427_v43, 4  ;;  %v360_v52 = vrot.slane %v359_v44, 2  ;;  %v370_v53 = vrot.slane %v369_v45, 2 }
  0x7a   : > { %v380_v54 = vrot.slane %v379_v46, 2  ;;  %v390_v55 = vrot.slane %v389_v47, 2  ;;  %v399_v56 = vmax.f32 %v397_v40, %v398_v48  ;;  %v409_v57 = vmax.f32 %v407_v41, %v408_v49 }
  0x7b   : > { %v419_v58 = vmax.f32 %v417_v42, %v418_v50  ;;  %v429_v59 = vmax.f32 %v427_v43, %v428_v51  ;;  %v361_v60 = vmax.f32 %v359_v44, %v360_v52  ;;  %v371_v61 = vmax.f32 %v369_v45, %v370_v53 }
  0x7c   : > { %v381_v62 = vmax.f32 %v379_v46, %v380_v54  ;;  %v391_v63 = vmax.f32 %v389_v47, %v390_v55  ;;  %v400_v0 = vrot.slane %v399_v56, 2  ;;  %v410_v1 = vrot.slane %v409_v57, 2 }
  0x7d   : > { %v420_v2 = vrot.slane %v419_v58, 2  ;;  %v430_v3 = vrot.slane %v429_v59, 2  ;;  %v362_v5 = vrot.slane %v361_v60, 1  ;;  %v372_v6 = vrot.slane %v371_v61, 1 }
  0x7e   : > { %v382_v7 = vrot.slane %v381_v62, 1  ;;  %v392_v8 = vrot.slane %v391_v63, 1  ;;  %v401_v12 = vmax.f32 %v399_v56, %v400_v0  ;;  %v411_v17 = vmax.f32 %v409_v57, %v410_v1 }
  0x7f   : > { %v421_v18 = vmax.f32 %v419_v58, %v420_v2  ;;  %v431_v19 = vmax.f32 %v429_v59, %v430_v3  ;;  %v1138_v26 = vmax.f32 %v361_v60, %v362_v5  ;;  %v1140_v27 = vmax.f32 %v371_v61, %v372_v6 }
  0x80   : > { %v1142_v28 = vmax.f32 %v381_v62, %v382_v7  ;;  %v1144_v29 = vmax.f32 %v391_v63, %v392_v8  ;;  %v402_v31 = vrot.slane %v401_v12, 1  ;;  %v412_v32 = vrot.slane %v411_v17, 1 }
  0x81   : > { %v422_v33 = vrot.slane %v421_v18, 1  ;;  %v432_v34 = vrot.slane %v431_v19, 1  ;;  %v436_v36 = vsel %vm355_vm0, %v345_v4, -inf  ;;  %v446_v37 = vsel %vm355_vm0, %v346_v9, -inf }
  0x82   : > { %v456_v38 = vsel %vm355_vm0, %v347_v10, -inf  ;;  %v466_v39 = vsel %vm355_vm0, %v348_v11, -inf  ;;  %v1152_v40 = vmax.f32 %v401_v12, %v402_v31  ;;  %v1154_v41 = vmax.f32 %v411_v17, %v412_v32 }
  0x83   : > { %v1156_v42 = vmax.f32 %v421_v18, %v422_v33  ;;  %v1158_v43 = vmax.f32 %v431_v19, %v432_v34  ;;  %v437_v44 = vmax.f32 %v1105_v13, %v436_v36  ;;  %v447_v45 = vmax.f32 %v1107_v14, %v446_v37 }
  0x84   : > { %v457_v46 = vmax.f32 %v1109_v15, %v456_v38  ;;  %v467_v47 = vmax.f32 %v1111_v16, %v466_v39  ;;  %v476_v48 = vsel %vm355_vm0, %v349_v24, -inf  ;;  %v486_v49 = vsel %vm355_vm0, %v350_v25, -inf }
  0x85   : > { %v496_v50 = vsel %vm355_vm0, %v351_v30, -inf  ;;  %v506_v51 = vsel %vm355_vm0, %v352_v35, -inf  ;;  %v438_v52 = vrot.slane %v437_v44, 4  ;;  %v448_v53 = vrot.slane %v447_v45, 4 }
  0x86   : > { %v458_v54 = vrot.slane %v457_v46, 4  ;;  %v468_v55 = vrot.slane %v467_v47, 4  ;;  %v477_v13 = vmax.f32 %v1116_v20, %v476_v48  ;;  %v487_v14 = vmax.f32 %v1118_v21, %v486_v49 }
  0x87   : > { %v497_v15 = vmax.f32 %v1120_v22, %v496_v50  ;;  %v507_v16 = vmax.f32 %v1122_v23, %v506_v51  ;;  %v439_v56 = vmax.f32 %v437_v44, %v438_v52  ;;  %v449_v57 = vmax.f32 %v447_v45, %v448_v53 }
  0x88   : > { %v459_v58 = vmax.f32 %v457_v46, %v458_v54  ;;  %v469_v59 = vmax.f32 %v467_v47, %v468_v55  ;;  %v478_v60 = vrot.slane %v477_v13, 4  ;;  %v488_v61 = vrot.slane %v487_v14, 4 }
  0x89   : > { %v498_v62 = vrot.slane %v497_v15, 4  ;;  %v508_v63 = vrot.slane %v507_v16, 4  ;;  %v440_v0 = vrot.slane %v439_v56, 2  ;;  %v450_v1 = vrot.slane %v449_v57, 2 }
  0x8a   : > { %v460_v2 = vrot.slane %v459_v58, 2  ;;  %v470_v20 = vrot.slane %v469_v59, 2  ;;  %v479_v3 = vmax.f32 %v477_v13, %v478_v60  ;;  %v489_v21 = vmax.f32 %v487_v14, %v488_v61 }
  0x8b   : > { %v499_v4 = vmax.f32 %v497_v15, %v498_v62  ;;  %v509_v22 = vmax.f32 %v507_v16, %v508_v63  ;;  %v441_v5 = vmax.f32 %v439_v56, %v440_v0  ;;  %v451_v23 = vmax.f32 %v449_v57, %v450_v1 }
  0x8c   : > { %v461_v6 = vmax.f32 %v459_v58, %v460_v2  ;;  %v471_v7 = vmax.f32 %v469_v59, %v470_v20  ;;  %v480_v8 = vrot.slane %v479_v3, 2  ;;  %v490_v9 = vrot.slane %v489_v21, 2 }
  0x8d   : > { %v500_v10 = vrot.slane %v499_v4, 2  ;;  %v510_v11 = vrot.slane %v509_v22, 2  ;;  %v442_v12 = vrot.slane %v441_v5, 1  ;;  %v452_v17 = vrot.slane %v451_v23, 1 }
  0x8e   : > { %v462_v18 = vrot.slane %v461_v6, 1  ;;  %v472_v19 = vrot.slane %v471_v7, 1  ;;  %v481_v24 = vmax.f32 %v479_v3, %v480_v8  ;;  %v491_v25 = vmax.f32 %v489_v21, %v490_v9 }
  0x8f   : > { %v501_v30 = vmax.f32 %v499_v4, %v500_v10  ;;  %v511_v31 = vmax.f32 %v509_v22, %v510_v11  ;;  %v443_v32 = vmax.f32 %v441_v5, %v442_v12  ;;  %v453_v33 = vmax.f32 %v451_v23, %v452_v17 }
  0x90   : > { %v463_v34 = vmax.f32 %v461_v6, %v462_v18  ;;  %v473_v35 = vmax.f32 %v471_v7, %v472_v19  ;;  %v482_v36 = vrot.slane %v481_v24, 1  ;;  %v492_v37 = vrot.slane %v491_v25, 1 }
  0x91   : > { %v502_v38 = vrot.slane %v501_v30, 1  ;;  %v512_v39 = vrot.slane %v511_v31, 1  ;;  %v514_v44 = vmax.f32 %v1138_v26, 0.0  ;;  %v515_v45 = vmax.f32 %v1140_v27, 0.0 }
  0x92   : > { %v516_v46 = vmax.f32 %v1142_v28, 0.0  ;;  %v517_v47 = vmax.f32 %v1144_v29, 0.0  ;;  %v483_v48 = vmax.f32 %v481_v24, %v482_v36  ;;  %v493_v49 = vmax.f32 %v491_v25, %v492_v37 }
  0x93   : > { %v503_v50 = vmax.f32 %v501_v30, %v502_v38  ;;  %v513_v51 = vmax.f32 %v511_v31, %v512_v39  ;;  %v518_v52 = vmax.f32 %v1152_v40, 0.0  ;;  %v519_v53 = vmax.f32 %v1154_v41, 0.0 }
  0x94   : > { %v520_v54 = vmax.f32 %v1156_v42, 0.0  ;;  %v521_v55 = vmax.f32 %v1158_v43, 0.0  ;;  %v522_v26 = vmax.f32 %v443_v32, 0.0  ;;  %v523_v27 = vmax.f32 %v453_v33, 0.0 }
  0x95   : > { %v524_v28 = vmax.f32 %v463_v34, 0.0  ;;  %v525_v13 = vmax.f32 %v473_v35, 0.0  ;;  %v526_v29 = vmax.f32 %v483_v48, 0.0  ;;  %v527_v14 = vmax.f32 %v493_v49, 0.0 }
  0x96   : > { %v528_v15 = vmax.f32 %v503_v50, 0.0  ;;  %v529_v16 = vmax.f32 %v513_v51, 0.0  ;;  %v546_v56 = vrot.slane %v515_v45, 7  ;;  %v547_v40 = vrot.slane %v516_v46, 6 }
  0x97   : > { %v548_v57 = vrot.slane %v517_v47, 5  ;;  %v549_v41 = vrot.slane %v518_v52, 4  ;;  %v550_v58 = vrot.slane %v519_v53, 3  ;;  %v551_v42 = vrot.slane %v520_v54, 2 }
  0x98   : > { %v552_v59 = vrot.slane %v521_v55, 1  ;;  %v553_v43 = vrot.slane %v523_v27, 7  ;;  %v554_v60 = vrot.slane %v524_v28, 6  ;;  %v555_v61 = vrot.slane %v525_v13, 5 }
  0x99   : > { %v556_v62 = vrot.slane %v526_v29, 4  ;;  %v557_v63 = vrot.slane %v527_v14, 3  ;;  %v558_v0 = vrot.slane %v528_v15, 2  ;;  %v559_v1 = vrot.slane %v529_v16, 1 }
  0x9a   : > { %v560_v2 = vsel %vm355_vm0, %v514_v44, %v546_v56  ;;  %v562_v20 = vsel %vm561_vm1, %v547_v40, %v548_v57  ;;  %v566_v21 = vsel %vm565_vm3, %v549_v41, %v550_v58  ;;  %v568_v4 = vsel %vm567_vm4, %v551_v42, %v552_v59 }
  0x9b   : > { %v564_v3 = vsel %vm563_vm2, %v560_v2, %v562_v20  ;;  %v570_v22 = vsel %vm569_vm5, %v566_v21, %v568_v4  ;;  %v573_v5 = vsel %vm355_vm0, %v522_v26, %v553_v43  ;;  %v574_v23 = vsel %vm561_vm1, %v554_v60, %v555_v61 }
  0x9c   : > { %v572_v6 = vsel %vm571_vm6, %v564_v3, %v570_v22  ;;  %v575_v7 = vsel %vm563_vm2, %v573_v5, %v574_v23  ;;  %v576_v8 = vsel %vm565_vm3, %v556_v62, %v557_v63  ;;  %v577_v9 = vsel %vm567_vm4, %v558_v0, %v559_v1 }
  0x9d   : > { %v578_v10 = vsel %vm569_vm5, %v576_v8, %v577_v9  ;;  %582 = vst [vmem:[%s287_s16] sm:$0xff] %v572_v6 }
  0x9e   : > { %v579_v11 = vsel %vm571_vm6, %v575_v7, %v578_v10 }
  0x9f   : > { %583 = vst [vmem:[%s287_s16 + $0x8] sm:$0xff] %v579_v11 }
  0xa0 PF: > { %s11_s12 = sadd.s32 1, %s795_s12   ;;  %s1227_s6 = smov %s775_s7 }
  0xa1   : > { %p8_p12 = scmp.ge.s32.totalorder %s11_s12, 6   ;;  %s1228_s7 = smov %s858_s19 }
  0xa2   : > { %s1229_s8 = smov %s787_s10  ;;  %s1230_s9 = smov %s791_s11 }
  0xa3   : > { %s1231_s10 = smov %s1234_s13  ;;  %s1232_s11 = smov %s1238_s14 }
  0xa4   :  { %10 = sbr.rel (!%p8_p12) target bundleno = 4 (0x4), region = 82 }

// kernel: squeeze.3
= control target key start
LH: loop header
LB: loop body
LE: loop exit
PB: predicated region body
PF: predicated region fallthrough
CT: control target
= control target key end

     0   :  { %vm117_vm0 = vcmask 64512   ;;  %vm144_vm1 = vcmask 130048   ;;  %s650_s28 = smov 120   ;;  %s651_s2 = smov 112   ;;  %vm171_vm2 = vcmask 195584   ;;  %vm198_vm3 = vcmask 261120   ;;  %s1053_s0 = inlined_call_operand.vmem [shape: f32[2,3136], index: 0, kind: input, shape index: {}]   ;;  %s1054_s1 = inlined_call_operand.vmem [shape: f32[2,16,196], index: 1, kind: output, shape index: {}]  }
   0x1   :  { %v539_v0 = vld [vmem:[%s1053_s0 + $0x6] sm:$0x3]  ;;  %v536_v1 = vld [vmem:[%s1053_s0 + $0xc] sm:$0x3]  ;;  %v538_v2 = vld [vmem:[%s1053_s0 + $0x8] sm:$0x3] }
   0x2   :  { %91 = vst [vmem:[#allocation0 + $0x18] sm:$0x3] %v539_v0  ;;  %v535_v3 = vld [vmem:[%s1053_s0 + $0xe] sm:$0x3]  ;;  %v533_v4 = vld [vmem:[%s1053_s0 + $0x12] sm:$0x3] }
   0x3   :  { %79 = vst [vmem:[#allocation0 + $0x30] sm:$0x3] %v536_v1  ;;  %v530_v5 = vld [vmem:[%s1053_s0 + $0x18] sm:$0x3]  ;;  %v529_v6 = vld [vmem:[%s1053_s0 + $0x1a] sm:$0x3] }
   0x4   :  { %87 = vst [vmem:[#allocation0 + $0x20] sm:$0x3] %v538_v2  ;;  %v532_v7 = vld [vmem:[%s1053_s0 + $0x14] sm:$0x3]  ;;  %v527_v8 = vld [vmem:[%s1053_s0 + $0x1e] sm:$0x3] }
   0x5   :  { %75 = vst [vmem:[#allocation0 + $0x38] sm:$0x3] %v535_v3  ;;  %v523_v9 = vld [vmem:[%s1053_s0 + $0x26] sm:$0x3]  ;;  %v521_v11 = vld [vmem:[%s1053_s0 + $0x2a] sm:$0x3] }
   0x6   :  { %67 = vst [vmem:[#allocation0 + $0x48] sm:$0x3] %v533_v4  ;;  %v520_v13 = vld [vmem:[%s1053_s0 + $0x2c] sm:$0x3]  ;;  %v526_v19 = vld [vmem:[%s1053_s0 + $0x20] sm:$0x3] }
   0x7   :  { %55 = vst [vmem:[#allocation0 + $0x60] sm:$0x3] %v530_v5  ;;  %s652_s5 = smov 104   ;;  %v537_v21 = vld [vmem:[%s1053_s0 + $0xa] sm:$0x3]  ;;  %vm225_vm4 = vcmask 326656  }
   0x8   :  { %51 = vst [vmem:[#allocation0 + $0x68] sm:$0x3] %v529_v6  ;;  %v540_v25 = vld [vmem:[%s1053_s0 + $0x4] sm:$0x3]  ;;  %v528_v30 = vld [vmem:[%s1053_s0 + $0x1c] sm:$0x3] }
   0x9   :  { %v132_v10 = vld [vmem:[#allocation0 + $0x18] sm:$0x3]   ;;  %63 = vst [vmem:[#allocation0 + $0x50] sm:$0x3] %v532_v7  ;;  %v524_v27 = vld [vmem:[%s1053_s0 + $0x24] sm:$0x3] }
   0xa   :  { %133 = vrot.lane.b32.xlu0 %v132_v10, %s650_s28  ;;  %v159_v12 = vld [vmem:[#allocation0 + $0x30] sm:$0x3]   ;;  %43 = vst [vmem:[#allocation0 + $0x78] sm:$0x3] %v527_v8  ;;  %v531_v34 = vld [vmem:[%s1053_s0 + $0x16] sm:$0x3] }
   0xb   :  { %160 = vrot.lane.b32.xlu1 %v159_v12, %s651_s2  ;;  %v114_v14 = vld [vmem:[#allocation0 + $0x20] sm:$0x3]   ;;  %27 = vst [vmem:[#allocation0 + $0x98] sm:$0x3] %v523_v9  ;;  %v541_v36 = vld [vmem:[%s1053_s0 + $0x2] sm:$0x3] }
   0xc   :  { %v116_v15 = vld [vmem:[#allocation0 + $0x20] sm:$0x3]   ;;  %v141_v16 = vld [vmem:[#allocation0 + $0x38] sm:$0x3]   ;;  %19 = vst [vmem:[#allocation0 + $0xa8] sm:$0x3] %v521_v11 }
   0xd   :  { %v143_v17 = vld [vmem:[#allocation0 + $0x38] sm:$0x3]   ;;  %v186_v18 = vld [vmem:[#allocation0 + $0x48] sm:$0x3]   ;;  %15 = vst [vmem:[#allocation0 + $0xb0] sm:$0x3] %v520_v13  ;;  %v118_v20 = vsel %vm117_vm0, %v116_v15, %v114_v14 }
   0xe   :  { %187 = vrot.lane.b32.xlu2 %v186_v18, %s652_s5  ;;  %39 = vst [vmem:[#allocation0 + $0x80] sm:$0x3] %v526_v19  ;;  %v145_v22 = vsel %vm144_vm1, %v143_v17, %v141_v16  ;;  %v213_v31 = vld [vmem:[#allocation0 + $0x60] sm:$0x3]   ;;  %s653_s18 = smov 96   ;;  %vm252_vm5 = vcmask 392192  }
   0xf   :  { %83 = vst [vmem:[#allocation0 + $0x28] sm:$0x3] %v537_v21  ;;  %v195_v28 = vld [vmem:[#allocation0 + $0x68] sm:$0x3]   ;;  %v518_v38 = vld [vmem:[%s1053_s0 + $0x30] sm:$0x3] }
  0x10   :  { %v168_v23 = vld [vmem:[#allocation0 + $0x50] sm:$0x3]   ;;  %95 = vst [vmem:[#allocation0 + $0x10] sm:$0x3] %v540_v25  ;;  %v197_v29 = vld [vmem:[#allocation0 + $0x68] sm:$0x3]  }
  0x11   :  { %v170_v24 = vld [vmem:[#allocation0 + $0x50] sm:$0x3]   ;;  %31 = vst [vmem:[#allocation0 + $0x90] sm:$0x3] %v524_v27  ;;  %v199_v32 = vsel %vm198_vm3, %v197_v29, %v195_v28  ;;  %v522_v37 = vld [vmem:[%s1053_s0 + $0x28] sm:$0x3] }
  0x12   :  { %119 = vrot.lane.b32.xlu0 %v118_v20, %s650_s28  ;;  %v172_v26 = vsel %vm171_vm2, %v170_v24, %v168_v23  ;;  %47 = vst [vmem:[#allocation0 + $0x70] sm:$0x3] %v528_v30  ;;  %v519_v40 = vld [vmem:[%s1053_s0 + $0x2e] sm:$0x3]  ;;  %v249_v41 = vld [vmem:[#allocation0 + $0x98] sm:$0x3]  }
  0x13   :  { %146 = vrot.lane.b32.xlu1 %v145_v22, %s651_s2  ;;  %59 = vst [vmem:[#allocation0 + $0x58] sm:$0x3] %v531_v34  ;;  %v251_v42 = vld [vmem:[#allocation0 + $0x98] sm:$0x3]   ;;  %s654_s25 = smov 88   ;;  %vm104_vm6 = vcmask 556032  }
  0x14   :  { %99 = vst [vmem:[#allocation0 + $0x8] sm:$0x3] %v541_v36  ;;  %v240_v43 = vld [vmem:[#allocation0 + $0x78] sm:$0x3]   ;;  %v253_v44 = vsel %vm252_vm5, %v251_v42, %v249_v41  ;;  %v534_v46 = vld [vmem:[%s1053_s0 + $0x10] sm:$0x3] }
  0x15   :  { %v222_v33 = vld [vmem:[#allocation0 + $0x80] sm:$0x3]   ;;  %23 = vst [vmem:[#allocation0 + $0xa0] sm:$0x3] %v522_v37  ;;  %s655_s30 = smov 80   ;;  %vm279_vm7 = vcmask 457728  }
  0x16   :  { %173 = vrot.lane.b32.xlu2 %v172_v26, %s652_s5  ;;  %v224_v35 = vld [vmem:[#allocation0 + $0x80] sm:$0x3]   ;;  %7 = vst [vmem:[#allocation0 + $0xc0] sm:$0x3] %v518_v38  ;;  %v276_v48 = vld [vmem:[#allocation0 + $0xb0] sm:$0x3]  }
  0x17   :  { %v226_v39 = vsel %vm225_vm4, %v224_v35, %v222_v33  ;;  %11 = vst [vmem:[#allocation0 + $0xb8] sm:$0x3] %v519_v40  ;;  %v278_v49 = vld [vmem:[#allocation0 + $0xb0] sm:$0x3]   ;;  %v294_v50 = vld [vmem:[#allocation0 + $0xa8] sm:$0x3]  }
  0x18   :  { %v267_v47 = vld [vmem:[#allocation0 + $0x90] sm:$0x3]   ;;  %71 = vst [vmem:[#allocation0 + $0x40] sm:$0x3] %v534_v46  ;;  %v280_v51 = vsel %vm279_vm7, %v278_v49, %v276_v48  ;;  %v305_v52 = vld [vmem:[#allocation0 + $0x18] sm:$0x3]  }
  0x19   :  { %v525_v54 = vld [vmem:[%s1053_s0 + $0x22] sm:$0x3]  ;;  %s656_s6 = smov 72   ;;  %vm333_vm8 = vcmask 621568   ;;  %v332_v57 = vld [vmem:[#allocation0 + $0x30] sm:$0x3]  }
  0x1a   :  { %200 = vrot.lane.b32.xlu0 %v199_v32, %s653_s18  ;;  %35 = vst [vmem:[#allocation0 + $0x88] sm:$0x3] %v525_v54  ;;  %v330_v56 = vld.sshfl [vmem:[#allocation0 + $0x20] sm:$0xff pattern:$0x99999180]   ;;  %s657_s7 = smov 60  }
  0x1b   :  { %214 = vrot.lane.b32.xlu1 %v213_v31, %s653_s18  ;;  %v103_v45 = vld [vmem:[#allocation0 + $0x8] sm:$0x3]   ;;  %v321_v58 = vld [vmem:[#allocation0 + $0x10] sm:$0x3]   ;;  %v334_v59 = vsel %vm333_vm8, %v332_v57, %v330_v56  ;;  %vm360_vm9 = vcmask 687104   ;;  %s658_s8 = smov 52  }
  0x1c   :  { %542 = vst.msk [vmem:[%s1054_s1 + $0x8] sm:$0x1] %vm104_vm6, %v103_v45   ;;  %v303_v53 = vld.sshfl [vmem:[#allocation0 + $0x8] sm:$0xff pattern:$0x99999180]   ;;  %vm387_vm10 = vcmask 752640  }
  0x1d   :  { %543 = vst.msk [vmem:[%s1054_s1 + $0x27] sm:$0x2] %vm104_vm6, %v103_v45   ;;  %v307_v55 = vsel %vm104_vm6, %v305_v52, %v303_v53  ;;  %v359_v61 = vld [vmem:[#allocation0 + $0x48] sm:$0x3]   ;;  %v386_v0 = vld [vmem:[#allocation0 + $0x60] sm:$0x3]  }
  0x1e   :  { %227 = vrot.lane.b32.xlu2 %v226_v39, %s654_s25  ;;  %v384_v63 = vld.sshfl [vmem:[#allocation0 + $0x50] sm:$0xff pattern:$0x99999180]   ;;  %vm414_vm11 = vcmask 818176   ;;  %s659_s9 = smov 44   ;;  %vm441_vm12 = vcmask 883712  }
  0x1f   :  { %v357_v60 = vld.sshfl [vmem:[#allocation0 + $0x38] sm:$0xff pattern:$0x99999180]   ;;  %v411_v1 = vld.sshfl [vmem:[#allocation0 + $0x68] sm:$0xff pattern:$0x99999180]   ;;  %v388_v3 = vsel %vm387_vm10, %v386_v0, %v384_v63 }
  0x20   :  { %v361_v62 = vsel %vm360_vm9, %v359_v61, %v357_v60  ;;  %v413_v2 = vld [vmem:[#allocation0 + $0x78] sm:$0x3]   ;;  %v440_v6 = vld [vmem:[#allocation0 + $0x90] sm:$0x3]   ;;  %s660_s10 = smov 36   ;;  %s661_s11 = smov 28  }
  0x21   :  { %v415_v4 = vsel %vm414_vm11, %v413_v2, %v411_v1  ;;  %v438_v5 = vld.sshfl [vmem:[#allocation0 + $0x80] sm:$0xff pattern:$0x99999180]   ;;  %vm468_vm13 = vcmask 949248   ;;  %vm495_vm14 = vcmask 1014784   ;;  %s662_s12 = smov 20  }
  0x22   :  { %241 = vrot.lane.b32.xlu0 %v240_v43, %s654_s25  ;;  %v442_v7 = vsel %vm441_vm12, %v440_v6, %v438_v5  ;;  %v465_v8 = vld.sshfl [vmem:[#allocation0 + $0x98] sm:$0xff pattern:$0x99999180]   ;;  %v467_v9 = vld [vmem:[#allocation0 + $0xa8] sm:$0x3]   ;;  %s663_s13 = smov 12  }
  0x23   :  { %254 = vrot.lane.b32.xlu1 %v253_v44, %s655_s30  ;;  %v492_v10 = vld.sshfl [vmem:[#allocation0 + $0xb0] sm:$0xff pattern:$0x99999180]   ;;  %v494_v11 = vld [vmem:[#allocation0 + $0xc0] sm:$0x3]   ;;  %v469_v12 = vsel %vm468_vm13, %v467_v9, %v465_v8  ;;  %s664_s14 = smov 4  }
  0x24   :  { %v496_v13 = vsel %vm495_vm14, %v494_v11, %v492_v10  ;;  %v348_v14 = vld [vmem:[#allocation0 + $0x28] sm:$0x3]   ;;  %v375_v15 = vld [vmem:[#allocation0 + $0x40] sm:$0x3]   ;;  %v402_v16 = vld [vmem:[#allocation0 + $0x58] sm:$0x3]  }
  0x25   :  { %v429_v17 = vld [vmem:[#allocation0 + $0x70] sm:$0x3]   ;;  %v456_v18 = vld [vmem:[#allocation0 + $0x88] sm:$0x3]   ;;  %v483_v19 = vld [vmem:[#allocation0 + $0xa0] sm:$0x3]  }
  0x26   :  { %268 = vrot.lane.b32.xlu2 %v267_v47, %s655_s30  ;;  %v510_v20 = vld [vmem:[#allocation0 + $0xb8] sm:$0x3]   ;;  %vm180_vm15 = vcmask 1048384   ;;  %vm189_vm0 = vcmask 850944   ;;  %vm234_vm1 = vcmask 1048256   ;;  %vm126_vm2 = vcmask 1048512  }
  0x27   :  { %vm135_vm3 = vcmask 982016   ;;  %vm153_vm4 = vcmask 1048448   ;;  %vm162_vm5 = vcmask 916480   ;;  %vm207_vm7 = vcmask 1048320  }
  0x28   :  { %vm216_vm8 = vcmask 785408   ;;  %vm243_vm9 = vcmask 719872   ;;  %vm261_vm10 = vcmask 1048192   ;;  %vm310_vm11 = vcmask 490496  }
  0x29   :  { %vm315_vm12 = vcmask 556512   ;;  %vm270_vm13 = vcmask 654336   ;;  %vm288_vm14 = vcmask 1048128  }
  0x2a   :  { %281 = vrot.lane.b32.xlu0 %v280_v51, %s656_s6  ;;  %v100_v51 = vld [vmem:[%s1053_s0] sm:$0x3] }
  0x2b   :  { %295 = vrot.lane.b32.xlu1 %v294_v50, %s656_s6  ;;  %101 = vst [vmem:[#allocation0] sm:$0x3] %v100_v51 }
  0x2e   :  { %308 = vrot.lane.b32.xlu2 %v307_v55, %s657_s7 }
  0x32   :  { %322 = vrot.lane.b32.xlu0 %v321_v58, %s657_s7  ;;  %v109_v52 = vld [vmem:[#allocation0] sm:$0x3]  }
  0x33   :  { %335 = vrot.lane.b32.xlu1 %v334_v59, %s658_s8  ;;  %110 = vst [vmem:[%s1054_s1] sm:$0x1] %v109_v52  }
  0x34   :  { %544 = vst [vmem:[%s1054_s1 + $0x1f] sm:$0x2] %v109_v52  }
  0x36   :  { %362 = vrot.lane.b32.xlu2 %v361_v62, %s659_s9 }
  0x3a   :  { %389 = vrot.lane.b32.xlu0 %v388_v3, %s660_s10 }
  0x3b   :  { %416 = vrot.lane.b32.xlu1 %v415_v4, %s661_s11 }
  0x3e   :  { %443 = vrot.lane.b32.xlu2 %v442_v7, %s662_s12 }
  0x42   :  { %470 = vrot.lane.b32.xlu0 %v469_v12, %s663_s13 }
  0x43   :  { %497 = vrot.lane.b32.xlu1 %v496_v13, %s664_s14 }
  0x46   :  { %349 = vrot.lane.b32.xlu2 %v348_v14, %s658_s8 }
  0x4a   :  { %376 = vrot.lane.b32.xlu0 %v375_v15, %s659_s9 }
  0x4b   :  { %403 = vrot.lane.b32.xlu1 %v402_v16, %s660_s10 }
  0x4e   :  { %430 = vrot.lane.b32.xlu2 %v429_v17, %s661_s11 }
  0x52   :  { %457 = vrot.lane.b32.xlu0 %v456_v18, %s662_s12 }
  0x53   :  { %484 = vrot.lane.b32.xlu1 %v483_v19, %s663_s13 }
  0x56   :  { %511 = vrot.lane.b32.xlu2 %v510_v20, %s664_s14 }
  0x68   :  { %v188_v21 = vpop.permute.xlu2 %187  }
  0x70   :  { %v174_v22 = vpop.permute.xlu2 %173  }
  0x71   :  { %557 = vst.msk [vmem:[%s1054_s1 + $0xe] sm:$0x1] %vm104_vm6, %v174_v22  }
  0x72   :  { %558 = vst.msk [vmem:[%s1054_s1 + $0x2d] sm:$0x2] %vm104_vm6, %v174_v22  }
  0x73   :  { %559 = vst.msk [vmem:[%s1054_s1 + $0x6] sm:$0x1] %vm180_vm15, %v174_v22  }
  0x74   :  { %560 = vst.msk [vmem:[%s1054_s1 + $0x25] sm:$0x2] %vm180_vm15, %v174_v22   ;;  %vm369_vm15 = vcmask 556384  }
  0x75   :  { %561 = vst.msk [vmem:[%s1054_s1 + $0x6] sm:$0x1] %vm189_vm0, %v188_v21  }
  0x76   :  { %562 = vst.msk [vmem:[%s1054_s1 + $0x25] sm:$0x2] %vm189_vm0, %v188_v21   ;;  %vm297_vm0 = vcmask 588800  }
  0x78   :  { %v228_v23 = vpop.permute.xlu2 %227  }
  0x79   :  { %569 = vst.msk [vmem:[%s1054_s1 + $0x1a] sm:$0x1] %vm104_vm6, %v228_v23  }
  0x7a   :  { %570 = vst.msk [vmem:[%s1054_s1 + $0x39] sm:$0x2] %vm104_vm6, %v228_v23  }
  0x7b   :  { %571 = vst.msk [vmem:[%s1054_s1 + $0x12] sm:$0x1] %vm234_vm1, %v228_v23  }
  0x7c   :  { %v134_v24 = vpop.permute.xlu0 %133   ;;  %572 = vst.msk [vmem:[%s1054_s1 + $0x31] sm:$0x2] %vm234_vm1, %v228_v23   ;;  %vm337_vm1 = vcmask 424960  }
  0x7d   :  { %v161_v25 = vpop.permute.xlu1 %160  }
  0x80   :  { %v269_v26 = vpop.permute.xlu2 %268  }
  0x84   :  { %v120_v27 = vpop.permute.xlu0 %119  }
  0x85   :  { %545 = vst.msk [vmem:[%s1054_s1 + $0xa] sm:$0x1] %vm104_vm6, %v120_v27   ;;  %v147_v28 = vpop.permute.xlu1 %146  }
  0x86   :  { %546 = vst.msk [vmem:[%s1054_s1 + $0x29] sm:$0x2] %vm104_vm6, %v120_v27  }
  0x87   :  { %547 = vst.msk [vmem:[%s1054_s1 + $0x2] sm:$0x1] %vm126_vm2, %v120_v27  }
  0x88   :  { %548 = vst.msk [vmem:[%s1054_s1 + $0x21] sm:$0x2] %vm126_vm2, %v120_v27   ;;  %v309_v29 = vpop.permute.xlu2 %308   ;;  %vm342_vm2 = vcmask 556448  }
  0x89   :  { %551 = vst.msk [vmem:[%s1054_s1 + $0xc] sm:$0x1] %vm104_vm6, %v147_v28  }
  0x8a   :  { %552 = vst.msk [vmem:[%s1054_s1 + $0x2b] sm:$0x2] %vm104_vm6, %v147_v28  }
  0x8b   :  { %549 = vst.msk [vmem:[%s1054_s1 + $0x2] sm:$0x1] %vm135_vm3, %v134_v24  }
  0x8c   :  { %550 = vst.msk [vmem:[%s1054_s1 + $0x21] sm:$0x2] %vm135_vm3, %v134_v24   ;;  %v201_v30 = vpop.permute.xlu0 %200   ;;  %vm324_vm3 = vcmask 1048032  }
  0x8d   :  { %553 = vst.msk [vmem:[%s1054_s1 + $0x4] sm:$0x1] %vm153_vm4, %v147_v28   ;;  %v215_v31 = vpop.permute.xlu1 %214  }
  0x8e   :  { %554 = vst.msk [vmem:[%s1054_s1 + $0x23] sm:$0x2] %vm153_vm4, %v147_v28   ;;  %vm445_vm4 = vcmask 162816  }
  0x8f   :  { %555 = vst.msk [vmem:[%s1054_s1 + $0x4] sm:$0x1] %vm162_vm5, %v161_v25  }
  0x90   :  { %556 = vst.msk [vmem:[%s1054_s1 + $0x23] sm:$0x2] %vm162_vm5, %v161_v25   ;;  %v363_v32 = vpop.permute.xlu2 %362   ;;  %vm450_vm5 = vcmask 556192  }
  0x91   :  { %563 = vst.msk [vmem:[%s1054_s1 + $0x18] sm:$0x1] %vm104_vm6, %v201_v30  }
  0x92   :  { %564 = vst.msk [vmem:[%s1054_s1 + $0x37] sm:$0x2] %vm104_vm6, %v201_v30  }
  0x93   :  { %565 = vst.msk [vmem:[%s1054_s1 + $0x10] sm:$0x1] %vm207_vm7, %v201_v30  }
  0x94   :  { %566 = vst.msk [vmem:[%s1054_s1 + $0x2f] sm:$0x2] %vm207_vm7, %v201_v30   ;;  %v242_v33 = vpop.permute.xlu0 %241   ;;  %vm418_vm7 = vcmask 228352  }
  0x95   :  { %567 = vst.msk [vmem:[%s1054_s1 + $0x10] sm:$0x1] %vm216_vm8, %v215_v31   ;;  %v255_v34 = vpop.permute.xlu1 %254  }
  0x96   :  { %568 = vst.msk [vmem:[%s1054_s1 + $0x2f] sm:$0x2] %vm216_vm8, %v215_v31   ;;  %vm423_vm8 = vcmask 556256  }
  0x97   :  { %573 = vst.msk [vmem:[%s1054_s1 + $0x12] sm:$0x1] %vm243_vm9, %v242_v33  }
  0x98   :  { %574 = vst.msk [vmem:[%s1054_s1 + $0x31] sm:$0x2] %vm243_vm9, %v242_v33   ;;  %v444_v35 = vpop.permute.xlu2 %443   ;;  %vm391_vm9 = vcmask 293888  }
  0x99   :  { %575 = vst.msk [vmem:[%s1054_s1 + $0x1c] sm:$0x1] %vm104_vm6, %v255_v34  }
  0x9a   :  { %576 = vst.msk [vmem:[%s1054_s1 + $0x3b] sm:$0x2] %vm104_vm6, %v255_v34  }
  0x9b   :  { %577 = vst.msk [vmem:[%s1054_s1 + $0x14] sm:$0x1] %vm261_vm10, %v255_v34  }
  0x9c   :  { %578 = vst.msk [vmem:[%s1054_s1 + $0x33] sm:$0x2] %vm261_vm10, %v255_v34   ;;  %v282_v36 = vpop.permute.xlu0 %281   ;;  %vm396_vm10 = vcmask 556320  }
  0x9d   :  { %587 = vst.msk [vmem:[%s1054_s1 + $0x1] ss:$8 sm:$0x3] %vm310_vm11, %v309_v29   ;;  %v296_v37 = vpop.permute.xlu1 %295  }
  0x9e   :  { %588 = vst.msk [vmem:[%s1054_s1 + $0x11] ss:$8 sm:$0xc] %vm310_vm11, %v309_v29   ;;  %vm351_vm11 = vcmask 1047968  }
  0x9f   :  { %589 = vst.msk [vmem:[%s1054_s1 + $0x9] sm:$0x1] %vm315_vm12, %v309_v29  }
  0xa0   :  { %590 = vst.msk [vmem:[%s1054_s1 + $0x28] sm:$0x2] %vm315_vm12, %v309_v29   ;;  %v350_v38 = vpop.permute.xlu2 %349   ;;  %vm472_vm12 = vcmask 97280  }
  0xa1   :  { %579 = vst.msk [vmem:[%s1054_s1 + $0x14] sm:$0x1] %vm270_vm13, %v269_v26  }
  0xa2   :  { %580 = vst.msk [vmem:[%s1054_s1 + $0x33] sm:$0x2] %vm270_vm13, %v269_v26   ;;  %vm477_vm13 = vcmask 556128  }
  0xa3   :  { %581 = vst.msk [vmem:[%s1054_s1 + $0x1e] sm:$0x1] %vm104_vm6, %v282_v36  }
  0xa4   :  { %582 = vst.msk [vmem:[%s1054_s1 + $0x3d] sm:$0x2] %vm104_vm6, %v282_v36   ;;  %vm364_vm6 = vcmask 359424   ;;  %v323_v39 = vpop.permute.xlu0 %322  }
  0xa5   :  { %583 = vst.msk [vmem:[%s1054_s1 + $0x16] sm:$0x1] %vm288_vm14, %v282_v36   ;;  %v336_v40 = vpop.permute.xlu1 %335  }
  0xa6   :  { %584 = vst.msk [vmem:[%s1054_s1 + $0x35] sm:$0x2] %vm288_vm14, %v282_v36   ;;  %vm499_vm14 = vcmask 31744  }
  0xa7   :  { %599 = vst.msk [vmem:[%s1054_s1 + $0x5] ss:$8 sm:$0x3] %vm364_vm6, %v363_v32  }
  0xa8   :  { %600 = vst.msk [vmem:[%s1054_s1 + $0x15] ss:$8 sm:$0xc] %vm364_vm6, %v363_v32   ;;  %v431_v41 = vpop.permute.xlu2 %430   ;;  %vm504_vm6 = vcmask 556064  }
  0xa9   :  { %601 = vst.msk [vmem:[%s1054_s1 + $0xd] sm:$0x1] %vm369_vm15, %v363_v32  }
  0xaa   :  { %602 = vst.msk [vmem:[%s1054_s1 + $0x2c] sm:$0x2] %vm369_vm15, %v363_v32   ;;  %vm432_vm15 = vcmask 1047776  }
  0xab   :  { %585 = vst.msk [vmem:[%s1054_s1 + $0x16] sm:$0x1] %vm297_vm0, %v296_v37  }
  0xac   :  { %586 = vst.msk [vmem:[%s1054_s1 + $0x35] sm:$0x2] %vm297_vm0, %v296_v37   ;;  %v390_v42 = vpop.permute.xlu0 %389   ;;  %vm378_vm0 = vcmask 1047904  }
  0xad   :  { %593 = vst.msk [vmem:[%s1054_s1 + $0x3] ss:$8 sm:$0x3] %vm337_vm1, %v336_v40   ;;  %v417_v43 = vpop.permute.xlu1 %416  }
  0xae   :  { %594 = vst.msk [vmem:[%s1054_s1 + $0x13] ss:$8 sm:$0xc] %vm337_vm1, %v336_v40   ;;  %vm405_vm1 = vcmask 1047840  }
  0xaf   :  { %595 = vst.msk [vmem:[%s1054_s1 + $0xb] sm:$0x1] %vm342_vm2, %v336_v40  }
  0xb0   :  { %596 = vst.msk [vmem:[%s1054_s1 + $0x2a] sm:$0x2] %vm342_vm2, %v336_v40   ;;  %v512_v44 = vpop.permute.xlu2 %511   ;;  %vm459_vm2 = vcmask 1047712  }
  0xb1   :  { %591 = vst.msk [vmem:[%s1054_s1 + $0x1] sm:$0x1] %vm324_vm3, %v323_v39  }
  0xb2   :  { %592 = vst.msk [vmem:[%s1054_s1 + $0x20] sm:$0x2] %vm324_vm3, %v323_v39   ;;  %vm513_vm3 = vcmask 1047584  }
  0xb3   :  { %617 = vst.msk [vmem:[%s1054_s1 + $0x13] ss:$8 sm:$0x3] %vm445_vm4, %v444_v35  }
  0xb4   :  { %618 = vst.msk [vmem:[%s1054_s1 + $0x23] ss:$8 sm:$0xc] %vm445_vm4, %v444_v35   ;;  %v471_v45 = vpop.permute.xlu0 %470   ;;  %vm486_vm4 = vcmask 1047648  }
  0xb5   :  { %619 = vst.msk [vmem:[%s1054_s1 + $0x1b] sm:$0x1] %vm450_vm5, %v444_v35   ;;  %v498_v46 = vpop.permute.xlu1 %497  }
  0xb6   :  { %620 = vst.msk [vmem:[%s1054_s1 + $0x3a] sm:$0x2] %vm450_vm5, %v444_v35  }
  0xb7   :  { %611 = vst.msk [vmem:[%s1054_s1 + $0x11] ss:$8 sm:$0x3] %vm418_vm7, %v417_v43  }
  0xb8   :  { %612 = vst.msk [vmem:[%s1054_s1 + $0x21] ss:$8 sm:$0xc] %vm418_vm7, %v417_v43  }
  0xb9   :  { %613 = vst.msk [vmem:[%s1054_s1 + $0x19] sm:$0x1] %vm423_vm8, %v417_v43  }
  0xba   :  { %614 = vst.msk [vmem:[%s1054_s1 + $0x38] sm:$0x2] %vm423_vm8, %v417_v43  }
  0xbb   :  { %605 = vst.msk [vmem:[%s1054_s1 + $0x7] ss:$8 sm:$0x3] %vm391_vm9, %v390_v42  }
  0xbc   :  { %606 = vst.msk [vmem:[%s1054_s1 + $0x17] ss:$8 sm:$0xc] %vm391_vm9, %v390_v42   ;;  %v377_v47 = vpop.permute.xlu0 %376  }
  0xbd   :  { %607 = vst.msk [vmem:[%s1054_s1 + $0xf] sm:$0x1] %vm396_vm10, %v390_v42   ;;  %v404_v48 = vpop.permute.xlu1 %403  }
  0xbe   :  { %608 = vst.msk [vmem:[%s1054_s1 + $0x2e] sm:$0x2] %vm396_vm10, %v390_v42  }
  0xbf   :  { %597 = vst.msk [vmem:[%s1054_s1 + $0x3] sm:$0x1] %vm351_vm11, %v350_v38  }
  0xc0   :  { %598 = vst.msk [vmem:[%s1054_s1 + $0x22] sm:$0x2] %vm351_vm11, %v350_v38  }
  0xc1   :  { %623 = vst.msk [vmem:[%s1054_s1 + $0x15] ss:$8 sm:$0x3] %vm472_vm12, %v471_v45  }
  0xc2   :  { %624 = vst.msk [vmem:[%s1054_s1 + $0x25] ss:$8 sm:$0xc] %vm472_vm12, %v471_v45  }
  0xc3   :  { %625 = vst.msk [vmem:[%s1054_s1 + $0x1d] sm:$0x1] %vm477_vm13, %v471_v45  }
  0xc4   :  { %626 = vst.msk [vmem:[%s1054_s1 + $0x3c] sm:$0x2] %vm477_vm13, %v471_v45   ;;  %v458_v49 = vpop.permute.xlu0 %457  }
  0xc5   :  { %629 = vst.msk [vmem:[%s1054_s1 + $0x17] ss:$8 sm:$0x3] %vm499_vm14, %v498_v46   ;;  %v485_v50 = vpop.permute.xlu1 %484  }
  0xc6   :  { %630 = vst.msk [vmem:[%s1054_s1 + $0x27] ss:$8 sm:$0xc] %vm499_vm14, %v498_v46  }
  0xc7   :  { %631 = vst.msk [vmem:[%s1054_s1 + $0x1f] sm:$0x1] %vm504_vm6, %v498_v46  }
  0xc8   :  { %632 = vst.msk [vmem:[%s1054_s1 + $0x3e] sm:$0x2] %vm504_vm6, %v498_v46  }
  0xc9   :  { %615 = vst.msk [vmem:[%s1054_s1 + $0x11] sm:$0x1] %vm432_vm15, %v431_v41  }
  0xca   :  { %616 = vst.msk [vmem:[%s1054_s1 + $0x30] sm:$0x2] %vm432_vm15, %v431_v41  }
  0xcb   :  { %603 = vst.msk [vmem:[%s1054_s1 + $0x5] sm:$0x1] %vm378_vm0, %v377_v47  }
  0xcc   :  { %604 = vst.msk [vmem:[%s1054_s1 + $0x24] sm:$0x2] %vm378_vm0, %v377_v47  }
  0xcd   :  { %609 = vst.msk [vmem:[%s1054_s1 + $0x7] sm:$0x1] %vm405_vm1, %v404_v48  }
  0xce   :  { %610 = vst.msk [vmem:[%s1054_s1 + $0x26] sm:$0x2] %vm405_vm1, %v404_v48  }
  0xcf   :  { %621 = vst.msk [vmem:[%s1054_s1 + $0x13] sm:$0x1] %vm459_vm2, %v458_v49  }
  0xd0   :  { %622 = vst.msk [vmem:[%s1054_s1 + $0x32] sm:$0x2] %vm459_vm2, %v458_v49  }
  0xd1   :  { %633 = vst.msk [vmem:[%s1054_s1 + $0x17] sm:$0x1] %vm513_vm3, %v512_v44  }
  0xd2   :  { %634 = vst.msk [vmem:[%s1054_s1 + $0x36] sm:$0x2] %vm513_vm3, %v512_v44  }
  0xd3   :  { %627 = vst.msk [vmem:[%s1054_s1 + $0x15] sm:$0x1] %vm486_vm4, %v485_v50  }
  0xd4   :  { %628 = vst.msk [vmem:[%s1054_s1 + $0x34] sm:$0x2] %vm486_vm4, %v485_v50  }

// kernel: cbam_cnn_forward.13
= control target key start
LH: loop header
LB: loop body
LE: loop exit
PB: predicated region body
PF: predicated region fallthrough
CT: control target
= control target key end

     0   :  { %vm37_vm0 = vcmask 556032   ;;  %v438_v24 = vmov 196.0   ;;  %vm85_vm2 = vcmask 31744   ;;  %s659_s0 = inlined_call_operand.vmem [shape: f32[2,16,196], index: 0, kind: input, shape index: {}]   ;;  %s660_s1 = inlined_call_operand.vmem [shape: f32[1,16,4], index: 1, kind: input, shape index: {}]   ;;  %s661_s2 = inlined_call_operand.vmem [shape: f32[1,1,4], index: 2, kind: input, shape index: {}]   ;;  %s662_s3 = inlined_call_operand.vmem [shape: f32[1,16,4], index: 3, kind: input, shape index: {}]   ;;  %s663_s4 = inlined_call_operand.vmem [shape: f32[1,16,1], index: 4, kind: input, shape index: {}]   ;;  %s664_s5 = inlined_call_operand.vmem [shape: f32[2,16,196], index: 5, kind: output, shape index: {0}]   ;;  %s665_s6 = inlined_call_operand.vmem [shape: f32[2,2,196], index: 6, kind: output, shape index: {1}]  }
   0x1   :  { %v479_v0 = vld [vmem:[%s659_s0 + $0x20] sm:$0xff]  ;;  %v484_v1 = vld [vmem:[%s659_s0 + $0x28] sm:$0xff]  ;;  %v506_v8 = vld [vmem:[%s659_s0 + $0x38] sm:$0xff]  ;;  %418 = vrcp.f32 %v438_v24 }
   0x2   :  { %v489_v2 = vld [vmem:[%s659_s0] sm:$0xff]  ;;  %v46_v3 = vsel %vm37_vm0, %v484_v1, 0.0  ;;  %v496_v4 = vld [vmem:[%s659_s0 + $0x8] sm:$0xff]  ;;  %v513_v11 = vld [vmem:[%s659_s0 + $0x18] sm:$0xff]  ;;  %v50_v13 = vsel %vm37_vm0, %v506_v8, 0.0  ;;  %v77_v20 = vsel %vm37_vm0, %v506_v8, -inf }
   0x3   :  { %v47_v5 = vadd.f32 %v46_v3, %v479_v0  ;;  %v65_v6 = vsel %vm37_vm0, %v496_v4, -inf  ;;  %v38_v7 = vsel %vm37_vm0, %v496_v4, 0.0  ;;  %v518_v12 = vld [vmem:[%s659_s0 + $0x30] sm:$0xff]  ;;  %v69_v15 = vsel %vm37_vm0, %v513_v11, -inf  ;;  %v30_v35 = vld [vmem:[%s660_s1] sm:$0xff]  ;;  %v31_v39 = vld [vmem:[%s660_s1 + $0x8] sm:$0xff] }
   0x4   :  { %v66_v9 = vmax.f32 %v489_v2, %v65_v6  ;;  %v39_v10 = vadd.f32 %v38_v7, %v489_v2  ;;  %v525_v14 = vld [vmem:[%s659_s0 + $0x10] sm:$0xff]  ;;  %v42_v16 = vsel %vm37_vm0, %v513_v11, 0.0  ;;  %v51_v17 = vadd.f32 %v50_v13, %v518_v12 }
   0x5   :  { %48 = vadd.xlane.f32.xlu1 %v47_v5  ;;  %v70_v18 = vmax.f32 %v525_v14, %v69_v15  ;;  %v43_v19 = vadd.f32 %v42_v16, %v525_v14  ;;  %v73_v21 = vsel %vm37_vm0, %v484_v1, -inf  ;;  %v78_v22 = vmax.f32 %v518_v12, %v77_v20 }
   0x6   :  { %67 = vmax.xlane.f32.xlu2 %v66_v9  ;;  %40 = vadd.xlane.f32.xlu0 %v39_v10  ;;  %v74_v23 = vmax.f32 %v479_v0, %v73_v21 }
   0x7   :  { %v419_v25 = vpop.eup %418 }
   0x8   :  { %v55_v26 = vmul.f32 196.0, %v419_v25  ;;  %vm59_vm1 = vweird.f32 %v419_v25 }
   0xa   :  { %v56_v27 = vsub.f32 1.0, %v55_v26 }
   0xc   :  { %v57_v28 = vmul.f32 %v419_v25, %v56_v27 }
   0xd   :  { %52 = vadd.xlane.f32.xlu1 %v51_v17 }
   0xe   :  { %71 = vmax.xlane.f32.xlu2 %v70_v18  ;;  %44 = vadd.xlane.f32.xlu0 %v43_v19  ;;  %v58_v29 = vadd.f32 %v419_v25, %v57_v28 }
  0x10   :  { %v60_v33 = vsel %vm59_vm1, %v419_v25, %v58_v29 }
  0x15   :  { %79 = vmax.xlane.f32.xlu1 %v78_v22 }
  0x16   :  { %75 = vmax.xlane.f32.xlu0 %v74_v23  ;;  %v32_v23 = vld [vmem:[%s661_s2] sm:$0x1] }
  0x78   :  { %v49_v30 = vpop.xlane.xlu1 %48 }
  0x79   :  { %v68_v31 = vpop.xlane.xlu2 %67  ;;  %v41_v32 = vpop.xlane.xlu0 %40  ;;  %v63_v34 = vmul.f32 %v60_v33, %v49_v30 }
  0x7a   :  { %v130_v36 = vmul.f32 %v68_v31, %v30_v35  ;;  %v61_v37 = vmul.f32 %v60_v33, %v41_v32 }
  0x7b   :  { %v83_v38 = vmul.f32 %v63_v34, %v30_v35 }
  0x7c   :  { %v134_v44 = vsel %vm85_vm2, %v130_v36, 0.0  ;;  %v81_v45 = vmul.f32 %v61_v37, %v30_v35  ;;  %v33_v36 = vld [vmem:[%s662_s3] sm:$0xff] }
  0x7d   :  { %v95_v48 = vsel %vm85_vm2, %v83_v38, 0.0 }
  0x7e   :  { %v86_v54 = vsel %vm85_vm2, %v81_v45, 0.0 }
  0x80   :  { %v53_v40 = vpop.xlane.xlu1 %52 }
  0x81   :  { %v64_v41 = vmul.f32 %v60_v33, %v53_v40  ;;  %v72_v42 = vpop.xlane.xlu2 %71  ;;  %v45_v43 = vpop.xlane.xlu0 %44 }
  0x82   :  { %v131_v46 = vmul.f32 %v72_v42, %v31_v39  ;;  %v62_v47 = vmul.f32 %v60_v33, %v45_v43 }
  0x83   :  { %v84_v49 = vmul.f32 %v64_v41, %v31_v39 }
  0x84   :  { %v135_v50 = vsel %vm85_vm2, %v131_v46, 0.0  ;;  %v82_v51 = vmul.f32 %v62_v47, %v31_v39 }
  0x85   :  { %v96_v52 = vsel %vm85_vm2, %v84_v49, 0.0  ;;  %v136_v53 = vadd.f32 %v135_v50, %v134_v44  ;;  %v34_v49 = vld [vmem:[%s662_s3 + $0x8] sm:$0xff] }
  0x86   :  { %v97_v55 = vadd.f32 %v96_v52, %v95_v48  ;;  %v87_v56 = vsel %vm85_vm2, %v82_v51, 0.0 }
  0x87   :  { %v137_v57 = vrot.slane %v136_v53, 4  ;;  %v88_v58 = vadd.f32 %v87_v56, %v86_v54 }
  0x88   :  { %v98_v59 = vrot.slane %v97_v55, 4  ;;  %v80_v60 = vpop.xlane.xlu1 %79 }
  0x89   :  { %v138_v61 = vadd.f32 %v137_v57, %v136_v53  ;;  %v89_v62 = vrot.slane %v88_v58, 4  ;;  %v133_v63 = vmul.f32 %v80_v60, %v31_v39  ;;  %v76_v3 = vpop.xlane.xlu0 %75 }
  0x8a   :  { %v99_v5 = vadd.f32 %v98_v59, %v97_v55  ;;  %v132_v6 = vmul.f32 %v76_v3, %v30_v35  ;;  %v35_v3 = vld [vmem:[%s663_s4] sm:$0xff] }
  0x8b   :  { %v139_v7 = vrot.slane %v138_v61, 2  ;;  %v90_v9 = vadd.f32 %v89_v62, %v88_v58  ;;  %v144_v10 = vsel %vm85_vm2, %v133_v63, 0.0 }
  0x8c   :  { %v100_v13 = vrot.slane %v99_v5, 2  ;;  %v143_v15 = vsel %vm85_vm2, %v132_v6, 0.0 }
  0x8d   :  { %v140_v16 = vadd.f32 %v139_v7, %v138_v61  ;;  %v91_v17 = vrot.slane %v90_v9, 2  ;;  %v145_v18 = vadd.f32 %v144_v10, %v143_v15  ;;  %v439_v15 = vmov 0  }
  0x8e   :  { %v101_v19 = vadd.f32 %v100_v13, %v99_v5  ;;  %415 = vset.pattern.permute.xlu1 %v439_v15  ;;  %416 = vset.pattern.permute.xlu2 %v439_v15 }
  0x8f   :  { %v146_v20 = vrot.slane %v145_v18, 4  ;;  %v141_v21 = vrot.slane %v140_v16, 1  ;;  %v92_v22 = vadd.f32 %v91_v17, %v90_v9  ;;  %417 = vset.pattern.permute.xlu0 %v439_v15  ;;  %v36_v17 = vld [vmem:[%s663_s4 + $0x8] sm:$0xff] }
  0x90   :  { %v102_v24 = vrot.slane %v101_v19, 1 }
  0x91   :  { %v147_v25 = vadd.f32 %v146_v20, %v145_v18  ;;  %v142_v26 = vadd.f32 %v141_v21, %v140_v16  ;;  %v93_v27 = vrot.slane %v92_v22, 1 }
  0x92   :  { %v103_v28 = vadd.f32 %v102_v24, %v101_v19 }
  0x93   :  { %v148_v29 = vrot.slane %v147_v25, 2  ;;  %v152_v30 = vadd.f32 %v142_v26, %v32_v23  ;;  %v94_v31 = vadd.f32 %v93_v27, %v92_v22 }
  0x94   :  { %v105_v32 = vadd.f32 %v103_v28, %v32_v23 }
  0x95   :  { %v149_v33 = vadd.f32 %v148_v29, %v147_v25  ;;  %v154_v34 = vmax.f32 %v152_v30, 0.0  ;;  %v104_v35 = vadd.f32 %v94_v31, %v32_v23 }
  0x96   :  { %v107_v37 = vmax.f32 %v105_v32, 0.0 }
  0x97   :  { %v156_v38 = vperm.slane %v154_v34, 0  ;;  %v106_v39 = vmax.f32 %v104_v35, 0.0  ;;  %v150_v40 = vrot.slane %v149_v33, 1 }
  0x98   :  { %v109_v41 = vperm.slane %v107_v37, 0 }
  0x99   :  { %v158_v42 = vmul.f32 %v156_v38, %v33_v36  ;;  %v108_v43 = vperm.slane %v106_v39, 0  ;;  %v151_v44 = vadd.f32 %v150_v40, %v149_v33  ;;  %v159_v54 = vmul.f32 %v156_v38, %v34_v49 }
  0x9a   :  { %v112_v45 = vmul.f32 %v109_v41, %v33_v36  ;;  %v113_v55 = vmul.f32 %v109_v41, %v34_v49 }
  0x9b   :  { %v162_v46 = vsel %vm85_vm2, %v158_v42, 0.0  ;;  %v110_v47 = vmul.f32 %v108_v43, %v33_v36  ;;  %v153_v50 = vadd.f32 %v151_v44, %v32_v23  ;;  %v111_v52 = vmul.f32 %v108_v43, %v34_v49 }
  0x9c   :  { %163 = vadd.xlane.f32.xlu0 %v162_v46  ;;  %v120_v48 = vsel %vm85_vm2, %v112_v45, 0.0  ;;  %v165_v58 = vsel %vm85_vm2, %v159_v54, 0.0  ;;  %v123_v59 = vsel %vm85_vm2, %v113_v55, 0.0 }
  0x9d   :  { %121 = vadd.xlane.f32.xlu1 %v120_v48  ;;  %v114_v51 = vsel %vm85_vm2, %v110_v47, 0.0  ;;  %v155_v53 = vmax.f32 %v153_v50, 0.0  ;;  %v117_v56 = vsel %vm85_vm2, %v111_v52, 0.0 }
  0x9e   :  { %115 = vadd.xlane.f32.xlu2 %v114_v51 }
  0x9f   :  { %v157_v57 = vperm.slane %v155_v53, 0 }
  0xa1   :  { %v161_v60 = vmul.f32 %v157_v57, %v34_v49  ;;  %v160_v61 = vmul.f32 %v157_v57, %v33_v36 }
  0xa3   :  { %v171_v62 = vsel %vm85_vm2, %v161_v60, 0.0  ;;  %v168_v63 = vsel %vm85_vm2, %v160_v61, 0.0 }
  0xa4   :  { %118 = vadd.xlane.f32.xlu0 %v117_v56 }
  0xa5   :  { %166 = vadd.xlane.f32.xlu1 %v165_v58 }
  0xa6   :  { %124 = vadd.xlane.f32.xlu2 %v123_v59 }
  0xac   :  { %172 = vadd.xlane.f32.xlu0 %v171_v62 }
  0xae   :  { %169 = vadd.xlane.f32.xlu2 %v168_v63 }
 0x10f   :  { %v164_v5 = vpop.xlane.xlu0 %163 }
 0x110   :  { %v174_v6 = vadd.f32 %v164_v5, %v35_v3  ;;  %v122_v7 = vpop.xlane.xlu1 %121 }
 0x111   :  { %v116_v9 = vpop.xlane.xlu2 %115  ;;  %v128_v33 = vadd.f32 %v122_v7, %v35_v3 }
 0x112   :  { %v126_v10 = vadd.f32 %v116_v9, %v35_v3 }
 0x114   :  { %v178_v13 = vadd.f32 %v174_v6, %v126_v10 }
 0x116   :  { %v182_v16 = vsub.f32 0.0, %v178_v13 }
 0x117   :  { %v119_v18 = vpop.xlane.xlu0 %118 }
 0x118   :  { %v186_v19 = vmul.f32 1.442695, %v182_v16  ;;  %v167_v20 = vpop.xlane.xlu1 %166  ;;  %v127_v21 = vadd.f32 %v119_v18, %v36_v17 }
 0x119   :  { %v175_v22 = vadd.f32 %v167_v20, %v36_v17  ;;  %v125_v23 = vpop.xlane.xlu2 %124 }
 0x11a   :  { %420 = vpow2.f32 %v186_v19  ;;  %v129_v29 = vadd.f32 %v125_v23, %v36_v17 }
 0x11b   :  { %v179_v24 = vadd.f32 %v175_v22, %v127_v21 }
 0x11d   :  { %v183_v25 = vsub.f32 0.0, %v179_v24 }
 0x11f   :  { %v188_v26 = vmul.f32 1.442695, %v183_v25  ;;  %v173_v27 = vpop.xlane.xlu0 %172 }
 0x120   :  { %v421_v28 = vpop.eup %420  ;;  %v177_v30 = vadd.f32 %v173_v27, %v36_v17 }
 0x121   :  { %v194_v31 = vadd.f32 1.0, %v421_v28  ;;  %422 = vpow2.f32 %v188_v26  ;;  %v170_v32 = vpop.xlane.xlu2 %169 }
 0x122   :  { %v181_v34 = vadd.f32 %v177_v30, %v129_v29  ;;  %v176_v35 = vadd.f32 %v170_v32, %v35_v3 }
 0x123   :  { %424 = vrcp.f32 %v194_v31  ;;  %v209_v46 = vand.u32 2147483648, %v194_v31  ;;  %v207_v49 = vand.u32 2147483647, %v194_v31  ;;  %vm203_vm4 = vweird.f32 %v194_v31 }
 0x124   :  { %v185_v36 = vsub.f32 0.0, %v181_v34  ;;  %v180_v37 = vadd.f32 %v176_v35, %v128_v33  ;;  %v440_v34 = vmov 16.0  }
 0x125   :  { %v210_v54 = vor.u32 1.1754944e-38, %v209_v46  ;;  %vm208_vm6 = vcmp.eq.f32.partialorder %v207_v49, 8.507059e+37 }
 0x126   :  { %v192_v38 = vmul.f32 1.442695, %v185_v36  ;;  %v184_v39 = vsub.f32 0.0, %v180_v37 }
 0x127   :  { %v423_v40 = vpop.eup %422 }
 0x128   :  { %v195_v41 = vadd.f32 1.0, %v423_v40  ;;  %426 = vpow2.f32 %v192_v38  ;;  %v190_v42 = vmul.f32 1.442695, %v184_v39 }
 0x129   :  { %v425_v43 = vpop.eup %424 }
 0x12a   :  { %428 = vrcp.f32 %v195_v41  ;;  %v199_v44 = vmul.f32 %v425_v43, %v194_v31  ;;  %vm204_vm3 = vweird.f32 %v425_v43  ;;  %v224_v60 = vand.u32 2147483648, %v195_v41 }
 0x12b   :  { %430 = vpow2.f32 %v190_v42  ;;  %vm205_vm5 = vmor %vm203_vm4, %vm204_vm3  ;;  %v222_v62 = vand.u32 2147483647, %v195_v41  ;;  %vm218_vm8 = vweird.f32 %v195_v41 }
 0x12c   :  { %v200_v45 = vsub.f32 1.0, %v199_v44  ;;  %v225_v5 = vor.u32 1.1754944e-38, %v224_v60 }
 0x12d   :  { %vm223_vm10 = vcmp.eq.f32.partialorder %v222_v62, 8.507059e+37 }
 0x12e   :  { %v427_v47 = vpop.eup %426  ;;  %v201_v48 = vmul.f32 %v425_v43, %v200_v45 }
 0x12f   :  { %v197_v50 = vadd.f32 1.0, %v427_v47 }
 0x130   :  { %v429_v51 = vpop.eup %428  ;;  %v202_v52 = vadd.f32 %v425_v43, %v201_v48 }
 0x131   :  { %v431_v53 = vpop.eup %430  ;;  %432 = vrcp.f32 %v197_v50  ;;  %v214_v55 = vmul.f32 %v429_v51, %v195_v41  ;;  %vm219_vm7 = vweird.f32 %v429_v51  ;;  %v254_v17 = vand.u32 2147483648, %v197_v50 }
 0x132   :  { %v196_v56 = vadd.f32 1.0, %v431_v53  ;;  %v206_v57 = vsel %vm205_vm5, %v425_v43, %v202_v52  ;;  %vm220_vm9 = vmor %vm218_vm8, %vm219_vm7  ;;  %v252_v19 = vand.u32 2147483647, %v197_v50  ;;  %vm248_vm12 = vweird.f32 %v197_v50 }
 0x133   :  { %v211_v58 = vsel %vm208_vm6, %v210_v54, %v206_v57  ;;  %v215_v59 = vsub.f32 1.0, %v214_v55  ;;  %v255_v25 = vor.u32 1.1754944e-38, %v254_v17  ;;  %vm343_vm5 = vcmask 1040384  }
 0x134   :  { %434 = vrcp.f32 %v196_v56  ;;  %260 = vperm.xlu1 %415, %v211_v58   ;;  %v239_v20 = vand.u32 2147483648, %v196_v56  ;;  %v237_v23 = vand.u32 2147483647, %v196_v56  ;;  %vm233_vm15 = vweird.f32 %v196_v56 }
 0x135   :  { %v216_v61 = vmul.f32 %v429_v51, %v215_v59  ;;  %vm253_vm1 = vcmp.eq.f32.partialorder %v252_v19, 8.507059e+37  ;;  %436 = vrcp.f32 %v440_v34 }
 0x136   :  { %v240_v27 = vor.u32 1.1754944e-38, %v239_v20  ;;  %vm238_vm3 = vcmp.eq.f32.partialorder %v237_v23, 8.507059e+37 }
 0x137   :  { %v433_v63 = vpop.eup %432  ;;  %v217_v3 = vadd.f32 %v429_v51, %v216_v61 }
 0x138   :  { %v244_v6 = vmul.f32 %v433_v63, %v197_v50  ;;  %vm249_vm11 = vweird.f32 %v433_v63 }
 0x139   :  { %v221_v7 = vsel %vm220_vm9, %v429_v51, %v217_v3  ;;  %vm250_vm14 = vmor %vm248_vm12, %vm249_vm11  ;;  %v348_v3 = vlaneseq }
 0x13a   :  { %v435_v9 = vpop.eup %434  ;;  %v226_v10 = vsel %vm223_vm10, %v225_v5, %v221_v7  ;;  %v245_v13 = vsub.f32 1.0, %v244_v6 }
 0x13b   :  { %265 = vperm.xlu2 %416, %v226_v10   ;;  %v229_v15 = vmul.f32 %v435_v9, %v196_v56  ;;  %vm234_vm13 = vweird.f32 %v435_v9  ;;  %vm614_vm6 = vcmp.lt.s32.totalorder %v348_v3, 196 }
 0x13c   :  { %v246_v16 = vmul.f32 %v433_v63, %v245_v13  ;;  %vm235_vm2 = vmor %vm233_vm15, %vm234_vm13 }
 0x13d   :  { %v230_v18 = vsub.f32 1.0, %v229_v15 }
 0x13e   :  { %v247_v21 = vadd.f32 %v433_v63, %v246_v16 }
 0x13f   :  { %v231_v22 = vmul.f32 %v435_v9, %v230_v18 }
 0x140   :  { %v251_v24 = vsel %vm250_vm14, %v433_v63, %v247_v21 }
 0x141   :  { %v232_v26 = vadd.f32 %v435_v9, %v231_v22  ;;  %v256_v28 = vsel %vm253_vm1, %v255_v25, %v251_v24 }
 0x143   :  { %v236_v29 = vsel %vm235_vm2, %v435_v9, %v232_v26  ;;  %275 = vperm.xlu2 %416, %v256_v28  }
 0x144   :  { %v241_v30 = vsel %vm238_vm3, %v240_v27, %v236_v29 }
 0x145   :  { %270 = vperm.xlu0 %417, %v241_v30  }
 0x195   :  { %v266_v31 = vpop.permute.xlu2 %265 }
 0x196   :  { %v280_v32 = vmul.f32 %v266_v31, %v525_v14  ;;  %v281_v33 = vmul.f32 %v266_v31, %v513_v11  ;;  %v437_v11 = vpop.eup %436 }
 0x197   :  { %v327_v14 = vmul.f32 16.0, %v437_v11  ;;  %vm331_vm4 = vweird.f32 %v437_v11 }
 0x198   :  { %288 = vst [vmem:[%s664_s5 + $0x10] sm:$0xff] %v280_v32  ;;  %v363_v40 = vsel %vm37_vm0, %v281_v33, -inf }
 0x199   :  { %289 = vst.msk [vmem:[%s664_s5 + $0x18] sm:$0xff] %vm37_vm0, %v281_v33  ;;  %v328_v41 = vsub.f32 1.0, %v327_v14 }
 0x19b   :  { %v329_v50 = vmul.f32 %v437_v11, %v328_v41 }
 0x19d   :  { %v276_v35 = vpop.permute.xlu2 %275  ;;  %v330_v59 = vadd.f32 %v437_v11, %v329_v50 }
 0x19e   :  { %v587_v36 = vmul.f32 %v276_v35, %v518_v12  ;;  %v590_v37 = vmul.f32 %v276_v35, %v506_v8  ;;  %v302_v8 = vsel %vm37_vm0, %v281_v33, 0.0 }
 0x19f   :  { %v332_v10 = vsel %vm331_vm4, %v437_v11, %v330_v59 }
 0x1a0   :  { %292 = vst [vmem:[%s664_s5 + $0x30] sm:$0xff] %v587_v36  ;;  %v318_v24 = vsel %vm37_vm0, %v590_v37, 0.0 }
 0x1a1   :  { %293 = vst.msk [vmem:[%s664_s5 + $0x38] sm:$0xff] %vm37_vm0, %v590_v37 }
 0x1a6   :  { %v261_v38 = vpop.permute.xlu1 %260 }
 0x1a7   :  { %v278_v12 = vmul.f32 %v261_v38, %v489_v2  ;;  %v279_v39 = vmul.f32 %v261_v38, %v496_v4 }
 0x1a9   :  { %286 = vst [vmem:[%s664_s5] sm:$0xff] %v278_v12  ;;  %v294_v42 = vadd.f32 %v280_v32, %v278_v12  ;;  %v301_v43 = vsel %vm37_vm0, %v279_v39, 0.0  ;;  %v355_v44 = vmax.f32 %v278_v12, %v280_v32  ;;  %v362_v45 = vsel %vm37_vm0, %v279_v39, -inf }
 0x1aa   :  { %287 = vst.msk [vmem:[%s664_s5 + $0x8] sm:$0xff] %vm37_vm0, %v279_v39  ;;  %v303_v2 = vadd.f32 %v302_v8, %v301_v43  ;;  %v364_v4 = vmax.f32 %v362_v45, %v363_v40 }
 0x1ab   :  { %v295_v46 = vrot.slane %v294_v42, 4  ;;  %v356_v47 = vrot.slane %v355_v44, 4 }
 0x1ac   :  { %v304_v48 = vrot.slane %v303_v2, 4  ;;  %v365_v49 = vrot.slane %v364_v4, 4 }
 0x1ad   :  { %v296_v51 = vadd.f32 %v295_v46, %v294_v42  ;;  %v357_v52 = vmax.f32 %v355_v44, %v356_v47 }
 0x1ae   :  { %v305_v53 = vadd.f32 %v304_v48, %v303_v2  ;;  %v366_v54 = vmax.f32 %v364_v4, %v365_v49 }
 0x1af   :  { %v297_v55 = vrot.slane %v296_v51, 2  ;;  %v358_v56 = vrot.slane %v357_v52, 2 }
 0x1b0   :  { %v306_v57 = vrot.slane %v305_v53, 2  ;;  %v367_v58 = vrot.slane %v366_v54, 2 }
 0x1b1   :  { %v298_v60 = vadd.f32 %v297_v55, %v296_v51  ;;  %v359_v61 = vmax.f32 %v357_v52, %v358_v56 }
 0x1b2   :  { %v307_v62 = vadd.f32 %v306_v57, %v305_v53  ;;  %v368_v63 = vmax.f32 %v366_v54, %v367_v58 }
 0x1b3   :  { %v299_v5 = vrot.slane %v298_v60, 1  ;;  %v360_v6 = vrot.slane %v359_v61, 1 }
 0x1b4   :  { %v308_v7 = vrot.slane %v307_v62, 1  ;;  %v369_v9 = vrot.slane %v368_v63, 1 }
 0x1b5   :  { %v300_v13 = vadd.f32 %v299_v5, %v298_v60  ;;  %v361_v18 = vmax.f32 %v359_v61, %v360_v6 }
 0x1b6   :  { %v309_v15 = vadd.f32 %v308_v7, %v307_v62  ;;  %v370_v16 = vmax.f32 %v368_v63, %v369_v9 }
 0x1b7   :  { %v271_v19 = vpop.permute.xlu0 %270  ;;  %v333_v25 = vmul.f32 %v332_v10, %v300_v13 }
 0x1b8   :  { %v334_v20 = vmul.f32 %v332_v10, %v309_v15  ;;  %v391_v21 = vrot.slane %v370_v16, 7  ;;  %v282_v22 = vmul.f32 %v271_v19, %v479_v0  ;;  %v283_v23 = vmul.f32 %v271_v19, %v484_v1 }
 0x1b9   :  { %v379_v0 = vsel %vm37_vm0, %v590_v37, -inf }
 0x1ba   :  { %v341_v26 = vrot.slane %v334_v20, 7  ;;  %v393_v27 = vsel %vm343_vm5, %v361_v18, %v391_v21  ;;  %290 = vst [vmem:[%s664_s5 + $0x20] sm:$0xff] %v282_v22  ;;  %v310_v28 = vadd.f32 %v587_v36, %v282_v22  ;;  %v317_v29 = vsel %vm37_vm0, %v283_v23, 0.0 }
 0x1bb   :  { %410 = vst.msk [vmem:[%s665_s6 + $0x1] ss:$2 sm:$0x3] %vm614_vm6, %v393_v27  ;;  %v319_v1 = vadd.f32 %v318_v24, %v317_v29  ;;  %v371_v30 = vmax.f32 %v282_v22, %v587_v36  ;;  %v378_v31 = vsel %vm37_vm0, %v283_v23, -inf }
 0x1bc   :  { %v344_v32 = vsel %vm343_vm5, %v333_v25, %v341_v26  ;;  %291 = vst.msk [vmem:[%s664_s5 + $0x28] sm:$0xff] %vm37_vm0, %v283_v23  ;;  %v311_v33 = vrot.slane %v310_v28, 4  ;;  %v380_v34 = vmax.f32 %v378_v31, %v379_v0 }
 0x1bd   :  { %352 = vst.msk [vmem:[%s665_s6] ss:$2 sm:$0x3] %vm614_vm6, %v344_v32  ;;  %v320_v35 = vrot.slane %v319_v1, 4  ;;  %v372_v37 = vrot.slane %v371_v30, 4 }
 0x1be   :  { %v312_v36 = vadd.f32 %v311_v33, %v310_v28  ;;  %v381_v11 = vrot.slane %v380_v34, 4 }
 0x1bf   :  { %v321_v14 = vadd.f32 %v320_v35, %v319_v1  ;;  %v373_v38 = vmax.f32 %v371_v30, %v372_v37 }
 0x1c0   :  { %v313_v12 = vrot.slane %v312_v36, 2  ;;  %v382_v39 = vmax.f32 %v380_v34, %v381_v11 }
 0x1c1   :  { %v322_v8 = vrot.slane %v321_v14, 2  ;;  %v374_v40 = vrot.slane %v373_v38, 2 }
 0x1c2   :  { %v314_v41 = vadd.f32 %v313_v12, %v312_v36  ;;  %v383_v42 = vrot.slane %v382_v39, 2 }
 0x1c3   :  { %v323_v43 = vadd.f32 %v322_v8, %v321_v14  ;;  %v375_v44 = vmax.f32 %v373_v38, %v374_v40 }
 0x1c4   :  { %v315_v45 = vrot.slane %v314_v41, 1  ;;  %v384_v2 = vmax.f32 %v382_v39, %v383_v42 }
 0x1c5   :  { %v324_v4 = vrot.slane %v323_v43, 1  ;;  %v376_v46 = vrot.slane %v375_v44, 1 }
 0x1c6   :  { %v385_v47 = vrot.slane %v384_v2, 1  ;;  %v316_v48 = vadd.f32 %v315_v45, %v314_v41 }
 0x1c7   :  { %v325_v49 = vadd.f32 %v324_v4, %v323_v43  ;;  %v377_v52 = vmax.f32 %v375_v44, %v376_v46 }
 0x1c8   :  { %v386_v50 = vmax.f32 %v384_v2, %v385_v47  ;;  %v335_v54 = vmul.f32 %v332_v10, %v316_v48 }
 0x1c9   :  { %v336_v51 = vmul.f32 %v332_v10, %v325_v49 }
 0x1ca   :  { %v392_v53 = vrot.slane %v386_v50, 7 }
 0x1cb   :  { %v342_v55 = vrot.slane %v336_v51, 7 }
 0x1cc   :  { %v394_v56 = vsel %vm343_vm5, %v377_v52, %v392_v53 }
 0x1cd   :  { %v345_v57 = vsel %vm343_vm5, %v335_v54, %v342_v55  ;;  %411 = vst.msk [vmem:[%s665_s6 + $0x5] ss:$2 sm:$0x3] %vm614_vm6, %v394_v56 }
 0x1ce   :  { %409 = vst.msk [vmem:[%s665_s6 + $0x4] ss:$2 sm:$0x3] %vm614_vm6, %v345_v57 }

// kernel: cbam_cnn_forward.14
= control target key start
LH: loop header
LB: loop body
LE: loop exit
PB: predicated region body
PF: predicated region fallthrough
CT: control target
= control target key end

     0   :  { %s856_s12 = smov 0   ;;  %s858_s13 = smov 0   ;;  %s941_s0 = inlined_call_operand.vmem [shape: bf16[512,128], index: 0, kind: input, shape index: {}]   ;;  %s942_s1 = inlined_call_operand.vmem [shape: bf16[128,128], index: 1, kind: input, shape index: {}]   ;;  %s943_s2 = inlined_call_operand.vmem [shape: f32[1,128], index: 2, kind: input, shape index: {}]   ;;  %s944_s3 = inlined_call_operand.vmem [shape: f32[512,128], index: 3, kind: output, shape index: {}]  }
   0x1   :  { %s860_s14 = smov 0  }
   0x2 LB: > { %s32_s15 = sadd.s32 1, %s830_s13  ;;  %p676_p0 = scmp.ge.s32.totalorder %s834_s14, 1  ;;  %s834_s14 = sphi %s860_s14, %s13_s14   ;;  %s830_s13 = sphi %s858_s13, %s946_s13   ;;  %s826_s12 = sphi %s856_s12, %s945_s12  }
   0x3   : > { %p34_p1 = scmp.ge.s32.totalorder %s32_s15, 4  ;;  %p188_p2 = scmp.lt.s32.totalorder %s834_s14, 5 }
   0x5   : > { %s948_s15 = smov (%p34_p1, %s32_s15), 0  ;;  %p189_p3 = pnand %p676_p0, %p188_p2 }
   0x6   : > { %s677_s24 = sshll.u32 (!%p189_p3), %s826_s12, 4 }
   0x7   : > { %192 = sbr.rel (%p189_p3) target bundleno = 205 (0xcd), region = 32  ;;  %p230_p4 = scmp.lt.s32.totalorder (!%p189_p3), %s677_s24, 63 }
   0xc   : > { %v762_v0 = vld [vmem:[%s942_s1 + $0x38] sm:$0xff]  ;;  %v761_v1 = vld [vmem:[%s942_s1 + $0x30] sm:$0xff]  ;;  %v760_v2 = vld [vmem:[%s942_s1 + $0x28] sm:$0xff]  ;;  %s950_s24 = smov (!%p230_p4, %s677_s24), 63 }
   0xd   : > { %423 = vmatpush.bf16.msra.mxu0 %v762_v0  ;;  %763 = vmatpush.bf16.msra.mxu1 %v762_v0  ;;  %v759_v3 = vld [vmem:[%s942_s1 + $0x20] sm:$0xff]  ;;  %v758_v4 = vld [vmem:[%s942_s1 + $0x18] sm:$0xff]  ;;  %v757_v5 = vld [vmem:[%s942_s1 + $0x10] sm:$0xff]  ;;  %s678_s4 = sshll.u32 %s950_s24, 2  ;;  %s680_s10 = sshll.u32 %s950_s24, 3 }
   0xe   : > { %764 = vmatpush.bf16.msra.mxu2 %v762_v0  ;;  %765 = vmatpush.bf16.msra.mxu3 %v762_v0  ;;  %v756_v6 = vld [vmem:[%s942_s1 + $0x8] sm:$0xff]  ;;  %v755_v7 = vld [vmem:[%s942_s1] sm:$0xff]  ;;  %s236_s9 = scalar_lea.vmem %s941_s0, %s678_s4  ;;  %s914_s18 = scalar_lea.vmem %s944_s3, %s680_s10 }
   0xf   : > { %v747_v8 = vld [vmem:[%s236_s9] sm:$0xff]  ;;  %v749_v9 = vld [vmem:[%s236_s9 + $0x10] sm:$0xff]  ;;  %v748_v12 = vld [vmem:[%s236_s9 + $0x8] sm:$0xff] }
  0x10   : > { %v751_v10 = vld [vmem:[%s236_s9 + $0x20] sm:$0xff]  ;;  %v753_v11 = vld [vmem:[%s236_s9 + $0x30] sm:$0xff]  ;;  %v750_v13 = vld [vmem:[%s236_s9 + $0x18] sm:$0xff] }
  0x11   : > { %424 = vmatpush.bf16.msra.mxu0 %v761_v1  ;;  %766 = vmatpush.bf16.msra.mxu1 %v761_v1  ;;  %v752_v14 = vld [vmem:[%s236_s9 + $0x28] sm:$0xff]  ;;  %v754_v15 = vld [vmem:[%s236_s9 + $0x38] sm:$0xff]  ;;  %v811_v16 = vld [vmem:[%s943_s2] ss:$0 sm:$0xff] }
  0x12   : > { %767 = vmatpush.bf16.msra.mxu2 %v761_v1  ;;  %768 = vmatpush.bf16.msra.mxu3 %v761_v1 }
  0x15   : > { %425 = vmatpush.bf16.msra.mxu0 %v760_v2  ;;  %769 = vmatpush.bf16.msra.mxu1 %v760_v2 }
  0x16   : > { %770 = vmatpush.bf16.msra.mxu2 %v760_v2  ;;  %771 = vmatpush.bf16.msra.mxu3 %v760_v2 }
  0x19   : > { %426 = vmatpush.bf16.msra.mxu0 %v759_v3  ;;  %772 = vmatpush.bf16.msra.mxu1 %v759_v3 }
  0x1a   : > { %773 = vmatpush.bf16.msra.mxu2 %v759_v3  ;;  %774 = vmatpush.bf16.msra.mxu3 %v759_v3 }
  0x1d   : > { %427 = vmatpush.bf16.msra.mxu0 %v758_v4  ;;  %775 = vmatpush.bf16.msra.mxu1 %v758_v4 }
  0x1e   : > { %776 = vmatpush.bf16.msra.mxu2 %v758_v4  ;;  %777 = vmatpush.bf16.msra.mxu3 %v758_v4 }
  0x21   : > { %428 = vmatpush.bf16.msra.mxu0 %v757_v5  ;;  %778 = vmatpush.bf16.msra.mxu1 %v757_v5 }
  0x22   : > { %779 = vmatpush.bf16.msra.mxu2 %v757_v5  ;;  %780 = vmatpush.bf16.msra.mxu3 %v757_v5 }
  0x25   : > { %429 = vmatpush.bf16.msra.mxu0 %v756_v6  ;;  %781 = vmatpush.bf16.msra.mxu1 %v756_v6 }
  0x26   : > { %782 = vmatpush.bf16.msra.mxu2 %v756_v6  ;;  %783 = vmatpush.bf16.msra.mxu3 %v756_v6 }
  0x29   : > { %430 = vmatpush.bf16.msra.mxu0 %v755_v7  ;;  %784 = vmatpush.bf16.msra.mxu1 %v755_v7 }
  0x2a   : > { %785 = vmatpush.bf16.msra.mxu2 %v755_v7  ;;  %786 = vmatpush.bf16.msra.mxu3 %v755_v7 }
  0x2c   : > { %431 = vmatmul.bf16.vlgmr.msra.gmra.mxu0 %v747_v8  ;;  %441 = vmatmul.bf16.vlgmr.msra.gmra.mxu1 %v749_v9 }
  0x2d   : > { %451 = vmatmul.bf16.vlgmr.msra.gmra.mxu2 %v751_v10  ;;  %461 = vmatmul.bf16.vlgmr.msra.gmra.mxu3 %v753_v11 }
  0x3c   : > { %436 = vmatmul.bf16.gmra.mxu0 %v748_v12  ;;  %446 = vmatmul.bf16.gmra.mxu1 %v750_v13 }
  0x3d   : > { %456 = vmatmul.bf16.gmra.mxu2 %v752_v14  ;;  %466 = vmatmul.bf16.gmra.mxu3 %v754_v15 }
  0xa9   : > { %v432_v17 = vpop.f32.mrf.mxu0  ;;  %v442_v18 = vpop.f32.mrf.mxu1 }
  0xaa   : > { %v527_v19 = vadd.f32 %v811_v16, %v432_v17  ;;  %v531_v20 = vadd.f32 %v811_v16, %v442_v18 }
  0xac   : > { %543 = vst [vmem:[%s914_s18] sm:$0xff] %v527_v19 }
  0xad   : > { %547 = vst [vmem:[%s914_s18 + $0x20] sm:$0xff] %v531_v20 }
  0xb0   : > { %v452_v21 = vpop.f32.mrf.mxu2  ;;  %v462_v22 = vpop.f32.mrf.mxu3 }
  0xb1   : > { %v535_v23 = vadd.f32 %v811_v16, %v452_v21  ;;  %v539_v24 = vadd.f32 %v811_v16, %v462_v22  ;;  %v434_v25 = vpop.f32.mrf.mxu0  ;;  %v444_v26 = vpop.f32.mrf.mxu1 }
  0xb2   : > { %v528_v27 = vadd.f32 %v811_v16, %v434_v25  ;;  %v532_v28 = vadd.f32 %v811_v16, %v444_v26 }
  0xb3   : > { %551 = vst [vmem:[%s914_s18 + $0x40] sm:$0xff] %v535_v23 }
  0xb4   : > { %555 = vst [vmem:[%s914_s18 + $0x60] sm:$0xff] %v539_v24 }
  0xb5   : > { %544 = vst [vmem:[%s914_s18 + $0x8] sm:$0xff] %v528_v27 }
  0xb6   : > { %548 = vst [vmem:[%s914_s18 + $0x28] sm:$0xff] %v532_v28 }
  0xb8   : > { %v454_v29 = vpop.f32.mrf.mxu2  ;;  %v464_v30 = vpop.f32.mrf.mxu3 }
  0xb9   : > { %v536_v31 = vadd.f32 %v811_v16, %v454_v29  ;;  %v540_v32 = vadd.f32 %v811_v16, %v464_v30  ;;  %v437_v33 = vpop.f32.mrf.mxu0  ;;  %v447_v34 = vpop.f32.mrf.mxu1 }
  0xba   : > { %v529_v35 = vadd.f32 %v811_v16, %v437_v33  ;;  %v533_v36 = vadd.f32 %v811_v16, %v447_v34 }
  0xbb   : > { %552 = vst [vmem:[%s914_s18 + $0x48] sm:$0xff] %v536_v31 }
  0xbc   : > { %556 = vst [vmem:[%s914_s18 + $0x68] sm:$0xff] %v540_v32 }
  0xbd   : > { %545 = vst [vmem:[%s914_s18 + $0x10] sm:$0xff] %v529_v35 }
  0xbe   : > { %549 = vst [vmem:[%s914_s18 + $0x30] sm:$0xff] %v533_v36 }
  0xc0   : > { %v457_v37 = vpop.f32.mrf.mxu2  ;;  %v467_v38 = vpop.f32.mrf.mxu3 }
  0xc1   : > { %v537_v39 = vadd.f32 %v811_v16, %v457_v37  ;;  %v541_v40 = vadd.f32 %v811_v16, %v467_v38  ;;  %v439_v41 = vpop.f32.mrf.mxu0  ;;  %v449_v42 = vpop.f32.mrf.mxu1 }
  0xc2   : > { %v530_v43 = vadd.f32 %v811_v16, %v439_v41  ;;  %v534_v44 = vadd.f32 %v811_v16, %v449_v42 }
  0xc3   : > { %553 = vst [vmem:[%s914_s18 + $0x50] sm:$0xff] %v537_v39 }
  0xc4   : > { %557 = vst [vmem:[%s914_s18 + $0x70] sm:$0xff] %v541_v40 }
  0xc5   : > { %546 = vst [vmem:[%s914_s18 + $0x18] sm:$0xff] %v530_v43 }
  0xc6   : > { %550 = vst [vmem:[%s914_s18 + $0x38] sm:$0xff] %v534_v44 }
  0xc8   : > { %v459_v45 = vpop.f32.mrf.mxu2  ;;  %v469_v46 = vpop.f32.mrf.mxu3 }
  0xc9   : > { %v538_v47 = vadd.f32 %v811_v16, %v459_v45  ;;  %v542_v48 = vadd.f32 %v811_v16, %v469_v46 }
  0xcb   : > { %554 = vst [vmem:[%s914_s18 + $0x58] sm:$0xff] %v538_v47 }
  0xcc   : > { %558 = vst [vmem:[%s914_s18 + $0x78] sm:$0xff] %v542_v48 }
  0xcd PF: > { %s13_s14 = sadd.s32 1, %s834_s14   ;;  %s945_s12 = smov %s830_s13 }
  0xce   : > { %p10_p5 = scmp.ge.s32.totalorder %s13_s14, 6   ;;  %s946_s13 = smov %s948_s15 }
  0xd0   :  { %12 = sbr.rel (!%p10_p5) target bundleno = 2 (0x2), region = 76 }

// kernel: cbam_cnn_forward.15
= control target key start
LH: loop header
LB: loop body
LE: loop exit
PB: predicated region body
PF: predicated region fallthrough
CT: control target
= control target key end

     0   :  { %vm105_vm8 = vcmask 556032   ;;  %s233_s2 = inlined_call_operand.vmem [shape: f32[2,1,196], index: 2, kind: input, shape index: {}]   ;;  %s234_s1 = inlined_call_operand.vmem [shape: f32[2,16,196], index: 1, kind: input, shape index: {}]   ;;  %s235_s0 = inlined_call_operand.vmem [shape: f32[2,16,196], index: 0, kind: input, shape index: {}]   ;;  %s236_s3 = inlined_call_operand.vmem [shape: f32[2,16,196], index: 3, kind: output, shape index: {}]  }
   0x1   :  { %v14_v0 = vld [vmem:[%s233_s2] sm:$0x3]  ;;  %v15_v2 = vld [vmem:[%s233_s2 + $0x2] sm:$0x3]  ;;  %v63_v29 = vld [vmem:[%s234_s1 + $0x8] sm:$0xff] }
   0x2   :  { %v16_v1 = vsub.f32 0.0, %v14_v0  ;;  %v17_v3 = vsub.f32 0.0, %v15_v2  ;;  %v62_v28 = vld [vmem:[%s234_s1] sm:$0xff]  ;;  %v64_v32 = vld [vmem:[%s234_s1 + $0x10] sm:$0xff]  ;;  %v65_v33 = vld [vmem:[%s234_s1 + $0x18] sm:$0xff] }
   0x3   :  { %v54_v31 = vld [vmem:[%s235_s0] sm:$0xff]  ;;  %v67_v39 = vld [vmem:[%s234_s1 + $0x28] sm:$0xff]  ;;  %v68_v40 = vld [vmem:[%s234_s1 + $0x30] sm:$0xff] }
   0x4   :  { %v18_v4 = vmul.f32 1.442695, %v16_v1  ;;  %v20_v5 = vmul.f32 1.442695, %v17_v3  ;;  %v66_v35 = vld [vmem:[%s234_s1 + $0x20] sm:$0xff]  ;;  %v69_v41 = vld [vmem:[%s234_s1 + $0x38] sm:$0xff] }
   0x5   :  { %v55_v42 = vld [vmem:[%s235_s0 + $0x8] sm:$0xff]  ;;  %v56_v43 = vld [vmem:[%s235_s0 + $0x10] sm:$0xff]  ;;  %v57_v44 = vld [vmem:[%s235_s0 + $0x18] sm:$0xff] }
   0x6   :  { %117 = vpow2.f32 %v18_v4  ;;  %v58_v51 = vld [vmem:[%s235_s0 + $0x20] sm:$0xff]  ;;  %v59_v52 = vld [vmem:[%s235_s0 + $0x28] sm:$0xff]  ;;  %v60_v55 = vld [vmem:[%s235_s0 + $0x30] sm:$0xff] }
   0x7   :  { %119 = vpow2.f32 %v20_v5  ;;  %v61_v62 = vld [vmem:[%s235_s0 + $0x38] sm:$0xff] }
   0xc   :  { %v118_v6 = vpop.eup %117 }
   0xd   :  { %v120_v7 = vpop.eup %119  ;;  %v22_v8 = vadd.f32 1.0, %v118_v6 }
   0xe   :  { %v23_v9 = vadd.f32 1.0, %v120_v7 }
   0xf   :  { %121 = vrcp.f32 %v22_v8  ;;  %vm29_vm0 = vweird.f32 %v22_v8  ;;  %v35_v13 = vand.u32 2147483648, %v22_v8  ;;  %v33_v16 = vand.u32 2147483647, %v22_v8 }
  0x10   :  { %123 = vrcp.f32 %v23_v9  ;;  %v50_v17 = vand.u32 2147483648, %v23_v9  ;;  %vm44_vm2 = vweird.f32 %v23_v9  ;;  %v48_v19 = vand.u32 2147483647, %v23_v9 }
  0x11   :  { %v36_v21 = vor.u32 1.1754944e-38, %v35_v13  ;;  %vm34_vm5 = vcmp.eq.f32.partialorder %v33_v16, 8.507059e+37 }
  0x12   :  { %v51_v25 = vor.u32 1.1754944e-38, %v50_v17  ;;  %vm49_vm7 = vcmp.eq.f32.partialorder %v48_v19, 8.507059e+37 }
  0x15   :  { %v122_v10 = vpop.eup %121 }
  0x16   :  { %v124_v11 = vpop.eup %123  ;;  %v25_v12 = vmul.f32 %v122_v10, %v22_v8  ;;  %vm30_vm1 = vweird.f32 %v122_v10 }
  0x17   :  { %v40_v14 = vmul.f32 %v124_v11, %v23_v9  ;;  %vm45_vm3 = vweird.f32 %v124_v11  ;;  %vm31_vm4 = vmor %vm29_vm0, %vm30_vm1 }
  0x18   :  { %v26_v15 = vsub.f32 1.0, %v25_v12  ;;  %vm151_vm6 = vmor %vm44_vm2, %vm45_vm3 }
  0x19   :  { %v41_v18 = vsub.f32 1.0, %v40_v14 }
  0x1a   :  { %v27_v20 = vmul.f32 %v122_v10, %v26_v15 }
  0x1b   :  { %v42_v22 = vmul.f32 %v124_v11, %v41_v18 }
  0x1c   :  { %v28_v23 = vadd.f32 %v122_v10, %v27_v20 }
  0x1d   :  { %v43_v26 = vadd.f32 %v124_v11, %v42_v22 }
  0x1e   :  { %v32_v27 = vsel %vm31_vm4, %v122_v10, %v28_v23 }
  0x1f   :  { %v37_v30 = vsel %vm34_vm5, %v36_v21, %v32_v27  ;;  %v47_v34 = vsel %vm151_vm6, %v124_v11, %v43_v26 }
  0x20   :  { %v72_v36 = vperm.slane %v37_v30, 0  ;;  %v73_v37 = vperm.slane %v37_v30, 1  ;;  %v52_v38 = vsel %vm49_vm7, %v51_v25, %v47_v34 }
  0x21   :  { %v74_v45 = vperm.slane %v52_v38, 0  ;;  %v75_v46 = vperm.slane %v52_v38, 1 }
  0x22   :  { %v80_v47 = vmul.f32 %v72_v36, %v62_v28  ;;  %v81_v48 = vmul.f32 %v73_v37, %v63_v29  ;;  %v82_v49 = vmul.f32 %v72_v36, %v64_v32  ;;  %v83_v50 = vmul.f32 %v73_v37, %v65_v33 }
  0x23   :  { %v84_v53 = vmul.f32 %v74_v45, %v66_v35  ;;  %v85_v54 = vmul.f32 %v75_v46, %v67_v39  ;;  %v86_v56 = vmul.f32 %v74_v45, %v68_v40  ;;  %v87_v57 = vmul.f32 %v75_v46, %v69_v41 }
  0x24   :  { %v88_v58 = vadd.f32 %v80_v47, %v54_v31  ;;  %v89_v59 = vadd.f32 %v81_v48, %v55_v42  ;;  %v90_v60 = vadd.f32 %v82_v49, %v56_v43  ;;  %v91_v61 = vadd.f32 %v83_v50, %v57_v44 }
  0x25   :  { %v92_v63 = vadd.f32 %v84_v53, %v58_v51  ;;  %v93_v0 = vadd.f32 %v85_v54, %v59_v52  ;;  %v94_v4 = vadd.f32 %v86_v56, %v60_v55  ;;  %v95_v6 = vadd.f32 %v87_v57, %v61_v62 }
  0x26   :  { %v96_v1 = vmax.f32 %v88_v58, 0.0  ;;  %v97_v2 = vmax.f32 %v89_v59, 0.0  ;;  %v98_v3 = vmax.f32 %v90_v60, 0.0  ;;  %v99_v5 = vmax.f32 %v91_v61, 0.0 }
  0x27   :  { %v100_v7 = vmax.f32 %v92_v63, 0.0  ;;  %v101_v8 = vmax.f32 %v93_v0, 0.0  ;;  %v102_v9 = vmax.f32 %v94_v4, 0.0  ;;  %v103_v10 = vmax.f32 %v95_v6, 0.0 }
  0x28   :  { %104 = vst [vmem:[%s236_s3] sm:$0xff] %v96_v1 }
  0x29   :  { %106 = vst.msk [vmem:[%s236_s3 + $0x8] sm:$0xff] %vm105_vm8, %v97_v2 }
  0x2a   :  { %107 = vst [vmem:[%s236_s3 + $0x10] sm:$0xff] %v98_v3 }
  0x2b   :  { %108 = vst.msk [vmem:[%s236_s3 + $0x18] sm:$0xff] %vm105_vm8, %v99_v5 }
  0x2c   :  { %109 = vst [vmem:[%s236_s3 + $0x20] sm:$0xff] %v100_v7 }
  0x2d   :  { %110 = vst.msk [vmem:[%s236_s3 + $0x28] sm:$0xff] %vm105_vm8, %v101_v8 }
  0x2e   :  { %111 = vst [vmem:[%s236_s3 + $0x30] sm:$0xff] %v102_v9 }
  0x2f   :  { %112 = vst.msk [vmem:[%s236_s3 + $0x38] sm:$0xff] %vm105_vm8, %v103_v10 }

// kernel: cbam_cnn_forward.16
= control target key start
LH: loop header
LB: loop body
LE: loop exit
PB: predicated region body
PF: predicated region fallthrough
CT: control target
= control target key end

     0   :  { %s1436_s12 = smov 0   ;;  %s1438_s13 = smov 0   ;;  %s1553_s0 = inlined_call_operand.vmem [shape: bf16[8,4096], index: 0, kind: input, shape index: {}]   ;;  %s1554_s1 = inlined_call_operand.vmem [shape: bf16[4096,128], index: 1, kind: input, shape index: {}]   ;;  %s1555_s2 = inlined_call_operand.vmem [shape: f32[1,128], index: 2, kind: input, shape index: {}]   ;;  %s1556_s3 = inlined_call_operand.vmem [shape: f32[8,128], index: 3, kind: output, shape index: {}]  }
   0x1   :  { %s1440_s14 = smov 0  }
   0x2 LB: > { %s25_s15 = sadd.s32 1, %s1409_s13  ;;  %p1035_p0 = scmp.ge.s32.totalorder %s1413_s14, 1  ;;  %s1413_s14 = sphi %s1440_s14, %s13_s14   ;;  %s1409_s13 = sphi %s1438_s13, %s1558_s13   ;;  %s1405_s12 = sphi %s1436_s12, %s1557_s12  }
   0x3   : > { %p26_p1 = scmp.ge.s32.totalorder %s25_s15, 4  ;;  %p189_p2 = scmp.lt.s32.totalorder %s1413_s14, 5 }
   0x5   : > { %s1560_s15 = smov (%p26_p1, %s25_s15), 0  ;;  %p190_p3 = pnand %p1035_p0, %p189_p2 }
   0x6   : > { %s1036_s16 = sshll.u32 (!%p190_p3), %s1405_s12, 3  ;;  %s1038_s17 = sshll.u32 (!%p190_p3), %s1405_s12, 7 }
   0x7   : > { %193 = sbr.rel (%p190_p3) target bundleno = 237 (0xed), region = 32  ;;  %p233_p4 = scmp.lt.s32.totalorder (!%p190_p3), %s1036_s16, 31 }
   0x8   : > { %p241_p5 = scmp.lt.s32.totalorder (!%p190_p3), %s1038_s17, 511  ;;  %p1040_p6 = scmp.ne.s32.totalorder (!%p190_p3), %s1405_s12, 0 }
   0xc   : > { %s1562_s16 = smov (!%p233_p4, %s1036_s16), 31  ;;  %s1564_s17 = smov (!%p241_p5, %s1038_s17), 511 }
   0xd   : > { %s1037_s18 = sshll.u32 %s1562_s16, 2  ;;  %s1039_s22 = sshll.u32 %s1564_s17, 2 }
   0xe   : > { %s1461_s21 = scalar_lea.vmem %s1553_s0, %s1037_s18  ;;  %s1466_s25 = scalar_lea.vmem %s1554_s1, %s1039_s22 }
   0xf   : > { %262 = sbr.rel (%p1040_p6) target bundleno = 22 (0x16), region = 36 }
  0x14   : > { %v1415_v0 = vmov 0.0  }
  0x15   : > { %263 = vst [vmem:[#allocation2] sm:$0xff] %v1415_v0 }
  0x16 PF: > { %v1308_v1 = vld [vmem:[%s1466_s25 + $0x38] sm:$0xff]  ;;  %v1307_v5 = vld [vmem:[%s1466_s25 + $0x30] sm:$0xff]  ;;  %v1306_v9 = vld [vmem:[%s1466_s25 + $0x28] sm:$0xff]  ;;  %p1297_p7 = scmp.ne.s32.totalorder %s1405_s12, 3 }
  0x17   : > { %v1316_v2 = vld [vmem:[%s1466_s25 + $0x78] sm:$0xff]  ;;  %809 = vmatpush.bf16.msra.mxu0 %v1308_v1  ;;  %v1315_v6 = vld [vmem:[%s1466_s25 + $0x70] sm:$0xff]  ;;  %v1314_v10 = vld [vmem:[%s1466_s25 + $0x68] sm:$0xff] }
  0x18   : > { %v1324_v3 = vld [vmem:[%s1466_s25 + $0xb8] sm:$0xff]  ;;  %822 = vmatpush.bf16.msra.mxu1 %v1316_v2  ;;  %v1323_v7 = vld [vmem:[%s1466_s25 + $0xb0] sm:$0xff]  ;;  %v1322_v11 = vld [vmem:[%s1466_s25 + $0xa8] sm:$0xff] }
  0x19   : > { %v1332_v4 = vld [vmem:[%s1466_s25 + $0xf8] sm:$0xff]  ;;  %835 = vmatpush.bf16.msra.mxu2 %v1324_v3  ;;  %v1331_v8 = vld [vmem:[%s1466_s25 + $0xf0] sm:$0xff]  ;;  %v1330_v12 = vld [vmem:[%s1466_s25 + $0xe8] sm:$0xff] }
  0x1a   : > { %848 = vmatpush.bf16.msra.mxu3 %v1332_v4  ;;  %v1305_v13 = vld [vmem:[%s1466_s25 + $0x20] sm:$0xff]  ;;  %v1304_v17 = vld [vmem:[%s1466_s25 + $0x18] sm:$0xff]  ;;  %v1303_v21 = vld [vmem:[%s1466_s25 + $0x10] sm:$0xff] }
  0x1b   : > { %810 = vmatpush.bf16.msra.mxu0 %v1307_v5  ;;  %v1313_v14 = vld [vmem:[%s1466_s25 + $0x60] sm:$0xff]  ;;  %v1312_v18 = vld [vmem:[%s1466_s25 + $0x58] sm:$0xff]  ;;  %v1311_v22 = vld [vmem:[%s1466_s25 + $0x50] sm:$0xff] }
  0x1c   : > { %823 = vmatpush.bf16.msra.mxu1 %v1315_v6  ;;  %v1321_v15 = vld [vmem:[%s1466_s25 + $0xa0] sm:$0xff]  ;;  %v1320_v19 = vld [vmem:[%s1466_s25 + $0x98] sm:$0xff]  ;;  %v1319_v23 = vld [vmem:[%s1466_s25 + $0x90] sm:$0xff] }
  0x1d   : > { %836 = vmatpush.bf16.msra.mxu2 %v1323_v7  ;;  %v1329_v16 = vld [vmem:[%s1466_s25 + $0xe0] sm:$0xff]  ;;  %v1328_v20 = vld [vmem:[%s1466_s25 + $0xd8] sm:$0xff]  ;;  %v1327_v24 = vld [vmem:[%s1466_s25 + $0xd0] sm:$0xff] }
  0x1e   : > { %849 = vmatpush.bf16.msra.mxu3 %v1331_v8  ;;  %v1302_v25 = vld [vmem:[%s1466_s25 + $0x8] sm:$0xff]  ;;  %v265_v30 = vld [vmem:[%s1461_s21] sm:$0xff]  ;;  %v1340_v39 = vld [vmem:[%s1466_s25 + $0x138] sm:$0xff] }
  0x1f   : > { %811 = vmatpush.bf16.msra.mxu0 %v1306_v9  ;;  %v1310_v26 = vld [vmem:[%s1466_s25 + $0x48] sm:$0xff]  ;;  %v1301_v31 = vld [vmem:[%s1466_s25] sm:$0xff]  ;;  %v401_v37 = vunpack.c.l.b16 %v265_v30  ;;  %v402_v38 = vunpack.c.h.b16 %v265_v30  ;;  %v1348_v40 = vld [vmem:[%s1466_s25 + $0x178] sm:$0xff] }
  0x20   : > { %824 = vmatpush.bf16.msra.mxu1 %v1314_v10  ;;  %v1318_v27 = vld [vmem:[%s1466_s25 + $0x88] sm:$0xff]  ;;  %v1309_v32 = vld [vmem:[%s1466_s25 + $0x40] sm:$0xff]  ;;  %v1356_v41 = vld [vmem:[%s1466_s25 + $0x1b8] sm:$0xff] }
  0x21   : > { %837 = vmatpush.bf16.msra.mxu2 %v1322_v11  ;;  %v1326_v28 = vld [vmem:[%s1466_s25 + $0xc8] sm:$0xff]  ;;  %v1317_v35 = vld [vmem:[%s1466_s25 + $0x80] sm:$0xff]  ;;  %v1364_v42 = vld [vmem:[%s1466_s25 + $0x1f8] sm:$0xff]  ;;  %v409_v45 = vpack.c.b16 %v401_v37, %v401_v37  ;;  %v410_v46 = vpack.c.b16 %v402_v38, %v402_v38 }
  0x22   : > { %850 = vmatpush.bf16.msra.mxu3 %v1330_v12  ;;  %v266_v29 = vld [vmem:[%s1461_s21 + $0x8] sm:$0xff]  ;;  %v1325_v36 = vld [vmem:[%s1466_s25 + $0xc0] sm:$0xff]  ;;  %v1339_v47 = vld [vmem:[%s1466_s25 + $0x130] sm:$0xff] }
  0x23   : > { %812 = vmatpush.bf16.msra.mxu0 %v1305_v13  ;;  %v403_v33 = vunpack.c.l.b16 %v266_v29  ;;  %v404_v34 = vunpack.c.h.b16 %v266_v29  ;;  %v1347_v48 = vld [vmem:[%s1466_s25 + $0x170] sm:$0xff]  ;;  %v1338_v51 = vld [vmem:[%s1466_s25 + $0x128] sm:$0xff]  ;;  %v1337_v55 = vld [vmem:[%s1466_s25 + $0x120] sm:$0xff] }
  0x24   : > { %825 = vmatpush.bf16.msra.mxu1 %v1313_v14  ;;  %v1355_v49 = vld [vmem:[%s1466_s25 + $0x1b0] sm:$0xff]  ;;  %v1346_v52 = vld [vmem:[%s1466_s25 + $0x168] sm:$0xff]  ;;  %v1345_v56 = vld [vmem:[%s1466_s25 + $0x160] sm:$0xff] }
  0x25   : > { %838 = vmatpush.bf16.msra.mxu2 %v1321_v15  ;;  %v411_v43 = vpack.c.b16 %v403_v33, %v403_v33  ;;  %v412_v44 = vpack.c.b16 %v404_v34, %v404_v34  ;;  %v1363_v50 = vld [vmem:[%s1466_s25 + $0x1f0] sm:$0xff]  ;;  %v1354_v53 = vld [vmem:[%s1466_s25 + $0x1a8] sm:$0xff]  ;;  %v1353_v57 = vld [vmem:[%s1466_s25 + $0x1a0] sm:$0xff] }
  0x26   : > { %851 = vmatpush.bf16.msra.mxu3 %v1329_v16  ;;  %v1362_v54 = vld [vmem:[%s1466_s25 + $0x1e8] sm:$0xff]  ;;  %v1361_v58 = vld [vmem:[%s1466_s25 + $0x1e0] sm:$0xff]  ;;  %v1336_v59 = vld [vmem:[%s1466_s25 + $0x118] sm:$0xff] }
  0x27   : > { %813 = vmatpush.bf16.msra.mxu0 %v1304_v17  ;;  %v1344_v60 = vld [vmem:[%s1466_s25 + $0x158] sm:$0xff]  ;;  %v1335_v63 = vld [vmem:[%s1466_s25 + $0x110] sm:$0xff]  ;;  %v1334_v3 = vld [vmem:[%s1466_s25 + $0x108] sm:$0xff] }
  0x28   : > { %826 = vmatpush.bf16.msra.mxu1 %v1312_v18  ;;  %v1352_v61 = vld [vmem:[%s1466_s25 + $0x198] sm:$0xff]  ;;  %v1343_v0 = vld [vmem:[%s1466_s25 + $0x150] sm:$0xff]  ;;  %v1342_v4 = vld [vmem:[%s1466_s25 + $0x148] sm:$0xff] }
  0x29   : > { %839 = vmatpush.bf16.msra.mxu2 %v1320_v19  ;;  %v1360_v62 = vld [vmem:[%s1466_s25 + $0x1d8] sm:$0xff]  ;;  %v1351_v1 = vld [vmem:[%s1466_s25 + $0x190] sm:$0xff]  ;;  %v1350_v6 = vld [vmem:[%s1466_s25 + $0x188] sm:$0xff] }
  0x2a   : > { %852 = vmatpush.bf16.msra.mxu3 %v1328_v20  ;;  %v1359_v2 = vld [vmem:[%s1466_s25 + $0x1d0] sm:$0xff]  ;;  %v1358_v7 = vld [vmem:[%s1466_s25 + $0x1c8] sm:$0xff]  ;;  %v268_v8 = vld [vmem:[%s1461_s21 + $0x18] sm:$0xff] }
  0x2b   : > { %814 = vmatpush.bf16.msra.mxu0 %v1303_v21  ;;  %v267_v5 = vld [vmem:[%s1461_s21 + $0x10] sm:$0xff]  ;;  %v1333_v11 = vld [vmem:[%s1466_s25 + $0x100] sm:$0xff]  ;;  %v407_v13 = vunpack.c.l.b16 %v268_v8  ;;  %v408_v14 = vunpack.c.h.b16 %v268_v8 }
  0x2c   : > { %827 = vmatpush.bf16.msra.mxu1 %v1311_v22  ;;  %v405_v9 = vunpack.c.l.b16 %v267_v5  ;;  %v406_v10 = vunpack.c.h.b16 %v267_v5  ;;  %v1341_v12 = vld [vmem:[%s1466_s25 + $0x140] sm:$0xff] }
  0x2d   : > { %840 = vmatpush.bf16.msra.mxu2 %v1319_v23  ;;  %v1349_v15 = vld [vmem:[%s1466_s25 + $0x180] sm:$0xff]  ;;  %v415_v19 = vpack.c.b16 %v407_v13, %v407_v13  ;;  %v416_v20 = vpack.c.b16 %v408_v14, %v408_v14 }
  0x2e   : > { %853 = vmatpush.bf16.msra.mxu3 %v1327_v24  ;;  %v1357_v16 = vld [vmem:[%s1466_s25 + $0x1c0] sm:$0xff]  ;;  %v413_v17 = vpack.c.b16 %v405_v9, %v405_v9  ;;  %v414_v18 = vpack.c.b16 %v406_v10, %v406_v10 }
  0x2f   : > { %815 = vmatpush.bf16.msra.mxu0 %v1302_v25 }
  0x30   : > { %828 = vmatpush.bf16.msra.mxu1 %v1310_v26 }
  0x31   : > { %841 = vmatpush.bf16.msra.mxu2 %v1318_v27 }
  0x32   : > { %854 = vmatpush.bf16.msra.mxu3 %v1326_v28 }
  0x33   : > { %816 = vmatpush.bf16.msra.mxu0 %v1301_v31 }
  0x34   : > { %829 = vmatpush.bf16.msra.mxu1 %v1309_v32 }
  0x35   : > { %842 = vmatpush.bf16.msra.mxu2 %v1317_v35 }
  0x36   : > { %855 = vmatpush.bf16.msra.mxu3 %v1325_v36  ;;  %817 = vmatmul.bf16.vlgmr.msra.gmra.mxu0 %v409_v45 }
  0x37   : > { %861 = vmatpush.bf16.msrb.mxu0 %v1340_v39  ;;  %830 = vmatmul.bf16.vlgmr.msra.gmra.mxu1 %v410_v46 }
  0x38   : > { %874 = vmatpush.bf16.msrb.mxu1 %v1348_v40  ;;  %843 = vmatmul.bf16.vlgmr.msra.gmra.mxu2 %v411_v43 }
  0x39   : > { %887 = vmatpush.bf16.msrb.mxu2 %v1356_v41  ;;  %856 = vmatmul.bf16.vlgmr.msra.gmra.mxu3 %v412_v44  ;;  %v264_v41 = vld [vmem:[#allocation2] sm:$0xff] }
  0x3a   : > { %900 = vmatpush.bf16.msrb.mxu3 %v1364_v42 }
  0x3b   : > { %862 = vmatpush.bf16.msrb.mxu0 %v1339_v47 }
  0x3c   : > { %875 = vmatpush.bf16.msrb.mxu1 %v1347_v48 }
  0x3d   : > { %888 = vmatpush.bf16.msrb.mxu2 %v1355_v49 }
  0x3e   : > { %901 = vmatpush.bf16.msrb.mxu3 %v1363_v50 }
  0x3f   : > { %863 = vmatpush.bf16.msrb.mxu0 %v1338_v51 }
  0x40   : > { %876 = vmatpush.bf16.msrb.mxu1 %v1346_v52 }
  0x41   : > { %889 = vmatpush.bf16.msrb.mxu2 %v1354_v53 }
  0x42   : > { %902 = vmatpush.bf16.msrb.mxu3 %v1362_v54 }
  0x43   : > { %864 = vmatpush.bf16.msrb.mxu0 %v1337_v55 }
  0x44   : > { %877 = vmatpush.bf16.msrb.mxu1 %v1345_v56 }
  0x45   : > { %890 = vmatpush.bf16.msrb.mxu2 %v1353_v57 }
  0x46   : > { %903 = vmatpush.bf16.msrb.mxu3 %v1361_v58 }
  0x47   : > { %865 = vmatpush.bf16.msrb.mxu0 %v1336_v59 }
  0x48   : > { %878 = vmatpush.bf16.msrb.mxu1 %v1344_v60 }
  0x49   : > { %891 = vmatpush.bf16.msrb.mxu2 %v1352_v61 }
  0x4a   : > { %904 = vmatpush.bf16.msrb.mxu3 %v1360_v62 }
  0x4b   : > { %866 = vmatpush.bf16.msrb.mxu0 %v1335_v63 }
  0x4c   : > { %879 = vmatpush.bf16.msrb.mxu1 %v1343_v0 }
  0x4d   : > { %892 = vmatpush.bf16.msrb.mxu2 %v1351_v1 }
  0x4e   : > { %905 = vmatpush.bf16.msrb.mxu3 %v1359_v2 }
  0x4f   : > { %867 = vmatpush.bf16.msrb.mxu0 %v1334_v3 }
  0x50   : > { %880 = vmatpush.bf16.msrb.mxu1 %v1342_v4 }
  0x51   : > { %893 = vmatpush.bf16.msrb.mxu2 %v1350_v6 }
  0x52   : > { %906 = vmatpush.bf16.msrb.mxu3 %v1358_v7 }
  0x53   : > { %868 = vmatpush.bf16.msrb.mxu0 %v1333_v11 }
  0x54   : > { %881 = vmatpush.bf16.msrb.mxu1 %v1341_v12 }
  0x55   : > { %894 = vmatpush.bf16.msrb.mxu2 %v1349_v15 }
  0x56   : > { %907 = vmatpush.bf16.msrb.mxu3 %v1357_v16  ;;  %869 = vmatmul.bf16.vlgmr.msrb.gmra.mxu0 %v413_v17 }
  0x57   : > { %882 = vmatmul.bf16.vlgmr.msrb.gmra.mxu1 %v414_v18 }
  0x58   : > { %895 = vmatmul.bf16.vlgmr.msrb.gmra.mxu2 %v415_v19 }
  0x59   : > { %908 = vmatmul.bf16.vlgmr.msrb.gmra.mxu3 %v416_v20 }
  0xb3   : > { %v818_v21 = vpop.f32.mrf.mxu0 }
  0xb4   : > { %v831_v22 = vpop.f32.mrf.mxu1 }
  0xb5   : > { %v832_v29 = vadd.f32 %v831_v22, %v818_v21 }
  0xbb   : > { %v844_v23 = vpop.f32.mrf.mxu2  ;;  %v820_v25 = vpop.f32.mrf.mxu0 }
  0xbc   : > { %v857_v24 = vpop.f32.mrf.mxu3  ;;  %v833_v26 = vpop.f32.mrf.mxu1  ;;  %v845_v30 = vadd.f32 %v844_v23, %v832_v29 }
  0xbe   : > { %v858_v31 = vadd.f32 %v857_v24, %v845_v30 }
  0xc3   : > { %v846_v27 = vpop.f32.mrf.mxu2 }
  0xc4   : > { %v859_v28 = vpop.f32.mrf.mxu3 }
  0xd3   : > { %v870_v32 = vpop.f32.mrf.mxu0 }
  0xd4   : > { %v883_v33 = vpop.f32.mrf.mxu1  ;;  %v871_v34 = vadd.f32 %v870_v32, %v858_v31 }
  0xd6   : > { %v884_v35 = vadd.f32 %v883_v33, %v871_v34 }
  0xdb   : > { %v896_v36 = vpop.f32.mrf.mxu2  ;;  %v872_v39 = vpop.f32.mrf.mxu0 }
  0xdc   : > { %v909_v37 = vpop.f32.mrf.mxu3  ;;  %v897_v38 = vadd.f32 %v896_v36, %v884_v35  ;;  %v885_v40 = vpop.f32.mrf.mxu1 }
  0xde   : > { %v910_v42 = vadd.f32 %v909_v37, %v897_v38 }
  0xe0   : > { %v913_v43 = vadd.f32 %v910_v42, %v264_v41  ;;  %918 = sbr.rel (%p1297_p7) target bundleno = 237 (0xed), region = 40 }
  0xe2   : > { %914 = vst [vmem:[#allocation2] sm:$0xff] %v913_v43 }
  0xe3   : > { %v898_v44 = vpop.f32.mrf.mxu2 }
  0xe4   : > { %v911_v45 = vpop.f32.mrf.mxu3 }
  0xe5   : > { %v1390_v47 = vld [vmem:[%s1555_s2] ss:$0 sm:$0xff] }
  0xe9   : > { %v919_v46 = vld [vmem:[#allocation2] sm:$0xff] }
  0xea   : > { %v924_v48 = vadd.f32 %v1390_v47, %v919_v46 }
  0xec   : > { %925 = vst [vmem:[%s1556_s3] sm:$0xff] %v924_v48 }
  0xed PF: > { %s13_s14 = sadd.s32 1, %s1413_s14   ;;  %s1557_s12 = smov %s1409_s13 }
  0xee   : > { %p10_p8 = scmp.ge.s32.totalorder %s13_s14, 6   ;;  %s1558_s13 = smov %s1560_s15 }
  0xf0   :  { %12 = sbr.rel (!%p10_p8) target bundleno = 2 (0x2), region = 76 }

// kernel: cbam_cnn_forward.17
= control target key start
LH: loop header
LB: loop body
LE: loop exit
PB: predicated region body
PF: predicated region fallthrough
CT: control target
= control target key end

     0   :  { %s208_s1 = inlined_call_operand.vmem [shape: bf16[128,128], index: 1, kind: input, shape index: {}]   ;;  %s209_s2 = inlined_call_operand.vmem [shape: f32[1,128], index: 2, kind: input, shape index: {}]   ;;  %s210_s0 = inlined_call_operand.vmem [shape: bf16[8,128], index: 0, kind: input, shape index: {}]   ;;  %s211_s3 = inlined_call_operand.vmem [shape: f32[8,128], index: 3, kind: output, shape index: {}]  }
   0x1   :  { %v153_v0 = vld [vmem:[%s208_s1 + $0x38] sm:$0xff]  ;;  %v152_v1 = vld [vmem:[%s208_s1 + $0x30] sm:$0xff]  ;;  %v151_v2 = vld [vmem:[%s208_s1 + $0x28] sm:$0xff] }
   0x2   :  { %85 = vmatpush.bf16.msra.mxu0 %v153_v0  ;;  %v150_v3 = vld [vmem:[%s208_s1 + $0x20] sm:$0xff]  ;;  %v149_v4 = vld [vmem:[%s208_s1 + $0x18] sm:$0xff]  ;;  %v148_v5 = vld [vmem:[%s208_s1 + $0x10] sm:$0xff] }
   0x3   :  { %v147_v6 = vld [vmem:[%s208_s1 + $0x8] sm:$0xff]  ;;  %v146_v7 = vld [vmem:[%s208_s1] sm:$0xff] }
   0x4   :  { %v20_v8 = vld [vmem:[%s210_s0] sm:$0xf] }
   0x5   :  { %v154_v9 = vld [vmem:[%s209_s2] ss:$0 sm:$0xff] }
   0x6   :  { %86 = vmatpush.bf16.msra.mxu0 %v152_v1 }
   0xa   :  { %87 = vmatpush.bf16.msra.mxu0 %v151_v2 }
   0xe   :  { %88 = vmatpush.bf16.msra.mxu0 %v150_v3 }
  0x12   :  { %89 = vmatpush.bf16.msra.mxu0 %v149_v4 }
  0x16   :  { %90 = vmatpush.bf16.msra.mxu0 %v148_v5 }
  0x1a   :  { %91 = vmatpush.bf16.msra.mxu0 %v147_v6 }
  0x1e   :  { %92 = vmatpush.bf16.msra.mxu0 %v146_v7 }
  0x21   :  { %93 = vmatmul.bf16.vlgmr.msra.gmra.mxu0 %v20_v8 }
  0x9e   :  { %v94_v10 = vpop.f32.mrf.mxu0 }
  0x9f   :  { %v108_v11 = vadd.f32 %v154_v9, %v94_v10 }
  0xa1   :  { %109 = vst [vmem:[%s211_s3] sm:$0xff] %v108_v11 }
  0xa6   :  { %v96_v12 = vpop.f32.mrf.mxu0 }

</bundles_post_ra>
